<compile_context>
chip_gen: v5e
topology: v5e:2x2
jax: 0.10.0
libtpu: 0.0.40
codegen_flags: <defaults>
</compile_context>

<pallas_src>
from functools import partial

import jax
import jax.numpy as jnp
from jax.experimental import pallas as pl
from jax.experimental.pallas import tpu as pltpu

LN_EPS = 1e-5


# ----------------------------- small in-kernel helpers -----------------------------
def _gelu(x):
    # TODO(synk): PyTorch nn.GELU default is the exact erf formulation; tanh approximation
    # is used here for a guaranteed Mosaic lowering (max abs diff ~1e-3).
    return 0.5 * x * (1.0 + jnp.tanh(0.7978845608028654 * (x + 0.044715 * x * x * x)))


def _layernorm(x, gamma, beta):
    mu = jnp.mean(x, axis=-1, keepdims=True)
    var = jnp.mean((x - mu) ** 2, axis=-1, keepdims=True)
    return (x - mu) * jax.lax.rsqrt(var + LN_EPS) * gamma + beta


def _small_k_matmul(x, w, b):
    # (R, K) @ (K, C) with tiny K (=3) done as K VPU broadcast-FMAs: keeps the MXU free and
    # avoids a K<<128 systolic fill.
    acc = x[:, 0:1] * w[0:1, :]
    for ci in range(1, w.shape[0]):
        acc = acc + x[:, ci:ci + 1] * w[ci:ci + 1, :]
    return acc + b


def _full_spec(a):
    # whole-array spec for a 1-axis grid
    return pl.BlockSpec(a.shape, lambda i, _nd=a.ndim: (0,) * _nd)


def _pick_tile(total, target):
    # largest divisor of `total` that is <= target and a multiple of 8 (or the whole axis)
    for t in range(min(total, target), 0, -1):
        if total % t == 0 and (t % 8 == 0 or t == total):
            return t
    return total


# ----------------------------- Encoder kernel (TG groups / step, reduce_dim fused) -----------
def _encoder_kernel(pg_ref, w1, b1, s1, t1, w2, b2, w3g, w3l, b3, s2, t2, w4, b4,
                    wred, bred, out_ref, *, tg, n):
    bf16 = jnp.bfloat16
    x = pg_ref[...].reshape(tg * n, pg_ref.shape[-1])                       # (TG*n, point_dims)
    h = _small_k_matmul(x, w1[...], b1[...])                                # Conv1d 3->128 (VPU)
    h = jnp.maximum(h * s1[...] + t1[...], 0.0)                             # BN (folded) + ReLU
    f = jnp.dot(h.astype(bf16), w2[...], preferred_element_type=jnp.float32) + b2[...]  # 128->256
    fg = jnp.max(f.reshape(tg, n, f.shape[-1]), axis=1)                     # per-group max (TG,256)
    # concat([global, local], channel) @ W3  ==  global @ W3_g + local @ W3_l
    g_term = jnp.dot(fg.astype(bf16), w3g[...], preferred_element_type=jnp.float32)      # (TG,512)
    l_term = jnp.dot(f.astype(bf16), w3l[...], preferred_element_type=jnp.float32)       # (TG*n,512)
    h2 = l_term.reshape(tg, n, l_term.shape[-1]) + g_term[:, None, :] + b3[...]
    h2 = jnp.maximum(h2 * s2[...] + t2[...], 0.0)                           # BN + ReLU
    f2 = jnp.dot(h2.reshape(tg * n, h2.shape[-1]).astype(bf16), w4[...],
                 preferred_element_type=jnp.float32) + b4[...]              # 512->enc
    feat = jnp.max(f2.reshape(tg, n, f2.shape[-1]), axis=1)                 # per-group max (TG,enc)
    # fused reduce_dim linear epilogue -> lane-dense (TG, trans_dim) store
    out_ref[...] = jnp.dot(feat.astype(bf16), wred[...],
                           preferred_element_type=jnp.float32) + bred[...]


def encoder_forward(point_groups, p):
    BG, n, c = point_groups.shape
    D = p["wred"].shape[1]
    TG = _pick_tile(BG, 64)                      # 16-64 groups / step -> M = TG*n matmul rows
    names = ("w1", "b1", "s1", "t1", "w2", "b2", "w3g", "w3l", "b3",
             "s2", "t2", "w4", "b4", "wred", "bred")
    weights = [p[k] for k in names]
    kern = partial(_encoder_kernel, tg=TG, n=n)
    return pl.pallas_call(
        kern,
        grid=(BG // TG,),
        in_specs=[pl.BlockSpec((TG, n, c), lambda i: (i, 0, 0))]
                 + [_full_spec(w) for w in weights],
        out_specs=pl.BlockSpec((TG, D), lambda i: (i, 0)),
        out_shape=jax.ShapeDtypeStruct((BG, D), jnp.float32),
        compiler_params=pltpu.CompilerParams(dimension_semantics=("parallel",)),
    )(point_groups, *weights)


# ----------------------------- pos_embed kernel (row-tiled) -----------------------------
def _pos_embed_kernel(c_ref, w1, b1, w2, b2, o_ref):
    c = c_ref[...]
    h = _gelu(_small_k_matmul(c, w1[...], b1[...]))                         # Linear 3->128 + GELU
    o_ref[...] = jnp.dot(h.astype(jnp.bfloat16), w2[...],
                         preferred_element_type=jnp.float32) + b2[...]      # Linear 128->D


def pos_embed(center2d, p):
    BG, c = center2d.shape
    D = p["w2"].shape[1]
    TM = _pick_tile(BG, 256)
    weights = [p["w1"], p["b1"], p["w2"], p["b2"]]
    return pl.pallas_call(
        _pos_embed_kernel,
        grid=(BG // TM,),
        in_specs=[pl.BlockSpec((TM, c), lambda i: (i, 0))]
                 + [_full_spec(w) for w in weights],
        out_specs=pl.BlockSpec((TM, D), lambda i: (i, 0)),
        out_shape=jax.ShapeDtypeStruct((BG, D), jnp.float32),
        compiler_params=pltpu.CompilerParams(dimension_semantics=("parallel",)),
    )(center2d, *weights)


# ----------------- fused transformer stack: grid (B, depth), final LN in epilogue -------------
def _blocks_kernel(x_ref, pos_ref, g1, b1, wqkv, wproj, bproj, g2, b2,
                   wm1, bm1, wm2, bm2, gfin, bfin, o_ref, *, num_heads, dim):
    bf16 = jnp.bfloat16
    d = pl.program_id(1)
    H = num_heads
    hd = dim // H
    scale = hd ** (-0.5)

    @pl.when(d == 0)
    def _():
        o_ref[0] = x_ref[0]                       # seed resident activation with input tokens

    x = o_ref[0] + pos_ref[0]                     # pos is re-added every block (Point-BERT)
    h = _layernorm(x, g1[0], b1[0])
    qkv = jnp.dot(h.astype(bf16), wqkv[0], preferred_element_type=jnp.float32)   # (S, 3D)

    # head-batched attention: one batched QK^T, one batched AV, single full-width projection
    q = jnp.stack([qkv[:, hi * hd:(hi + 1) * hd] for hi in range(H)], axis=0)            # (H,S,hd)
    k = jnp.stack([qkv[:, dim + hi * hd: dim + (hi + 1) * hd] for hi in range(H)], axis=0)
    v = jnp.stack([qkv[:, 2 * dim + hi * hd: 2 * dim + (hi + 1) * hd] for hi in range(H)], axis=0)
    a = jnp.einsum('hqd,hkd->hqk', q.astype(bf16), k.astype(bf16),
                   preferred_element_type=jnp.float32) * scale
    a = jax.nn.softmax(a, axis=-1)
    o_h = jnp.einsum('hqk,hkd->hqd', a.astype(bf16), v.astype(bf16),
                     preferred_element_type=jnp.float32)                                  # (H,S,hd)
    attn = jnp.concatenate([o_h[hi] for hi in range(H)], axis=-1)                         # (S, D)
    x = x + jnp.dot(attn.astype(bf16), wproj[0],
                    preferred_element_type=jnp.float32) + bproj[0]

    h2 = _layernorm(x, g2[0], b2[0])
    m = _gelu(jnp.dot(h2.astype(bf16), wm1[0], preferred_element_type=jnp.float32) + bm1[0])
    m = jnp.dot(m.astype(bf16), wm2[0], preferred_element_type=jnp.float32) + bm2[0]
    y = x + m
    o_ref[0] = y

    @pl.when(d == pl.num_programs(1) - 1)
    def _():
        o_ref[0] = _layernorm(y, gfin[...], bfin[...])        # fused final LayerNorm


def transformer_blocks(x, pos, bp, norm_g, norm_b, num_heads):
    # TODO(synk): for very small B*S*D, pack several batch elements per grid step to raise
    # sublane occupancy (at production S=513, D=384 one batch element per step is adequate).
    B, S, D = x.shape
    depth = bp["wqkv"].shape[0]
    names = ("g1", "b1", "wqkv", "wproj", "bproj", "g2", "b2", "wm1", "bm1", "wm2", "bm2")
    ws = [bp[k] for k in names]
    # stream one block's weights per depth step (keeps VMEM residency to one block: v7x-safe)
    w_specs = [pl.BlockSpec((1,) + tuple(w.shape[1:]),
                            lambda b, d, _nd=w.ndim: (d,) + (0,) * (_nd - 1))
               for w in ws]
    kern = partial(_blocks_kernel, num_heads=num_heads, dim=D)
    return pl.pallas_call(
        kern,
        grid=(B, depth),
        in_specs=[pl.BlockSpec((1, S, D), lambda b, d: (b, 0, 0)),
                  pl.BlockSpec((1, S, D), lambda b, d: (b, 0, 0))]
                 + w_specs
                 + [pl.BlockSpec((1, D), lambda b, d: (0, 0)),
                    pl.BlockSpec((1, D), lambda b, d: (0, 0))],
        out_specs=pl.BlockSpec((1, S, D), lambda b, d: (b, 0, 0)),
        out_shape=jax.ShapeDtypeStruct((B, S, D), jnp.float32),
        compiler_params=pltpu.CompilerParams(
            dimension_semantics=("parallel", "arbitrary")),
    )(x, pos, *ws, norm_g, norm_b)


# ----------------------------- Group (FPS + kNN) : plain-JAX glue -----------------------------
def fps_jax(xyz, num_samples):
    """Furthest point sampling, deterministic start at index 0 (as pointnet2 CUDA op)."""
    # TODO(synk): sequential data-dependent argmax loop; no clean Pallas equivalent.
    B, N, _ = xyz.shape

    def one(x):
        def body(i, carry):
            dist, farthest, idxs = carry
            idxs = idxs.at[i].set(farthest)
            dnew = jnp.sum((x - x[farthest]) ** 2, axis=-1)
            dist = jnp.minimum(dist, dnew)
            return dist, jnp.argmax(dist).astype(jnp.int32), idxs

        init = (jnp.full((N,), 1e10, jnp.float32), jnp.int32(0),
                jnp.zeros((num_samples,), jnp.int32))
        _, _, idxs = jax.lax.fori_loop(0, num_samples, body, init)
        return idxs

    idx = jax.vmap(one)(xyz)
    return jnp.take_along_axis(xyz, idx[:, :, None], axis=1)          # (B, G, 3)


def group_points(xyz, num_group, group_size):
    """Group.forward for point_dims == 3: FPS centers, kNN gather, recenter."""
    # TODO(synk): top_k tie-breaking may differ from the CUDA KNN op for tied distances.
    center = fps_jax(xyz, num_group)                                   # (B, G, 3)
    d2 = jnp.sum((center[:, :, None, :] - xyz[:, None, :, :]) ** 2, axis=-1)  # (B, G, N)
    _, idx = jax.lax.top_k(-d2, group_size)                            # (B, G, k)
    neigh = jax.vmap(lambda x, i: x[i])(xyz, idx)                      # (B, G, k, 3)
    neigh = neigh - center[:, :, None, :]
    return neigh, center


# ----------------------------- PointEncoder forward -----------------------------
def point_encoder_forward(pts, params, cfg):
    B, N, C = pts.shape
    G, M, D = cfg["num_group"], cfg["group_size"], cfg["trans_dim"]
    neighborhood, center = group_points(pts, G, M)                     # (B,G,M,3), (B,G,3)

    pg = neighborhood.reshape(B * G, M, C)
    tokens = encoder_forward(pg, params["encoder"])                    # (B*G, D) reduce_dim fused
    tokens = tokens.reshape(B, G, D)

    pos = pos_embed(center.reshape(B * G, 3), params["pos_embed"]).reshape(B, G, D)

    cls_tok = jnp.broadcast_to(params["cls_token"], (B, 1, D))
    cls_pos = jnp.broadcast_to(params["cls_pos"], (B, 1, D))
    x = jnp.concatenate([cls_tok, tokens], axis=1)                     # (B, G+1, D)
    pos = jnp.concatenate([cls_pos, pos], axis=1)

    x = transformer_blocks(x, pos, params["blocks"],
                           params["norm_g"], params["norm_b"], cfg["num_heads"])
    # use_max_pool=False path: `return self.out(x)`
    # TODO(synk): `self.out` is never defined in PointEncoder.__init__; treated as identity.
    return x


# ----------------------------- deterministic parameter init -----------------------------
def init_params(key, cfg):
    D, enc, pd = cfg["trans_dim"], cfg["encoder_dims"], cfg["point_dims"]
    depth = cfg["depth"]
    keys = iter(jax.random.split(key, 128))
    bf16 = jnp.bfloat16

    def nrm(shape, s=0.02, dtype=jnp.float32):
        return (jax.random.normal(next(keys), shape, jnp.float32) * s).astype(dtype)

    # TODO(synk): BatchNorm1d reproduced in eval mode (running_mean=0, running_var=1) folded
    # into per-channel scale/bias; training-mode batch statistics are not computed.
    def bn(c, eps=1e-5):
        gamma = jnp.ones((1, c), jnp.float32) + nrm((1, c))
        beta = nrm((1, c))
        return gamma / jnp.sqrt(1.0 + eps), beta

    s1, t1 = bn(128)
    s2, t2 = bn(512)
    encoder = dict(
        w1=nrm((pd, 128)), b1=nrm((1, 128)), s1=s1, t1=t1,
        w2=nrm((128, 256), dtype=bf16), b2=nrm((1, 256)),
        w3g=nrm((256, 512), dtype=bf16), w3l=nrm((256, 512), dtype=bf16),
        b3=nrm((1, 512)), s2=s2, t2=t2,
        w4=nrm((512, enc), dtype=bf16), b4=nrm((1, enc)),
        wred=nrm((enc, D), dtype=bf16), bred=nrm((1, D)),          # fused reduce_dim linear
    )
    pos_embed_p = dict(w1=nrm((3, 128)), b1=nrm((1, 128)),
                       w2=nrm((128, D), dtype=bf16), b2=nrm((1, D)))
    blocks = dict(   # weights stacked along a leading depth axis for per-step streaming
        g1=jnp.ones((depth, 1, D), jnp.float32), b1=jnp.zeros((depth, 1, D), jnp.float32),
        wqkv=nrm((depth, D, 3 * D), dtype=bf16),                   # qkv_bias=False
        wproj=nrm((depth, D, D), dtype=bf16), bproj=nrm((depth, 1, D)),
        g2=jnp.ones((depth, 1, D), jnp.float32), b2=jnp.zeros((depth, 1, D), jnp.float32),
        wm1=nrm((depth, D, 4 * D), dtype=bf16), bm1=nrm((depth, 1, 4 * D)),
        wm2=nrm((depth, 4 * D, D), dtype=bf16), bm2=nrm((depth, 1, D)),
    )
    return dict(
        encoder=encoder,
        cls_token=jnp.zeros((1, 1, D), jnp.float32),    # nn.Parameter(torch.zeros(...))
        cls_pos=nrm((1, 1, D), s=1.0),                  # nn.Parameter(torch.randn(...))
        pos_embed=pos_embed_p,
        blocks=blocks,
        norm_g=jnp.ones((1, D), jnp.float32),
        norm_b=jnp.zeros((1, D), jnp.float32),
    )


if __name__ == "__main__":
    cfg = dict(trans_dim=32, depth=2, drop_path_rate=0.0, num_heads=4,
               group_size=8, num_group=8, point_dims=3, encoder_dims=64)
    key = jax.random.PRNGKey(0)
    kp, kx = jax.random.split(key)
    params = init_params(kp, cfg)
    pts = jax.random.normal(kx, (2, 32, 3), jnp.float32)               # B=2, N=32, C=3

    out = point_encoder_forward(pts, params, cfg)
    out = jax.block_until_ready(out)
    assert out.shape == (2, cfg["num_group"] + 1, cfg["trans_dim"])
    assert bool(jnp.all(jnp.isfinite(out)))
    print("KERNEL_OK")
</pallas_src>

<mosaic_0001>
module attributes {stable_mosaic.version = 11 : i64} {
  func.func @_encoder_kernel(%arg0: i32, %arg1: memref<16x8x3xf32, #tpu.memory_space<vmem>>, %arg2: memref<3x128xf32, #tpu.memory_space<vmem>>, %arg3: memref<1x128xf32, #tpu.memory_space<vmem>>, %arg4: memref<1x128xf32, #tpu.memory_space<vmem>>, %arg5: memref<1x128xf32, #tpu.memory_space<vmem>>, %arg6: memref<128x256xbf16, #tpu.memory_space<vmem>>, %arg7: memref<1x256xf32, #tpu.memory_space<vmem>>, %arg8: memref<256x512xbf16, #tpu.memory_space<vmem>>, %arg9: memref<256x512xbf16, #tpu.memory_space<vmem>>, %arg10: memref<1x512xf32, #tpu.memory_space<vmem>>, %arg11: memref<1x512xf32, #tpu.memory_space<vmem>>, %arg12: memref<1x512xf32, #tpu.memory_space<vmem>>, %arg13: memref<512x64xbf16, #tpu.memory_space<vmem>>, %arg14: memref<1x64xf32, #tpu.memory_space<vmem>>, %arg15: memref<64x32xbf16, #tpu.memory_space<vmem>>, %arg16: memref<1x32xf32, #tpu.memory_space<vmem>>, %arg17: memref<16x32xf32, #tpu.memory_space<vmem>>) attributes {dimension_semantics = [#tpu.dimension_semantics<parallel>], iteration_bounds = array<i64: 1>, scalar_prefetch = 0 : i64, scratch_operands = 0 : i64, tpu.core_type = #tpu.core_type<tc>, window_params = [{transform_indices = @transform_0, window_bounds = array<i64: 16, 8, 3>}, {pipeline_mode = #tpu.pipeline_mode<synchronous>, transform_indices = @transform_1, window_bounds = array<i64: 3, 128>}, {pipeline_mode = #tpu.pipeline_mode<synchronous>, transform_indices = @transform_2, window_bounds = array<i64: 1, 128>}, {pipeline_mode = #tpu.pipeline_mode<synchronous>, transform_indices = @transform_3, window_bounds = array<i64: 1, 128>}, {pipeline_mode = #tpu.pipeline_mode<synchronous>, transform_indices = @transform_4, window_bounds = array<i64: 1, 128>}, {pipeline_mode = #tpu.pipeline_mode<synchronous>, transform_indices = @transform_5, window_bounds = array<i64: 128, 256>}, {pipeline_mode = #tpu.pipeline_mode<synchronous>, transform_indices = @transform_6, window_bounds = array<i64: 1, 256>}, {pipeline_mode = #tpu.pipeline_mode<synchronous>, transform_indices = @transform_7, window_bounds = array<i64: 256, 512>}, {pipeline_mode = #tpu.pipeline_mode<synchronous>, transform_indices = @transform_8, window_bounds = array<i64: 256, 512>}, {pipeline_mode = #tpu.pipeline_mode<synchronous>, transform_indices = @transform_9, window_bounds = array<i64: 1, 512>}, {pipeline_mode = #tpu.pipeline_mode<synchronous>, transform_indices = @transform_10, window_bounds = array<i64: 1, 512>}, {pipeline_mode = #tpu.pipeline_mode<synchronous>, transform_indices = @transform_11, window_bounds = array<i64: 1, 512>}, {pipeline_mode = #tpu.pipeline_mode<synchronous>, transform_indices = @transform_12, window_bounds = array<i64: 512, 64>}, {pipeline_mode = #tpu.pipeline_mode<synchronous>, transform_indices = @transform_13, window_bounds = array<i64: 1, 64>}, {pipeline_mode = #tpu.pipeline_mode<synchronous>, transform_indices = @transform_14, window_bounds = array<i64: 64, 32>}, {pipeline_mode = #tpu.pipeline_mode<synchronous>, transform_indices = @transform_15, window_bounds = array<i64: 1, 32>}, {transform_indices = @transform_16, window_bounds = array<i64: 16, 32>}]} {
    %c0 = arith.constant 0 : index
    %c0_0 = arith.constant 0 : index
    %c0_1 = arith.constant 0 : index
    %0 = vector.load %arg1[%c0, %c0_0, %c0_1] : memref<16x8x3xf32, #tpu.memory_space<vmem>>, vector<16x8x3xf32>
    %1 = vector.shape_cast %0 : vector<16x8x3xf32> to vector<128x3xf32>
    %c0_2 = arith.constant 0 : index
    %c0_3 = arith.constant 0 : index
    %2 = vector.load %arg2[%c0_2, %c0_3] : memref<3x128xf32, #tpu.memory_space<vmem>>, vector<3x128xf32>
    %c0_4 = arith.constant 0 : index
    %c0_5 = arith.constant 0 : index
    %3 = vector.load %arg3[%c0_4, %c0_5] : memref<1x128xf32, #tpu.memory_space<vmem>>, vector<1x128xf32>
    %4 = vector.extract_strided_slice %1 {offsets = [0, 0], sizes = [128, 1], strides = [1, 1]} : vector<128x3xf32> to vector<128x1xf32>
    %5 = vector.extract_strided_slice %2 {offsets = [0, 0], sizes = [1, 128], strides = [1, 1]} : vector<3x128xf32> to vector<1x128xf32>
    %6 = vector.broadcast %4 : vector<128x1xf32> to vector<128x128xf32>
    %7 = vector.broadcast %5 : vector<1x128xf32> to vector<128x128xf32>
    %8 = arith.mulf %6, %7 : vector<128x128xf32>
    %9 = vector.extract_strided_slice %1 {offsets = [0, 1], sizes = [128, 1], strides = [1, 1]} : vector<128x3xf32> to vector<128x1xf32>
    %10 = vector.extract_strided_slice %2 {offsets = [1, 0], sizes = [1, 128], strides = [1, 1]} : vector<3x128xf32> to vector<1x128xf32>
    %11 = vector.broadcast %9 : vector<128x1xf32> to vector<128x128xf32>
    %12 = vector.broadcast %10 : vector<1x128xf32> to vector<128x128xf32>
    %13 = arith.mulf %11, %12 : vector<128x128xf32>
    %14 = arith.addf %8, %13 : vector<128x128xf32>
    %15 = vector.extract_strided_slice %1 {offsets = [0, 2], sizes = [128, 1], strides = [1, 1]} : vector<128x3xf32> to vector<128x1xf32>
    %16 = vector.extract_strided_slice %2 {offsets = [2, 0], sizes = [1, 128], strides = [1, 1]} : vector<3x128xf32> to vector<1x128xf32>
    %17 = vector.broadcast %15 : vector<128x1xf32> to vector<128x128xf32>
    %18 = vector.broadcast %16 : vector<1x128xf32> to vector<128x128xf32>
    %19 = arith.mulf %17, %18 : vector<128x128xf32>
    %20 = arith.addf %14, %19 : vector<128x128xf32>
    %21 = vector.broadcast %3 : vector<1x128xf32> to vector<128x128xf32>
    %22 = arith.addf %20, %21 : vector<128x128xf32>
    %c0_6 = arith.constant 0 : index
    %c0_7 = arith.constant 0 : index
    %23 = vector.load %arg4[%c0_6, %c0_7] : memref<1x128xf32, #tpu.memory_space<vmem>>, vector<1x128xf32>
    %24 = vector.broadcast %23 : vector<1x128xf32> to vector<128x128xf32>
    %25 = arith.mulf %22, %24 : vector<128x128xf32>
    %c0_8 = arith.constant 0 : index
    %c0_9 = arith.constant 0 : index
    %26 = vector.load %arg5[%c0_8, %c0_9] : memref<1x128xf32, #tpu.memory_space<vmem>>, vector<1x128xf32>
    %27 = vector.broadcast %26 : vector<1x128xf32> to vector<128x128xf32>
    %28 = arith.addf %25, %27 : vector<128x128xf32>
    %cst = arith.constant 0.000000e+00 : f32
    %29 = vector.broadcast %cst : f32 to vector<128x128xf32>
    %30 = arith.maximumf %28, %29 : vector<128x128xf32>
    %31 = arith.truncf %30 : vector<128x128xf32> to vector<128x128xbf16>
    %c0_10 = arith.constant 0 : index
    %c0_11 = arith.constant 0 : index
    %32 = vector.load %arg6[%c0_10, %c0_11] : memref<128x256xbf16, #tpu.memory_space<vmem>>, vector<128x256xbf16>
    %cst_12 = arith.constant dense<0.000000e+00> : vector<128x256xf32>
    %33 = tpu.matmul %31, %32, %cst_12 {dimension_numbers = #tpu.dot_dimension_numbers<[1], [0], [0], [1], [0, 0, 1, 1], [], []>} : vector<128x128xbf16>, vector<128x256xbf16>, vector<128x256xf32> -> vector<128x256xf32>
    %c0_13 = arith.constant 0 : index
    %c0_14 = arith.constant 0 : index
    %34 = vector.load %arg7[%c0_13, %c0_14] : memref<1x256xf32, #tpu.memory_space<vmem>>, vector<1x256xf32>
    %35 = vector.broadcast %34 : vector<1x256xf32> to vector<128x256xf32>
    %36 = arith.addf %33, %35 : vector<128x256xf32>
    %37 = vector.shape_cast %36 : vector<128x256xf32> to vector<16x8x256xf32>
    %cst_15 = arith.constant dense<0xFF800000> : vector<16x256xf32>
    %38 = vector.multi_reduction <maximumf>, %37, %cst_15 [1] : vector<16x8x256xf32> to vector<16x256xf32>
    %39 = arith.truncf %38 : vector<16x256xf32> to vector<16x256xbf16>
    %c0_16 = arith.constant 0 : index
    %c0_17 = arith.constant 0 : index
    %40 = vector.load %arg8[%c0_16, %c0_17] : memref<256x512xbf16, #tpu.memory_space<vmem>>, vector<256x512xbf16>
    %cst_18 = arith.constant dense<0.000000e+00> : vector<16x512xf32>
    %41 = tpu.matmul %39, %40, %cst_18 {dimension_numbers = #tpu.dot_dimension_numbers<[1], [0], [0], [1], [0, 0, 1, 1], [], []>} : vector<16x256xbf16>, vector<256x512xbf16>, vector<16x512xf32> -> vector<16x512xf32>
    %42 = arith.truncf %36 : vector<128x256xf32> to vector<128x256xbf16>
    %c0_19 = arith.constant 0 : index
    %c0_20 = arith.constant 0 : index
    %43 = vector.load %arg9[%c0_19, %c0_20] : memref<256x512xbf16, #tpu.memory_space<vmem>>, vector<256x512xbf16>
    %cst_21 = arith.constant dense<0.000000e+00> : vector<128x512xf32>
    %44 = tpu.matmul %42, %43, %cst_21 {dimension_numbers = #tpu.dot_dimension_numbers<[1], [0], [0], [1], [0, 0, 1, 1], [], []>} : vector<128x256xbf16>, vector<256x512xbf16>, vector<128x512xf32> -> vector<128x512xf32>
    %45 = vector.shape_cast %44 : vector<128x512xf32> to vector<16x8x512xf32>
    %46 = vector.shape_cast %41 : vector<16x512xf32> to vector<16x1x512xf32>
    %47 = vector.broadcast %46 : vector<16x1x512xf32> to vector<16x8x512xf32>
    %48 = arith.addf %45, %47 : vector<16x8x512xf32>
    %c0_22 = arith.constant 0 : index
    %c0_23 = arith.constant 0 : index
    %49 = vector.load %arg10[%c0_22, %c0_23] : memref<1x512xf32, #tpu.memory_space<vmem>>, vector<1x512xf32>
    %50 = vector.shape_cast %49 : vector<1x512xf32> to vector<1x1x512xf32>
    %51 = vector.broadcast %50 : vector<1x1x512xf32> to vector<16x8x512xf32>
    %52 = arith.addf %48, %51 : vector<16x8x512xf32>
    %c0_24 = arith.constant 0 : index
    %c0_25 = arith.constant 0 : index
    %53 = vector.load %arg11[%c0_24, %c0_25] : memref<1x512xf32, #tpu.memory_space<vmem>>, vector<1x512xf32>
    %54 = vector.shape_cast %53 : vector<1x512xf32> to vector<1x1x512xf32>
    %55 = vector.broadcast %54 : vector<1x1x512xf32> to vector<16x8x512xf32>
    %56 = arith.mulf %52, %55 : vector<16x8x512xf32>
    %c0_26 = arith.constant 0 : index
    %c0_27 = arith.constant 0 : index
    %57 = vector.load %arg12[%c0_26, %c0_27] : memref<1x512xf32, #tpu.memory_space<vmem>>, vector<1x512xf32>
    %58 = vector.shape_cast %57 : vector<1x512xf32> to vector<1x1x512xf32>
    %59 = vector.broadcast %58 : vector<1x1x512xf32> to vector<16x8x512xf32>
    %60 = arith.addf %56, %59 : vector<16x8x512xf32>
    %cst_28 = arith.constant 0.000000e+00 : f32
    %61 = vector.broadcast %cst_28 : f32 to vector<16x8x512xf32>
    %62 = arith.maximumf %60, %61 : vector<16x8x512xf32>
    %63 = vector.shape_cast %62 : vector<16x8x512xf32> to vector<128x512xf32>
    %64 = arith.truncf %63 : vector<128x512xf32> to vector<128x512xbf16>
    %c0_29 = arith.constant 0 : index
    %c0_30 = arith.constant 0 : index
    %65 = vector.load %arg13[%c0_29, %c0_30] : memref<512x64xbf16, #tpu.memory_space<vmem>>, vector<512x64xbf16>
    %cst_31 = arith.constant dense<0.000000e+00> : vector<128x64xf32>
    %66 = tpu.matmul %64, %65, %cst_31 {dimension_numbers = #tpu.dot_dimension_numbers<[1], [0], [0], [1], [0, 0, 1, 1], [], []>} : vector<128x512xbf16>, vector<512x64xbf16>, vector<128x64xf32> -> vector<128x64xf32>
    %c0_32 = arith.constant 0 : index
    %c0_33 = arith.constant 0 : index
    %67 = vector.load %arg14[%c0_32, %c0_33] : memref<1x64xf32, #tpu.memory_space<vmem>>, vector<1x64xf32>
    %68 = vector.broadcast %67 : vector<1x64xf32> to vector<128x64xf32>
    %69 = arith.addf %66, %68 : vector<128x64xf32>
    %70 = vector.shape_cast %69 : vector<128x64xf32> to vector<16x8x64xf32>
    %cst_34 = arith.constant dense<0xFF800000> : vector<16x64xf32>
    %71 = vector.multi_reduction <maximumf>, %70, %cst_34 [1] : vector<16x8x64xf32> to vector<16x64xf32>
    %72 = arith.truncf %71 : vector<16x64xf32> to vector<16x64xbf16>
    %c0_35 = arith.constant 0 : index
    %c0_36 = arith.constant 0 : index
    %73 = vector.load %arg15[%c0_35, %c0_36] : memref<64x32xbf16, #tpu.memory_space<vmem>>, vector<64x32xbf16>
    %cst_37 = arith.constant dense<0.000000e+00> : vector<16x32xf32>
    %74 = tpu.matmul %72, %73, %cst_37 {dimension_numbers = #tpu.dot_dimension_numbers<[1], [0], [0], [1], [0, 0, 1, 1], [], []>} : vector<16x64xbf16>, vector<64x32xbf16>, vector<16x32xf32> -> vector<16x32xf32>
    %c0_38 = arith.constant 0 : index
    %c0_39 = arith.constant 0 : index
    %75 = vector.load %arg16[%c0_38, %c0_39] : memref<1x32xf32, #tpu.memory_space<vmem>>, vector<1x32xf32>
    %76 = vector.broadcast %75 : vector<1x32xf32> to vector<16x32xf32>
    %77 = arith.addf %74, %76 : vector<16x32xf32>
    %c0_40 = arith.constant 0 : index
    %c0_41 = arith.constant 0 : index
    %78 = vector.load %arg17[%c0_40, %c0_41] : memref<16x32xf32, #tpu.memory_space<vmem>>, vector<16x32xf32>
    tpu.vector_store %arg17[%c0_40, %c0_41], %77 {strides = array<i32>} : memref<16x32xf32, #tpu.memory_space<vmem>>, vector<16x32xf32>,
    return
  }
  func.func @transform_0(%arg0: i32) -> (i32, i32, i32) {
    %c0_i32 = arith.constant 0 : i32
    %c0_i32_0 = arith.constant 0 : i32
    %c0_i32_1 = arith.constant 0 : i32
    return %arg0, %c0_i32, %c0_i32_0 : i32, i32, i32
  }
  func.func @transform_1(%arg0: i32) -> (i32, i32) {
    %c0_i32 = arith.constant 0 : i32
    %c0_i32_0 = arith.constant 0 : i32
    %c0_i32_1 = arith.constant 0 : i32
    return %c0_i32, %c0_i32_0 : i32, i32
  }
  func.func @transform_2(%arg0: i32) -> (i32, i32) {
    %c0_i32 = arith.constant 0 : i32
    %c0_i32_0 = arith.constant 0 : i32
    %c0_i32_1 = arith.constant 0 : i32
    return %c0_i32, %c0_i32_0 : i32, i32
  }
  func.func @transform_3(%arg0: i32) -> (i32, i32) {
    %c0_i32 = arith.constant 0 : i32
    %c0_i32_0 = arith.constant 0 : i32
    %c0_i32_1 = arith.constant 0 : i32
    return %c0_i32, %c0_i32_0 : i32, i32
  }
  func.func @transform_4(%arg0: i32) -> (i32, i32) {
    %c0_i32 = arith.constant 0 : i32
    %c0_i32_0 = arith.constant 0 : i32
    %c0_i32_1 = arith.constant 0 : i32
    return %c0_i32, %c0_i32_0 : i32, i32
  }
  func.func @transform_5(%arg0: i32) -> (i32, i32) {
    %c0_i32 = arith.constant 0 : i32
    %c0_i32_0 = arith.constant 0 : i32
    %c0_i32_1 = arith.constant 0 : i32
    return %c0_i32, %c0_i32_0 : i32, i32
  }
  func.func @transform_6(%arg0: i32) -> (i32, i32) {
    %c0_i32 = arith.constant 0 : i32
    %c0_i32_0 = arith.constant 0 : i32
    %c0_i32_1 = arith.constant 0 : i32
    return %c0_i32, %c0_i32_0 : i32, i32
  }
  func.func @transform_7(%arg0: i32) -> (i32, i32) {
    %c0_i32 = arith.constant 0 : i32
    %c0_i32_0 = arith.constant 0 : i32
    %c0_i32_1 = arith.constant 0 : i32
    return %c0_i32, %c0_i32_0 : i32, i32
  }
  func.func @transform_8(%arg0: i32) -> (i32, i32) {
    %c0_i32 = arith.constant 0 : i32
    %c0_i32_0 = arith.constant 0 : i32
    %c0_i32_1 = arith.constant 0 : i32
    return %c0_i32, %c0_i32_0 : i32, i32
  }
  func.func @transform_9(%arg0: i32) -> (i32, i32) {
    %c0_i32 = arith.constant 0 : i32
    %c0_i32_0 = arith.constant 0 : i32
    %c0_i32_1 = arith.constant 0 : i32
    return %c0_i32, %c0_i32_0 : i32, i32
  }
  func.func @transform_10(%arg0: i32) -> (i32, i32) {
    %c0_i32 = arith.constant 0 : i32
    %c0_i32_0 = arith.constant 0 : i32
    %c0_i32_1 = arith.constant 0 : i32
    return %c0_i32, %c0_i32_0 : i32, i32
  }
  func.func @transform_11(%arg0: i32) -> (i32, i32) {
    %c0_i32 = arith.constant 0 : i32
    %c0_i32_0 = arith.constant 0 : i32
    %c0_i32_1 = arith.constant 0 : i32
    return %c0_i32, %c0_i32_0 : i32, i32
  }
  func.func @transform_12(%arg0: i32) -> (i32, i32) {
    %c0_i32 = arith.constant 0 : i32
    %c0_i32_0 = arith.constant 0 : i32
    %c0_i32_1 = arith.constant 0 : i32
    return %c0_i32, %c0_i32_0 : i32, i32
  }
  func.func @transform_13(%arg0: i32) -> (i32, i32) {
    %c0_i32 = arith.constant 0 : i32
    %c0_i32_0 = arith.constant 0 : i32
    %c0_i32_1 = arith.constant 0 : i32
    return %c0_i32, %c0_i32_0 : i32, i32
  }
  func.func @transform_14(%arg0: i32) -> (i32, i32) {
    %c0_i32 = arith.constant 0 : i32
    %c0_i32_0 = arith.constant 0 : i32
    %c0_i32_1 = arith.constant 0 : i32
    return %c0_i32, %c0_i32_0 : i32, i32
  }
  func.func @transform_15(%arg0: i32) -> (i32, i32) {
    %c0_i32 = arith.constant 0 : i32
    %c0_i32_0 = arith.constant 0 : i32
    %c0_i32_1 = arith.constant 0 : i32
    return %c0_i32, %c0_i32_0 : i32, i32
  }
  func.func @transform_16(%arg0: i32) -> (i32, i32) {
    %c0_i32 = arith.constant 0 : i32
    %c0_i32_0 = arith.constant 0 : i32
    return %arg0, %c0_i32 : i32, i32
  }
}

</mosaic_0001>

<bundles_post_ra>
// kernel: tpu_custom_call.1
= control target key start
LH: loop header
LB: loop body
LE: loop exit
PB: predicated region body
PF: predicated region fallthrough
CT: control target
= control target key end

     0   :  { %s6311_s0 = inlined_call_operand.vmem [shape: f32[16,8,3], index: 0, kind: input, shape index: {}]   ;;  %s6312_s1 = inlined_call_operand.vmem [shape: f32[3,128], index: 1, kind: input, shape index: {}]   ;;  %s6313_s2 = inlined_call_operand.vmem [shape: f32[1,128], index: 2, kind: input, shape index: {}]   ;;  %s6314_s3 = inlined_call_operand.vmem [shape: f32[1,128], index: 3, kind: input, shape index: {}]   ;;  %s6315_s4 = inlined_call_operand.vmem [shape: f32[1,128], index: 4, kind: input, shape index: {}]   ;;  %s6316_s5 = inlined_call_operand.vmem [shape: bf16[128,256], index: 5, kind: input, shape index: {}]   ;;  %s6317_s6 = inlined_call_operand.vmem [shape: f32[1,256], index: 6, kind: input, shape index: {}]   ;;  %s6318_s7 = inlined_call_operand.hbm [shape: bf16[256,512], index: 7, kind: input, shape index: {}]   ;;  %s6319_s8 = inlined_call_operand.hbm [shape: bf16[256,512], index: 8, kind: input, shape index: {}]   ;;  %s6320_s9 = inlined_call_operand.vmem [shape: f32[1,512], index: 9, kind: input, shape index: {}]   ;;  %s6321_s10 = inlined_call_operand.vmem [shape: f32[1,512], index: 10, kind: input, shape index: {}]   ;;  %s6322_s11 = inlined_call_operand.vmem [shape: f32[1,512], index: 11, kind: input, shape index: {}]   ;;  %s6323_s12 = inlined_call_operand.vmem [shape: bf16[512,64], index: 12, kind: input, shape index: {}]   ;;  %s6324_s13 = inlined_call_operand.vmem [shape: f32[1,64], index: 13, kind: input, shape index: {}]   ;;  %s6325_s14 = inlined_call_operand.vmem [shape: bf16[64,32], index: 14, kind: input, shape index: {}]   ;;  %s6326_s15 = inlined_call_operand.vmem [shape: f32[1,32], index: 15, kind: input, shape index: {}]   ;;  %s6327_s16 = inlined_call_operand.hbm [shape: f32[16,32], index: 16, kind: output, shape index: {}]  }
   0x1   :  { %6347 = sst [smem:[#allocation39_spill]] %s6311_s0 }
   0x2   :  { %21 = vsyncpa [#allocation3], 0 }
   0x3   :  { %22 = vsyncpa [#allocation6], 0 }
   0x4   :  { %23 = vsyncpa [#allocation4], 0  ;;  %s42_s23 = sshll.u32 %s6318_s7, 4  ;;  %s4634_s24 = smov [#allocation2]   ;;  %s43_s23 = int_to_ptr.hbm [resolvable:$true] %s42_s23 }
   0x5   :  { %s44_s25 = sshll.u32 %s4634_s24, 4  ;;  %s55_s28 = sshll.u32 %s6319_s8, 4  ;;  %s45_s25 = int_to_ptr.vmem [resolvable:$true] %s44_s25  ;;  %s56_s28 = int_to_ptr.hbm [resolvable:$true] %s55_s28 }
   0x6   :  { %s4635_s29 = smov 256   ;;  %s4636_s30 = smov 16  }
   0x7   :  { %50 = dma.hbm_to_vmem [thread:$0]  %s43_s23, 8192, %s45_s25, [#allocation3], %s4635_s29, %s4635_s29, %s4636_s30  }
   0x8   :  { %s4637_s0 = smov [#allocation5]  }
   0x9   :  { %s57_s17 = sshll.u32 %s4637_s0, 4  ;;  %s58_s17 = int_to_ptr.vmem [resolvable:$true] %s57_s17 }
   0xa   :  { %63 = dma.hbm_to_vmem [thread:$0]  %s56_s28, 8192, %s58_s17, [#allocation6], %s4635_s29, %s4635_s29, %s4636_s30  }
   0xb   :  { %4628 = dma.done.wait [#allocation3], 8192  }
   0xc   :  { %4629 = vsyncadd [#allocation3], 4294959104 }
   0xd   :  { %4630 = dma.done.wait [#allocation6], 8192  }
   0xe   :  { %4631 = vsyncadd [#allocation6], 4294959104  ;;  %v4638_v0 = vmov 1   ;;  %v4639_v1 = vmov 0   ;;  %v4640_v2 = vmov 2   ;;  %s6348_s18 = sld [smem:[#allocation39_spill]] }
   0xf   :  { %4510 = vset.pattern.permute.xlu1 %v4638_v0  ;;  %4509 = vset.pattern.permute.xlu0 %v4639_v1  ;;  %v3656_v15 = vld [vmem:[%s6316_s5 + $0x70] sm:$0xf]  ;;  %v4334_v16 = vld [vmem:[%s6316_s5 + $0x74] sm:$0xf0]  ;;  %v4333_v17 = vld [vmem:[%s6316_s5 + $0x74] sm:$0xf] }
  0x10   :  { %4511 = vset.pattern.permute.xlu2 %v4640_v2  ;;  %v3657_v18 = vor.u32 %v4334_v16, %v3656_v15  ;;  %v3658_v19 = vld [vmem:[%s6316_s5 + $0x78] sm:$0xf0]  ;;  %v3648_v21 = vld [vmem:[%s6316_s5 + $0x60] sm:$0xf]  ;;  %v4332_v22 = vld [vmem:[%s6316_s5 + $0x64] sm:$0xf0] }
  0x11   :  { %v3661_v20 = vor.u32 %v4333_v17, %v3658_v19  ;;  %v4331_v23 = vld [vmem:[%s6316_s5 + $0x64] sm:$0xf]  ;;  %v3650_v24 = vld [vmem:[%s6316_s5 + $0x68] sm:$0xf0]  ;;  %v3649_v25 = vor.u32 %v4332_v22, %v3648_v21  ;;  %v3640_v27 = vld [vmem:[%s6316_s5 + $0x50] sm:$0xf] }
  0x12   :  { %581 = vmatpush.bf16.msra.mxu0 %v3657_v18  ;;  %v3653_v26 = vor.u32 %v4331_v23, %v3650_v24  ;;  %v4330_v28 = vld [vmem:[%s6316_s5 + $0x54] sm:$0xf0]  ;;  %v4329_v30 = vld [vmem:[%s6316_s5 + $0x54] sm:$0xf]  ;;  %v3642_v31 = vld [vmem:[%s6316_s5 + $0x58] sm:$0xf0] }
  0x13   :  { %630 = vmatpush.bf16.msra.mxu1 %v3661_v20  ;;  %v3641_v29 = vor.u32 %v4330_v28, %v3640_v27  ;;  %v3645_v32 = vor.u32 %v4329_v30, %v3642_v31  ;;  %v3632_v34 = vld [vmem:[%s6316_s5 + $0x40] sm:$0xf]  ;;  %v4328_v35 = vld [vmem:[%s6316_s5 + $0x44] sm:$0xf0]  ;;  %v4327_v36 = vld [vmem:[%s6316_s5 + $0x44] sm:$0xf] }
  0x14   :  { %v87_v3 = vld [vmem:[%s6348_s18] sm:$0xff]  ;;  %v88_v4 = vld [vmem:[%s6348_s18 + $0x8] sm:$0xff]  ;;  %v89_v5 = vld [vmem:[%s6348_s18 + $0x10] sm:$0xff]  ;;  %v3633_v37 = vor.u32 %v4328_v35, %v3632_v34  ;;  %vm1031_vm0 = vcmask 1041409   ;;  %vm1033_vm1 = vcmask 1042434   ;;  %vm1035_vm2 = vcmask 1043459  }
  0x15   :  { %203 = vperm.xlu1 %4510, %v87_v3   ;;  %107 = vperm.xlu0 %4509, %v87_v3   ;;  %v90_v6 = vld [vmem:[%s6348_s18 + $0x18] sm:$0xff]  ;;  %v91_v7 = vld [vmem:[%s6348_s18 + $0x20] sm:$0xff]  ;;  %v92_v8 = vld [vmem:[%s6348_s18 + $0x28] sm:$0xff]  ;;  %vm1037_vm3 = vcmask 1044484   ;;  %vm1039_vm4 = vcmask 1045509   ;;  %vm1041_vm5 = vcmask 1046534  }
  0x16   :  { %300 = vperm.xlu2 %4511, %v87_v3   ;;  %v93_v9 = vld [vmem:[%s6348_s18 + $0x30] sm:$0xff]  ;;  %v94_v10 = vld [vmem:[%s6348_s18 + $0x38] sm:$0xff]  ;;  %v96_v11 = vld [vmem:[%s6348_s18 + $0x48] sm:$0xff]  ;;  %582 = vmatpush.bf16.msra.mxu0 %v3649_v25  ;;  %vm6342_vm6 = vcmask 1047559   ;;  %vm2308_vm7 = vcmask 1040384   ;;  %vm2334_vm8 = vcmask 1046528  }
  0x17   :  { %v4783_v12 = vld [vmem:[%s6348_s18 + $0x50] sm:$0xff]  ;;  %v95_v13 = vld [vmem:[%s6348_s18 + $0x40] sm:$0xff]  ;;  %v4794_v14 = vld [vmem:[%s6348_s18 + $0x58] sm:$0xff]  ;;  %631 = vmatpush.bf16.msra.mxu1 %v3653_v26  ;;  %vm2320_vm9 = vcmask 1043458   ;;  %vm2311_vm10 = vcmask 1041408   ;;  %vm2325_vm11 = vcmask 1044483  }
  0x18   :  { %v4839_v33 = vld [vmem:[%s6348_s18 + $0x60] sm:$0xff]  ;;  %v3634_v38 = vld [vmem:[%s6316_s5 + $0x48] sm:$0xf0]  ;;  %v3624_v40 = vld [vmem:[%s6316_s5 + $0x30] sm:$0xf]  ;;  %vm2315_vm12 = vcmask 1042433  }
  0x19   :  { %v3637_v39 = vor.u32 %v4327_v36, %v3634_v38  ;;  %v4326_v41 = vld [vmem:[%s6316_s5 + $0x34] sm:$0xf0]  ;;  %v4325_v42 = vld [vmem:[%s6316_s5 + $0x34] sm:$0xf]  ;;  %v3626_v44 = vld [vmem:[%s6316_s5 + $0x38] sm:$0xf0] }
  0x1a   :  { %583 = vmatpush.bf16.msra.mxu0 %v3641_v29  ;;  %v3625_v43 = vor.u32 %v4326_v41, %v3624_v40  ;;  %v3629_v46 = vor.u32 %v4325_v42, %v3626_v44  ;;  %v4871_v47 = vld [vmem:[%s6348_s18 + $0x68] sm:$0xff]  ;;  %v3616_v48 = vld [vmem:[%s6316_s5 + $0x20] sm:$0xf]  ;;  %v4323_v50 = vld [vmem:[%s6316_s5 + $0x24] sm:$0xf]  ;;  %vm2330_vm13 = vcmask 1045508  }
  0x1b   :  { %632 = vmatpush.bf16.msra.mxu1 %v3645_v32  ;;  %v4324_v49 = vld [vmem:[%s6316_s5 + $0x24] sm:$0xf0]  ;;  %v3618_v51 = vld [vmem:[%s6316_s5 + $0x28] sm:$0xf0]  ;;  %v3608_v54 = vld [vmem:[%s6316_s5 + $0x10] sm:$0xf] }
  0x1c   :  { %v3617_v52 = vor.u32 %v4324_v49, %v3616_v48  ;;  %v3621_v53 = vor.u32 %v4323_v50, %v3618_v51  ;;  %v4322_v55 = vld [vmem:[%s6316_s5 + $0x14] sm:$0xf0]  ;;  %v4321_v56 = vld [vmem:[%s6316_s5 + $0x14] sm:$0xf]  ;;  %v3610_v57 = vld [vmem:[%s6316_s5 + $0x18] sm:$0xf0] }
  0x1d   :  { %207 = vperm.xlu1 %4510, %v88_v4   ;;  %112 = vperm.xlu0 %4509, %v88_v4   ;;  %v3609_v58 = vor.u32 %v4322_v55, %v3608_v54  ;;  %v3613_v59 = vor.u32 %v4321_v56, %v3610_v57  ;;  %v4906_v61 = vld [vmem:[%s6348_s18 + $0x70] sm:$0xff]  ;;  %v3600_v62 = vld [vmem:[%s6316_s5] sm:$0xf]  ;;  %v4320_v63 = vld [vmem:[%s6316_s5 + $0x4] sm:$0xf0]  ;;  %vm2336_vm14 = vcmask 1046533  }
  0x1e   :  { %304 = vperm.xlu2 %4511, %v88_v4   ;;  %584 = vmatpush.bf16.msra.mxu0 %v3633_v37  ;;  %v4319_v3 = vld [vmem:[%s6316_s5 + $0x4] sm:$0xf]  ;;  %v3602_v4 = vld [vmem:[%s6316_s5 + $0x8] sm:$0xf0]  ;;  %v4944_v18 = vld [vmem:[%s6313_s2] ss:$0 sm:$0xff] }
  0x1f   :  { %633 = vmatpush.bf16.msra.mxu1 %v3637_v39  ;;  %v4952_v26 = vld [vmem:[%s6314_s3] ss:$0 sm:$0xff]  ;;  %v102_v39 = vld [vmem:[%s6348_s18 + $0x78] sm:$0xff]  ;;  %vm2341_vm15 = vcmask 1045504   ;;  %s3584_s2 = sshll.u32 %s6327_s16, 4  ;;  %s4642_s19 = smov 128   ;;  %s3585_s2 = int_to_ptr.hbm [resolvable:$true] %s3584_s2 }
  0x20   :  { %v4963_v31 = vld [vmem:[%s6315_s4] ss:$0 sm:$0xff]  ;;  %s4643_s3 = smov 8  }
  0x22   :  { %585 = vmatpush.bf16.msra.mxu0 %v3625_v43 }
  0x23   :  { %634 = vmatpush.bf16.msra.mxu1 %v3629_v46 }
  0x25   :  { %4512 = vset.pattern.permute.xlu1 %v4639_v1  ;;  %117 = vperm.xlu0 %4509, %v89_v5  }
  0x26   :  { %122 = vperm.xlu1 %4512, %v90_v6   ;;  %4513 = vset.pattern.permute.xlu2 %v4638_v0 }
  0x27   :  { %211 = vperm.xlu2 %4513, %v89_v5   ;;  %586 = vmatpush.bf16.msra.mxu0 %v3617_v52 }
  0x28   :  { %635 = vmatpush.bf16.msra.mxu1 %v3621_v53 }
  0x2b   :  { %587 = vmatpush.bf16.msra.mxu0 %v3609_v58 }
  0x2c   :  { %636 = vmatpush.bf16.msra.mxu1 %v3613_v59 }
  0x2d   :  { %4514 = vset.pattern.permute.xlu0 %v4638_v0 }
  0x2e   :  { %4515 = vset.pattern.permute.xlu1 %v4640_v2  ;;  %215 = vperm.xlu0 %4514, %v90_v6  }
  0x2f   :  { %308 = vperm.xlu1 %4515, %v89_v5   ;;  %4516 = vset.pattern.permute.xlu2 %v4640_v2  ;;  %v3601_v5 = vor.u32 %v4320_v63, %v3600_v62 }
  0x30   :  { %312 = vperm.xlu2 %4516, %v90_v6   ;;  %v3605_v6 = vor.u32 %v4319_v3, %v3602_v4 }
  0x31   :  { %588 = vmatpush.bf16.msra.mxu0 %v3601_v5 }
  0x32   :  { %637 = vmatpush.bf16.msra.mxu1 %v3605_v6 }
  0x36   :  { %219 = vperm.xlu0 %4514, %v91_v7  }
  0x37   :  { %4517 = vset.pattern.permute.xlu1 %v4639_v1 }
  0x38   :  { %127 = vperm.xlu1 %4517, %v91_v7   ;;  %4518 = vset.pattern.permute.xlu2 %v4639_v1 }
  0x39   :  { %132 = vperm.xlu2 %4518, %v92_v8  }
  0x3e   :  { %4521 = vset.pattern.permute.xlu0 %v4640_v2 }
  0x3f   :  { %320 = vperm.xlu0 %4521, %v92_v8  }
  0x40   :  { %4519 = vset.pattern.permute.xlu1 %v4638_v0 }
  0x41   :  { %223 = vperm.xlu1 %4519, %v92_v8   ;;  %4520 = vset.pattern.permute.xlu2 %v4640_v2 }
  0x42   :  { %316 = vperm.xlu2 %4520, %v91_v7   ;;  %v103_v7 = vld [vmem:[%s6312_s1] sm:$0x7]  ;;  %s4641_s1 = smov [#allocation7]  }
  0x43   :  { %v4928_v8 = vperm.slane %v103_v7, 2  ;;  %s3582_s5 = sshll.u32 %s4641_s1, 4  ;;  %s3583_s5 = int_to_ptr.vmem [resolvable:$true] %s3582_s5 }
  0x47   :  { %324 = vperm.xlu0 %4521, %v93_v9  }
  0x49   :  { %4522 = vset.pattern.permute.xlu1 %v4639_v1 }
  0x4a   :  { %137 = vperm.xlu1 %4522, %v93_v9   ;;  %4523 = vset.pattern.permute.xlu2 %v4639_v1 }
  0x4b   :  { %142 = vperm.xlu2 %4523, %v94_v10  }
  0x4f   :  { %4528 = vset.pattern.permute.xlu0 %v4639_v1 }
  0x50   :  { %152 = vperm.xlu0 %4528, %v96_v11  }
  0x52   :  { %4524 = vset.pattern.permute.xlu1 %v4638_v0 }
  0x53   :  { %227 = vperm.xlu1 %4524, %v93_v9   ;;  %4525 = vset.pattern.permute.xlu2 %v4638_v0  ;;  %v4930_v9 = vperm.slane %v103_v7, 1 }
  0x54   :  { %231 = vperm.xlu2 %4525, %v94_v10  }
  0x58   :  { %157 = vperm.xlu0 %4528, %v4783_v12  }
  0x5b   :  { %4526 = vset.pattern.permute.xlu1 %v4640_v2 }
  0x5c   :  { %328 = vperm.xlu1 %4526, %v94_v10   ;;  %4527 = vset.pattern.permute.xlu2 %v4639_v1  ;;  %v4932_v10 = vperm.slane %v103_v7, 0 }
  0x5d   :  { %147 = vperm.xlu2 %4527, %v95_v13  }
  0x60   :  { %4535 = vset.pattern.permute.xlu0 %v4638_v0 }
  0x61   :  { %247 = vperm.xlu0 %4535, %v4794_v14  }
  0x64   :  { %4529 = vset.pattern.permute.xlu1 %v4638_v0 }
  0x65   :  { %235 = vperm.xlu1 %4529, %v95_v13   ;;  %4530 = vset.pattern.permute.xlu2 %v4638_v0 }
  0x66   :  { %239 = vperm.xlu2 %4530, %v96_v11  }
  0x69   :  { %251 = vperm.xlu0 %4535, %v4839_v33  }
  0x6d   :  { %4531 = vset.pattern.permute.xlu1 %v4640_v2 }
  0x6e   :  { %332 = vperm.xlu1 %4531, %v95_v13   ;;  %4532 = vset.pattern.permute.xlu2 %v4640_v2 }
  0x6f   :  { %336 = vperm.xlu2 %4532, %v96_v11  }
  0x70   :  { %v301_v45 = vpop.permute.xlu2 %300 }
  0x71   :  { %4542 = vset.pattern.permute.xlu0 %v4640_v2 }
  0x72   :  { %352 = vperm.xlu0 %4542, %v4871_v47  }
  0x76   :  { %4533 = vset.pattern.permute.xlu1 %v4639_v1 }
  0x77   :  { %162 = vperm.xlu1 %4533, %v4794_v14   ;;  %4534 = vset.pattern.permute.xlu2 %v4638_v0 }
  0x78   :  { %243 = vperm.xlu2 %4534, %v4783_v12   ;;  %v305_v60 = vpop.permute.xlu2 %304 }
  0x79   :  { %v365_v27 = vmul.f32 %v4928_v8, %v305_v60 }
  0x7a   :  { %356 = vperm.xlu0 %4542, %v4906_v61  }
  0x7f   :  { %4536 = vset.pattern.permute.xlu1 %v4640_v2 }
  0x80   :  { %340 = vperm.xlu1 %4536, %v4783_v12   ;;  %4537 = vset.pattern.permute.xlu2 %v4640_v2  ;;  %v364_v12 = vmul.f32 %v4928_v8, %v301_v45 }
  0x81   :  { %344 = vperm.xlu2 %4537, %v4794_v14   ;;  %v212_v11 = vpop.permute.xlu2 %211 }
  0x82   :  { %v269_v40 = vmul.f32 %v4930_v9, %v212_v11 }
  0x87   :  { %v204_v13 = vpop.permute.xlu1 %203  ;;  %v108_v15 = vpop.permute.xlu0 %107 }
  0x88   :  { %v267_v16 = vmul.f32 %v4930_v9, %v204_v13  ;;  %v186_v17 = vmul.f32 %v4932_v10, %v108_v15  ;;  %4538 = vset.pattern.permute.xlu1 %v4639_v1 }
  0x89   :  { %167 = vperm.xlu1 %4538, %v4839_v33   ;;  %4539 = vset.pattern.permute.xlu2 %v4639_v1 }
  0x8a   :  { %v283_v14 = vadd.f32 %v267_v16, %v186_v17  ;;  %172 = vperm.xlu2 %4539, %v4871_v47   ;;  %v313_v20 = vpop.permute.xlu2 %312 }
  0x8b   :  { %v367_v48 = vmul.f32 %v4928_v8, %v313_v20 }
  0x8c   :  { %v380_v19 = vadd.f32 %v364_v12, %v283_v14 }
  0x8e   :  { %v399_v23 = vadd.f32 %v4944_v18, %v380_v19 }
  0x8f   :  { %v208_v21 = vpop.permute.xlu1 %207  ;;  %v113_v22 = vpop.permute.xlu0 %112 }
  0x90   :  { %v268_v24 = vmul.f32 %v4930_v9, %v208_v21  ;;  %v187_v25 = vmul.f32 %v4932_v10, %v113_v22  ;;  %v419_v30 = vmul.f32 %v4952_v26, %v399_v23 }
  0x91   :  { %4540 = vset.pattern.permute.xlu1 %v4638_v0 }
  0x92   :  { %v284_v28 = vadd.f32 %v268_v24, %v187_v25  ;;  %255 = vperm.xlu1 %4540, %v4871_v47   ;;  %4541 = vset.pattern.permute.xlu2 %v4640_v2  ;;  %v439_v37 = vadd.f32 %v4963_v31, %v419_v30 }
  0x93   :  { %348 = vperm.xlu2 %4541, %v4839_v33   ;;  %v133_v38 = vpop.permute.xlu2 %132 }
  0x94   :  { %v381_v29 = vadd.f32 %v365_v27, %v284_v28  ;;  %v455_v42 = vmax.f32 %v439_v37, 0.0  ;;  %v191_v16 = vmul.f32 %v4932_v10, %v133_v38 }
  0x96   :  { %v400_v32 = vadd.f32 %v4944_v18, %v381_v29 }
  0x97   :  { %v118_v34 = vpop.permute.xlu0 %117 }
  0x98   :  { %v123_v35 = vpop.permute.xlu1 %122  ;;  %v420_v36 = vmul.f32 %v4952_v26, %v400_v32  ;;  %v188_v41 = vmul.f32 %v4932_v10, %v118_v34 }
  0x99   :  { %v189_v47 = vmul.f32 %v4932_v10, %v123_v35 }
  0x9a   :  { %4543 = vset.pattern.permute.xlu1 %v4639_v1  ;;  %v440_v33 = vadd.f32 %v4963_v31, %v420_v36  ;;  %v285_v45 = vadd.f32 %v269_v40, %v188_v41 }
  0x9b   :  { %177 = vperm.xlu1 %4543, %v4906_v61   ;;  %4544 = vset.pattern.permute.xlu2 %v4639_v1 }
  0x9c   :  { %v456_v43 = vmax.f32 %v440_v33, 0.0  ;;  %182 = vperm.xlu2 %4544, %v102_v39   ;;  %v317_v52 = vpop.permute.xlu2 %316 }
  0x9d   :  { %v368_v4 = vmul.f32 %v4928_v8, %v317_v52 }
  0x9e   :  { %v471_v44 = vpack.c.bf16 %v456_v43, %v455_v42 }
  0xa0   :  { %589 = vmatmul.bf16.vlgmr.msra.gmra.mxu0 %v471_v44  ;;  %638 = vmatmul.bf16.vlgmr.msra.gmra.mxu1 %v471_v44  ;;  %v216_v46 = vpop.permute.xlu0 %215 }
  0xa1   :  { %v270_v49 = vmul.f32 %v4930_v9, %v216_v46  ;;  %v309_v50 = vpop.permute.xlu1 %308 }
  0xa2   :  { %v366_v1 = vmul.f32 %v4928_v8, %v309_v50 }
  0xa3   :  { %v286_v51 = vadd.f32 %v270_v49, %v189_v47  ;;  %4545 = vset.pattern.permute.xlu1 %v4638_v0 }
  0xa4   :  { %v382_v53 = vadd.f32 %v366_v1, %v285_v45  ;;  %259 = vperm.xlu1 %4545, %v4906_v61   ;;  %4546 = vset.pattern.permute.xlu2 %v4638_v0 }
  0xa5   :  { %v383_v54 = vadd.f32 %v367_v48, %v286_v51  ;;  %263 = vperm.xlu2 %4546, %v102_v39   ;;  %v143_v3 = vpop.permute.xlu2 %142 }
  0xa6   :  { %v401_v55 = vadd.f32 %v4944_v18, %v382_v53  ;;  %v193_v42 = vmul.f32 %v4932_v10, %v143_v3 }
  0xa7   :  { %v402_v56 = vadd.f32 %v4944_v18, %v383_v54 }
  0xa8   :  { %v220_v57 = vpop.permute.xlu0 %219  ;;  %v421_v58 = vmul.f32 %v4952_v26, %v401_v55 }
  0xa9   :  { %v271_v59 = vmul.f32 %v4930_v9, %v220_v57  ;;  %v422_v60 = vmul.f32 %v4952_v26, %v402_v56 }
  0xaa   :  { %v128_v62 = vpop.permute.xlu1 %127  ;;  %v441_v63 = vadd.f32 %v4963_v31, %v421_v58 }
  0xab   :  { %v190_v61 = vmul.f32 %v4932_v10, %v128_v62  ;;  %v442_v0 = vadd.f32 %v4963_v31, %v422_v60 }
  0xac   :  { %4547 = vset.pattern.permute.xlu1 %v4640_v2  ;;  %v457_v5 = vmax.f32 %v441_v63, 0.0 }
  0xad   :  { %v287_v6 = vadd.f32 %v271_v59, %v190_v61  ;;  %360 = vperm.xlu1 %4547, %v102_v39   ;;  %v458_v7 = vmax.f32 %v442_v0, 0.0 }
  0xae   :  { %v232_v20 = vpop.permute.xlu2 %231 }
  0xaf   :  { %v472_v11 = vpack.c.bf16 %v458_v7, %v457_v5  ;;  %v384_v13 = vadd.f32 %v368_v4, %v287_v6  ;;  %v274_v43 = vmul.f32 %v4930_v9, %v232_v20 }
  0xb1   :  { %594 = vmatmul.bf16.gmra.mxu0 %v472_v11  ;;  %643 = vmatmul.bf16.gmra.mxu1 %v472_v11  ;;  %v321_v15 = vpop.permute.xlu0 %320  ;;  %v403_v17 = vadd.f32 %v4944_v18, %v384_v13  ;;  %v290_v46 = vadd.f32 %v274_v43, %v193_v42 }
  0xb2   :  { %v369_v19 = vmul.f32 %v4928_v8, %v321_v15 }
  0xb3   :  { %v224_v12 = vpop.permute.xlu1 %223  ;;  %v423_v22 = vmul.f32 %v4952_v26, %v403_v17 }
  0xb4   :  { %v272_v14 = vmul.f32 %v4930_v9, %v224_v12 }
  0xb5   :  { %v443_v27 = vadd.f32 %v4963_v31, %v423_v22 }
  0xb6   :  { %v288_v2 = vadd.f32 %v272_v14, %v191_v16 }
  0xb7   :  { %v148_v29 = vpop.permute.xlu2 %147  ;;  %v459_v30 = vmax.f32 %v443_v27, 0.0 }
  0xb8   :  { %v385_v21 = vadd.f32 %v369_v19, %v288_v2  ;;  %v194_v6 = vmul.f32 %v4932_v10, %v148_v29 }
  0xb9   :  { %v325_v35 = vpop.permute.xlu0 %324 }
  0xba   :  { %v404_v23 = vadd.f32 %v4944_v18, %v385_v21  ;;  %v370_v33 = vmul.f32 %v4928_v8, %v325_v35 }
  0xbc   :  { %v138_v24 = vpop.permute.xlu1 %137  ;;  %v424_v25 = vmul.f32 %v4952_v26, %v404_v23 }
  0xbd   :  { %v192_v37 = vmul.f32 %v4932_v10, %v138_v24 }
  0xbe   :  { %v444_v28 = vadd.f32 %v4963_v31, %v424_v25 }
  0xc0   :  { %v460_v32 = vmax.f32 %v444_v28, 0.0  ;;  %v240_v40 = vpop.permute.xlu2 %239 }
  0xc1   :  { %v276_v50 = vmul.f32 %v4930_v9, %v240_v40 }
  0xc2   :  { %v473_v34 = vpack.c.bf16 %v460_v32, %v459_v30  ;;  %v153_v48 = vpop.permute.xlu0 %152 }
  0xc3   :  { %v195_v1 = vmul.f32 %v4932_v10, %v153_v48 }
  0xc4   :  { %599 = vmatmul.bf16.gmra.mxu0 %v473_v34  ;;  %648 = vmatmul.bf16.gmra.mxu1 %v473_v34 }
  0xc5   :  { %v228_v36 = vpop.permute.xlu1 %227  ;;  %v292_v54 = vadd.f32 %v276_v50, %v195_v1  ;;  %v4032_v50 = vld [vmem:[#allocation5 + $0xe0] sm:$0xf]  ;;  %v4429_v1 = vld [vmem:[#allocation5 + $0xec] sm:$0xf0] }
  0xc6   :  { %v273_v38 = vmul.f32 %v4930_v9, %v228_v36 }
  0xc8   :  { %v289_v39 = vadd.f32 %v273_v38, %v192_v37 }
  0xc9   :  { %v337_v53 = vpop.permute.xlu2 %336 }
  0xca   :  { %v386_v41 = vadd.f32 %v370_v33, %v289_v39  ;;  %v373_v55 = vmul.f32 %v4928_v8, %v337_v53  ;;  %v158_v0 = vpop.permute.xlu0 %157 }
  0xcb   :  { %v196_v32 = vmul.f32 %v4932_v10, %v158_v0 }
  0xcc   :  { %v405_v44 = vadd.f32 %v4944_v18, %v386_v41  ;;  %v389_v60 = vadd.f32 %v373_v55, %v292_v54  ;;  %v4033_v54 = vor.u32 %v4429_v1, %v4032_v50  ;;  %v4160_v55 = vld [vmem:[#allocation5 + $0x1e0] sm:$0xf] }
  0xce   :  { %v329_v45 = vpop.permute.xlu1 %328  ;;  %v425_v51 = vmul.f32 %v4952_v26, %v405_v44  ;;  %v408_v4 = vadd.f32 %v4944_v18, %v389_v60  ;;  %1902 = vmatpush.bf16.msrb.mxu0 %v4033_v54  ;;  %v4016_v60 = vld [vmem:[#allocation5 + $0xc0] sm:$0xf] }
  0xcf   :  { %v371_v47 = vmul.f32 %v4928_v8, %v329_v45 }
  0xd0   :  { %v445_v57 = vadd.f32 %v4963_v31, %v425_v51  ;;  %v428_v15 = vmul.f32 %v4952_v26, %v408_v4 }
  0xd1   :  { %v387_v49 = vadd.f32 %v371_v47, %v290_v46 }
  0xd2   :  { %v461_v62 = vmax.f32 %v445_v57, 0.0  ;;  %v244_v5 = vpop.permute.xlu2 %243  ;;  %v448_v14 = vadd.f32 %v4963_v31, %v428_v15 }
  0xd3   :  { %v406_v52 = vadd.f32 %v4944_v18, %v387_v49  ;;  %v248_v17 = vpop.permute.xlu0 %247  ;;  %v277_v34 = vmul.f32 %v4930_v9, %v244_v5 }
  0xd4   :  { %v278_v2 = vmul.f32 %v4930_v9, %v248_v17  ;;  %v464_v23 = vmax.f32 %v448_v14, 0.0  ;;  %v4128_v17 = vld [vmem:[#allocation5 + $0x1a0] sm:$0xf] }
  0xd5   :  { %v426_v56 = vmul.f32 %v4952_v26, %v406_v52  ;;  %v293_v38 = vadd.f32 %v277_v34, %v196_v32 }
  0xd7   :  { %v236_v58 = vpop.permute.xlu1 %235  ;;  %v446_v59 = vadd.f32 %v4963_v31, %v426_v56  ;;  %v4461_v56 = vld [vmem:[#allocation5 + $0x1ec] sm:$0xf0] }
  0xd8   :  { %v275_v3 = vmul.f32 %v4930_v9, %v236_v58  ;;  %v4161_v58 = vor.u32 %v4461_v56, %v4160_v55 }
  0xd9   :  { %v462_v63 = vmax.f32 %v446_v59, 0.0 }
  0xda   :  { %v291_v11 = vadd.f32 %v275_v3, %v194_v6  ;;  %1951 = vmatpush.bf16.msrb.mxu1 %v4161_v58  ;;  %v4457_v3 = vld [vmem:[#allocation5 + $0x1cc] sm:$0xf0] }
  0xdb   :  { %v474_v61 = vpack.c.bf16 %v462_v63, %v461_v62  ;;  %v345_v19 = vpop.permute.xlu2 %344  ;;  %v252_v42 = vpop.permute.xlu0 %251  ;;  %v4425_v62 = vld [vmem:[#allocation5 + $0xcc] sm:$0xf0]  ;;  %v4144_v63 = vld [vmem:[#allocation5 + $0x1c0] sm:$0xf] }
  0xdc   :  { %v375_v25 = vmul.f32 %v4928_v8, %v345_v19  ;;  %v279_v45 = vmul.f32 %v4930_v9, %v252_v42  ;;  %v4017_v0 = vor.u32 %v4425_v62, %v4016_v60  ;;  %v4145_v5 = vor.u32 %v4457_v3, %v4144_v63  ;;  %v4453_v19 = vld [vmem:[#allocation5 + $0x1ac] sm:$0xf0]  ;;  %v495_v60 = vld [vmem:[%s6317_s6] sm:$0x3] }
  0xdd   :  { %604 = vmatmul.bf16.gmra.mxu0 %v474_v61  ;;  %653 = vmatmul.bf16.gmra.mxu1 %v474_v61  ;;  %v3920_v3 = vld [vmem:[#allocation5] sm:$0xf] }
  0xde   :  { %1903 = vmatpush.bf16.msrb.mxu0 %v4017_v0  ;;  %1952 = vmatpush.bf16.msrb.mxu1 %v4145_v5  ;;  %v4048_v5 = vld [vmem:[#allocation5 + $0x100] sm:$0xf] }
  0xe0   :  { %v333_v7 = vpop.permute.xlu1 %332 }
  0xe1   :  { %v372_v13 = vmul.f32 %v4928_v8, %v333_v7 }
  0xe3   :  { %v388_v12 = vadd.f32 %v372_v13, %v291_v11 }
  0xe4   :  { %v173_v35 = vpop.permute.xlu2 %172  ;;  %v353_v4 = vpop.permute.xlu0 %352 }
  0xe5   :  { %v407_v16 = vadd.f32 %v4944_v18, %v388_v12  ;;  %v199_v7 = vmul.f32 %v4932_v10, %v173_v35  ;;  %v377_v15 = vmul.f32 %v4928_v8, %v353_v4  ;;  %v4000_v12 = vld [vmem:[#allocation5 + $0xa0] sm:$0xf]  ;;  %v4401_v4 = vld [vmem:[#allocation5 + $0xc] sm:$0xf0] }
  0xe7   :  { %v427_v20 = vmul.f32 %v4952_v26, %v407_v16  ;;  %v4421_v16 = vld [vmem:[#allocation5 + $0xac] sm:$0xf0] }
  0xe8   :  { %v4001_v14 = vor.u32 %v4421_v16, %v4000_v12 }
  0xe9   :  { %v163_v21 = vpop.permute.xlu1 %162  ;;  %v447_v22 = vadd.f32 %v4963_v31, %v427_v20 }
  0xea   :  { %v197_v24 = vmul.f32 %v4932_v10, %v163_v21  ;;  %1904 = vmatpush.bf16.msrb.mxu0 %v4001_v14 }
  0xeb   :  { %v463_v27 = vmax.f32 %v447_v22, 0.0 }
  0xec   :  { %v294_v28 = vadd.f32 %v278_v2, %v197_v24  ;;  %v4129_v2 = vor.u32 %v4453_v19, %v4128_v17  ;;  %v4417_v24 = vld [vmem:[#allocation5 + $0x8c] sm:$0xf0]  ;;  %v357_v54 = vpop.permute.xlu0 %356 }
  0xed   :  { %v475_v29 = vpack.c.bf16 %v464_v23, %v463_v27  ;;  %v349_v46 = vpop.permute.xlu2 %348  ;;  %v3984_v23 = vld [vmem:[#allocation5 + $0x80] sm:$0xf]  ;;  %v378_v63 = vmul.f32 %v4928_v8, %v357_v54 }
  0xee   :  { %v391_v30 = vadd.f32 %v375_v25, %v294_v28  ;;  %v376_v51 = vmul.f32 %v4928_v8, %v349_v46  ;;  %1953 = vmatpush.bf16.msrb.mxu1 %v4129_v2  ;;  %v4112_v25 = vld [vmem:[#allocation5 + $0x180] sm:$0xf]  ;;  %v3985_v27 = vor.u32 %v4417_v24, %v3984_v23  ;;  %v4449_v28 = vld [vmem:[#allocation5 + $0x18c] sm:$0xf0] }
  0xef   :  { %609 = vmatmul.bf16.gmra.mxu0 %v475_v29  ;;  %658 = vmatmul.bf16.gmra.mxu1 %v475_v29  ;;  %v4409_v46 = vld [vmem:[#allocation5 + $0x4c] sm:$0xf0] }
  0xf0   :  { %v410_v36 = vadd.f32 %v4944_v18, %v391_v30  ;;  %v4113_v30 = vor.u32 %v4449_v28, %v4112_v25  ;;  %1905 = vmatpush.bf16.msrb.mxu0 %v3985_v27 }
  0xf2   :  { %v341_v37 = vpop.permute.xlu1 %340  ;;  %v430_v40 = vmul.f32 %v4952_v26, %v410_v36  ;;  %1954 = vmatpush.bf16.msrb.mxu1 %v4113_v30  ;;  %v3968_v36 = vld [vmem:[#allocation5 + $0x60] sm:$0xf] }
  0xf3   :  { %v374_v33 = vmul.f32 %v4928_v8, %v341_v37  ;;  %v4413_v37 = vld [vmem:[#allocation5 + $0x6c] sm:$0xf0] }
  0xf4   :  { %v450_v44 = vadd.f32 %v4963_v31, %v430_v40 }
  0xf5   :  { %v390_v39 = vadd.f32 %v374_v33, %v293_v38  ;;  %v4096_v38 = vld [vmem:[#allocation5 + $0x160] sm:$0xf]  ;;  %v3969_v33 = vor.u32 %v4413_v37, %v3968_v36 }
  0xf6   :  { %v466_v53 = vmax.f32 %v450_v44, 0.0  ;;  %v183_v40 = vpop.permute.xlu2 %182 }
  0xf7   :  { %v409_v41 = vadd.f32 %v4944_v18, %v390_v39  ;;  %v4445_v39 = vld [vmem:[#allocation5 + $0x16c] sm:$0xf0]  ;;  %1906 = vmatpush.bf16.msrb.mxu0 %v3969_v33  ;;  %v201_v16 = vmul.f32 %v4932_v10, %v183_v40 }
  0xf8   :  { %v4097_v42 = vor.u32 %v4445_v39, %v4096_v38 }
  0xf9   :  { %v429_v43 = vmul.f32 %v4952_v26, %v409_v41 }
  0xfa   :  { %1955 = vmatpush.bf16.msrb.mxu1 %v4097_v42 }
  0xfb   :  { %v168_v47 = vpop.permute.xlu1 %167  ;;  %v449_v48 = vadd.f32 %v4963_v31, %v429_v43 }
  0xfc   :  { %v198_v49 = vmul.f32 %v4932_v10, %v168_v47 }
  0xfd   :  { %v465_v52 = vmax.f32 %v449_v48, 0.0  ;;  %v4080_v48 = vld [vmem:[#allocation5 + $0x140] sm:$0xf] }
  0xfe   :  { %v295_v57 = vadd.f32 %v279_v45, %v198_v49  ;;  %v3952_v45 = vld [vmem:[#allocation5 + $0x40] sm:$0xf]  ;;  %v4441_v49 = vld [vmem:[#allocation5 + $0x14c] sm:$0xf0] }
  0xff   :  { %v476_v59 = vpack.c.bf16 %v466_v53, %v465_v52  ;;  %v3953_v47 = vor.u32 %v4409_v46, %v3952_v45  ;;  %v4081_v1 = vor.u32 %v4441_v49, %v4080_v48  ;;  %v4405_v52 = vld [vmem:[#allocation5 + $0x2c] sm:$0xf0]  ;;  %v4064_v53 = vld [vmem:[#allocation5 + $0x120] sm:$0xf] }
 0x100   :  { %v392_v61 = vadd.f32 %v376_v51, %v295_v57  ;;  %v3936_v51 = vld [vmem:[#allocation5 + $0x20] sm:$0xf]  ;;  %v4437_v57 = vld [vmem:[#allocation5 + $0x12c] sm:$0xf0] }
 0x101   :  { %614 = vmatmul.bf16.gmra.mxu0 %v476_v59  ;;  %663 = vmatmul.bf16.gmra.mxu1 %v476_v59  ;;  %v3937_v56 = vor.u32 %v4405_v52, %v3936_v51  ;;  %v4065_v62 = vor.u32 %v4437_v57, %v4064_v53 }
 0x102   :  { %v411_v11 = vadd.f32 %v4944_v18, %v392_v61  ;;  %1907 = vmatpush.bf16.msrb.mxu0 %v3953_v47  ;;  %1956 = vmatpush.bf16.msrb.mxu1 %v4081_v1  ;;  %v264_v61 = vpop.permute.xlu2 %263 }
 0x103   :  { %v282_v17 = vmul.f32 %v4930_v9, %v264_v61 }
 0x104   :  { %v256_v6 = vpop.permute.xlu1 %255  ;;  %v431_v22 = vmul.f32 %v4952_v26, %v411_v11  ;;  %v3921_v11 = vor.u32 %v4401_v4, %v3920_v3 }
 0x105   :  { %v280_v13 = vmul.f32 %v4930_v9, %v256_v6  ;;  %v5057_v6 = vperm.slane %v495_v60, 0  ;;  %v298_v23 = vadd.f32 %v282_v17, %v201_v16 }
 0x106   :  { %v451_v35 = vadd.f32 %v4963_v31, %v431_v22  ;;  %1908 = vmatpush.bf16.msrb.mxu0 %v3937_v56  ;;  %1957 = vmatpush.bf16.msrb.mxu1 %v4065_v62 }
 0x107   :  { %v296_v20 = vadd.f32 %v280_v13, %v199_v7  ;;  %v5059_v7 = vperm.slane %v495_v60, 1  ;;  %v4433_v13 = vld [vmem:[#allocation5 + $0x10c] sm:$0xf0] }
 0x108   :  { %v467_v43 = vmax.f32 %v451_v35, 0.0  ;;  %v4049_v12 = vor.u32 %v4433_v13, %v4048_v5 }
 0x109   :  { %v393_v21 = vadd.f32 %v377_v15, %v296_v20 }
 0x10a   :  { %1909 = vmatpush.bf16.msrb.mxu0 %v3921_v11  ;;  %1958 = vmatpush.bf16.msrb.mxu1 %v4049_v12 }
 0x10b   :  { %v412_v29 = vadd.f32 %v4944_v18, %v393_v21 }
 0x10d   :  { %v178_v32 = vpop.permute.xlu1 %177  ;;  %v432_v34 = vmul.f32 %v4952_v26, %v412_v29 }
 0x10e   :  { %v200_v58 = vmul.f32 %v4932_v10, %v178_v32 }
 0x10f   :  { %v452_v41 = vadd.f32 %v4963_v31, %v432_v34 }
 0x111   :  { %v468_v44 = vmax.f32 %v452_v41, 0.0 }
 0x113   :  { %v477_v50 = vpack.c.bf16 %v468_v44, %v467_v43 }
 0x115   :  { %619 = vmatmul.bf16.gmra.mxu0 %v477_v50  ;;  %668 = vmatmul.bf16.gmra.mxu1 %v477_v50 }
 0x116   :  { %v260_v55 = vpop.permute.xlu1 %259 }
 0x117   :  { %v281_v59 = vmul.f32 %v4930_v9, %v260_v55 }
 0x119   :  { %v297_v0 = vadd.f32 %v281_v59, %v200_v58 }
 0x11b   :  { %v394_v15 = vadd.f32 %v378_v63, %v297_v0 }
 0x11d   :  { %v590_v14 = vpop.f32.mrf.mxu0  ;;  %v639_v19 = vpop.f32.mrf.mxu1  ;;  %v413_v21 = vadd.f32 %v4944_v18, %v394_v15 }
 0x11e   :  { %v5064_v20 = vadd.f32 %v590_v14, %v5057_v6  ;;  %v5067_v2 = vadd.f32 %v639_v19, %v5059_v7 }
 0x11f   :  { %v361_v22 = vpop.permute.xlu1 %360  ;;  %v433_v29 = vmul.f32 %v4952_v26, %v413_v21 }
 0x120   :  { %v679_v24 = vrot.slane %v5064_v20, 4  ;;  %v685_v10 = vrot.slane %v5067_v2, 4  ;;  %v379_v9 = vmul.f32 %v4928_v8, %v361_v22 }
 0x121   :  { %v453_v40 = vadd.f32 %v4963_v31, %v433_v29 }
 0x122   :  { %v680_v25 = vmax.f32 %v5064_v20, %v679_v24  ;;  %v686_v27 = vmax.f32 %v5067_v2, %v685_v10  ;;  %v395_v28 = vadd.f32 %v379_v9, %v298_v23 }
 0x123   :  { %v469_v47 = vmax.f32 %v453_v40, 0.0 }
 0x124   :  { %v681_v30 = vrot.slane %v680_v25, 2  ;;  %v687_v32 = vrot.slane %v686_v27, 2  ;;  %v414_v34 = vadd.f32 %v4944_v18, %v395_v28 }
 0x125   :  { %v592_v35 = vpop.f32.mrf.mxu0  ;;  %v641_v36 = vpop.f32.mrf.mxu1 }
 0x126   :  { %v682_v37 = vmax.f32 %v680_v25, %v681_v30  ;;  %v688_v38 = vmax.f32 %v686_v27, %v687_v32  ;;  %v593_v33 = vadd.f32 %v592_v35, %v5057_v6  ;;  %v642_v39 = vadd.f32 %v641_v36, %v5059_v7 }
 0x127   :  { %v434_v8 = vmul.f32 %v4952_v26, %v414_v34 }
 0x128   :  { %v691_v41 = vrot.slane %v593_v33, 4  ;;  %v697_v42 = vrot.slane %v642_v39, 4  ;;  %v683_v44 = vrot.slane %v682_v37, 1  ;;  %v689_v45 = vrot.slane %v688_v38, 1 }
 0x129   :  { %v454_v43 = vadd.f32 %v4963_v31, %v434_v8  ;;  %v5097_v36 = vpack.c.bf16 %v593_v33, %v5064_v20 }
 0x12a   :  { %v692_v46 = vmax.f32 %v593_v33, %v691_v41  ;;  %v698_v18 = vmax.f32 %v642_v39, %v697_v42  ;;  %v684_v51 = vmax.f32 %v682_v37, %v683_v44  ;;  %v690_v52 = vmax.f32 %v688_v38, %v689_v45 }
 0x12b   :  { %v470_v48 = vmax.f32 %v454_v43, 0.0  ;;  %v5100_v38 = vpack.c.bf16 %v642_v39, %v5067_v2 }
 0x12c   :  { %v693_v49 = vrot.slane %v692_v46, 2  ;;  %v699_v50 = vrot.slane %v698_v18, 2  ;;  %v871_v62 = vpack.c.bf16 %v684_v51, %v684_v51  ;;  %v872_v63 = vpack.c.bf16 %v690_v52, %v690_v52 }
 0x12d   :  { %v478_v1 = vpack.c.bf16 %v470_v48, %v469_v47  ;;  %6349 = vst [vmem:[#allocation11_spill] sm:$0xff] %v5100_v38 }
 0x12e   :  { %v694_v53 = vmax.f32 %v692_v46, %v693_v49  ;;  %v595_v54 = vpop.f32.mrf.mxu0  ;;  %v644_v26 = vpop.f32.mrf.mxu1  ;;  %v700_v55 = vmax.f32 %v698_v18, %v699_v50  ;;  %v999_v12 = vunpack.c.l.b16 %v871_v62  ;;  %v1000_v16 = vunpack.c.l.b16 %v872_v63 }
 0x12f   :  { %v5083_v56 = vadd.f32 %v595_v54, %v5057_v6  ;;  %624 = vmatmul.bf16.gmra.mxu0 %v478_v1  ;;  %v5086_v31 = vadd.f32 %v644_v26, %v5059_v7  ;;  %673 = vmatmul.bf16.gmra.mxu1 %v478_v1 }
 0x130   :  { %v695_v57 = vrot.slane %v694_v53, 1  ;;  %v701_v58 = vrot.slane %v700_v55, 1 }
 0x131   :  { %v703_v59 = vrot.slane %v5083_v56, 4  ;;  %v709_v60 = vrot.slane %v5086_v31, 4 }
 0x132   :  { %v696_v61 = vmax.f32 %v694_v53, %v695_v57  ;;  %v702_v0 = vmax.f32 %v700_v55, %v701_v58 }
 0x133   :  { %v704_v3 = vmax.f32 %v5083_v56, %v703_v59  ;;  %v710_v4 = vmax.f32 %v5086_v31, %v709_v60 }
 0x134   :  { %v873_v5 = vpack.c.bf16 %v696_v61, %v696_v61  ;;  %v874_v11 = vpack.c.bf16 %v702_v0, %v702_v0 }
 0x135   :  { %v705_v13 = vrot.slane %v704_v3, 2  ;;  %v711_v15 = vrot.slane %v710_v4, 2 }
 0x136   :  { %v1001_v17 = vunpack.c.l.b16 %v873_v5  ;;  %v597_v14 = vpop.f32.mrf.mxu0  ;;  %v646_v19 = vpop.f32.mrf.mxu1  ;;  %v1002_v21 = vunpack.c.l.b16 %v874_v11 }
 0x137   :  { %v706_v22 = vmax.f32 %v704_v3, %v705_v13  ;;  %v712_v23 = vmax.f32 %v710_v4, %v711_v15  ;;  %v598_v24 = vadd.f32 %v597_v14, %v5057_v6  ;;  %v647_v9 = vadd.f32 %v646_v19, %v5059_v7 }
 0x138   :  { %v1032_v10 = vsel %vm1031_vm0, %v1001_v17, %v999_v12  ;;  %v1045_v25 = vsel %vm1031_vm0, %v1002_v21, %v1000_v16 }
 0x139   :  { %v707_v27 = vrot.slane %v706_v22, 1  ;;  %v713_v28 = vrot.slane %v712_v23, 1  ;;  %v715_v29 = vrot.slane %v598_v24, 4  ;;  %v721_v30 = vrot.slane %v647_v9, 4 }
 0x13a   :  { %v5113_v16 = vpack.c.bf16 %v598_v24, %v5083_v56  ;;  %v5116_v17 = vpack.c.bf16 %v647_v9, %v5086_v31 }
 0x13b   :  { %v708_v32 = vmax.f32 %v706_v22, %v707_v27  ;;  %v714_v34 = vmax.f32 %v712_v23, %v713_v28  ;;  %v716_v35 = vmax.f32 %v598_v24, %v715_v29  ;;  %v722_v37 = vmax.f32 %v647_v9, %v721_v30 }
 0x13c   :  { %6350 = vst [vmem:[#allocation12_spill] sm:$0xff] %v5113_v16 }
 0x13d   :  { %v875_v8 = vpack.c.bf16 %v708_v32, %v708_v32  ;;  %v876_v40 = vpack.c.bf16 %v714_v34, %v714_v34  ;;  %v717_v41 = vrot.slane %v716_v35, 2  ;;  %v723_v42 = vrot.slane %v722_v37, 2  ;;  %6351 = vst [vmem:[#allocation13_spill] sm:$0xff] %v5116_v17 }
 0x13f   :  { %v1003_v43 = vunpack.c.l.b16 %v875_v8  ;;  %v1004_v44 = vunpack.c.l.b16 %v876_v40  ;;  %v718_v45 = vmax.f32 %v716_v35, %v717_v41  ;;  %1910 = vmatmul.bf16.vlgmr.msrb.gmra.mxu0 %v5097_v36  ;;  %1959 = vmatmul.bf16.vlgmr.msrb.gmra.mxu1 %v5100_v38  ;;  %v724_v46 = vmax.f32 %v722_v37, %v723_v42 }
 0x141   :  { %v1034_v20 = vsel %vm1033_vm1, %v1003_v43, %v1032_v10  ;;  %v1046_v33 = vsel %vm1033_vm1, %v1004_v44, %v1045_v25  ;;  %v719_v18 = vrot.slane %v718_v45, 1  ;;  %v600_v2 = vpop.f32.mrf.mxu0  ;;  %v649_v39 = vpop.f32.mrf.mxu1  ;;  %v725_v47 = vrot.slane %v724_v46, 1 }
 0x142   :  { %v601_v48 = vadd.f32 %v600_v2, %v5057_v6  ;;  %v650_v49 = vadd.f32 %v649_v39, %v5059_v7 }
 0x143   :  { %v720_v50 = vmax.f32 %v718_v45, %v719_v18  ;;  %v726_v1 = vmax.f32 %v724_v46, %v725_v47 }
 0x144   :  { %v727_v51 = vrot.slane %v601_v48, 4  ;;  %v733_v52 = vrot.slane %v650_v49, 4 }
 0x145   :  { %v877_v53 = vpack.c.bf16 %v720_v50, %v720_v50  ;;  %v878_v54 = vpack.c.bf16 %v726_v1, %v726_v1 }
 0x146   :  { %v728_v26 = vmax.f32 %v601_v48, %v727_v51  ;;  %v734_v55 = vmax.f32 %v650_v49, %v733_v52 }
 0x147   :  { %v1005_v57 = vunpack.c.l.b16 %v877_v53  ;;  %v1006_v58 = vunpack.c.l.b16 %v878_v54 }
 0x148   :  { %v729_v59 = vrot.slane %v728_v26, 2  ;;  %v735_v60 = vrot.slane %v734_v55, 2 }
 0x149   :  { %v1036_v62 = vsel %vm1035_vm2, %v1005_v57, %v1034_v20  ;;  %v602_v63 = vpop.f32.mrf.mxu0  ;;  %v651_v61 = vpop.f32.mrf.mxu1  ;;  %v1047_v0 = vsel %vm1035_vm2, %v1006_v58, %v1046_v33 }
 0x14a   :  { %v730_v3 = vmax.f32 %v728_v26, %v729_v59  ;;  %v736_v4 = vmax.f32 %v734_v55, %v735_v60  ;;  %v603_v5 = vadd.f32 %v602_v63, %v5057_v6  ;;  %v652_v11 = vadd.f32 %v651_v61, %v5059_v7 }
 0x14c   :  { %v731_v13 = vrot.slane %v730_v3, 1  ;;  %v737_v15 = vrot.slane %v736_v4, 1  ;;  %v739_v12 = vrot.slane %v603_v5, 4  ;;  %v745_v14 = vrot.slane %v652_v11, 4 }
 0x14d   :  { %v5124_v20 = vpack.c.bf16 %v603_v5, %v601_v48  ;;  %v5127_v18 = vpack.c.bf16 %v652_v11, %v650_v49 }
 0x14e   :  { %v732_v19 = vmax.f32 %v730_v3, %v731_v13  ;;  %v738_v21 = vmax.f32 %v736_v4, %v737_v15  ;;  %v740_v22 = vmax.f32 %v603_v5, %v739_v12  ;;  %v746_v23 = vmax.f32 %v652_v11, %v745_v14 }
 0x14f   :  { %1915 = vmatmul.bf16.gmra.mxu0 %v5113_v16  ;;  %1964 = vmatmul.bf16.gmra.mxu1 %v5116_v17  ;;  %6352 = vst [vmem:[#allocation14_spill] sm:$0xff] %v5124_v20 }
 0x150   :  { %v879_v10 = vpack.c.bf16 %v732_v19, %v732_v19  ;;  %v880_v25 = vpack.c.bf16 %v738_v21, %v738_v21  ;;  %v741_v27 = vrot.slane %v740_v22, 2  ;;  %v747_v28 = vrot.slane %v746_v23, 2  ;;  %6353 = vst [vmem:[#allocation15_spill] sm:$0xff] %v5127_v18 }
 0x152   :  { %v1007_v29 = vunpack.c.l.b16 %v879_v10  ;;  %v1008_v56 = vunpack.c.l.b16 %v880_v25  ;;  %v742_v24 = vmax.f32 %v740_v22, %v741_v27  ;;  %v748_v30 = vmax.f32 %v746_v23, %v747_v28  ;;  %v3776_v25 = vld [vmem:[#allocation2 + $0xe0] sm:$0xf]  ;;  %v4365_v27 = vld [vmem:[#allocation2 + $0xec] sm:$0xf0] }
 0x154   :  { %v1038_v31 = vsel %vm1037_vm3, %v1007_v29, %v1036_v62  ;;  %v1048_v9 = vsel %vm1037_vm3, %v1008_v56, %v1047_v0  ;;  %v743_v32 = vrot.slane %v742_v24, 1  ;;  %v749_v34 = vrot.slane %v748_v30, 1 }
 0x155   :  { %v3777_v56 = vor.u32 %v4365_v27, %v3776_v25  ;;  %v3824_v25 = vld [vmem:[#allocation2 + $0x140] sm:$0xf]  ;;  %v4377_v27 = vld [vmem:[#allocation2 + $0x14c] sm:$0xf0] }
 0x156   :  { %v744_v35 = vmax.f32 %v742_v24, %v743_v32  ;;  %v750_v37 = vmax.f32 %v748_v30, %v749_v34  ;;  %v3904_v24 = vld [vmem:[#allocation2 + $0x1e0] sm:$0xf]  ;;  %v4397_v30 = vld [vmem:[#allocation2 + $0x1ec] sm:$0xf0] }
 0x157   :  { %v3905_v32 = vor.u32 %v4397_v30, %v3904_v24  ;;  %1390 = vmatpush.bf16.msra.mxu2 %v3777_v56  ;;  %v4341_v56 = vld [vmem:[#allocation2 + $0x2c] sm:$0xf0] }
 0x158   :  { %v881_v8 = vpack.c.bf16 %v744_v35, %v744_v35  ;;  %v882_v40 = vpack.c.bf16 %v750_v37, %v750_v37  ;;  %v3760_v37 = vld [vmem:[#allocation2 + $0xc0] sm:$0xf] }
 0x159   :  { %1404 = vmatpush.bf16.msra.mxu3 %v3905_v32  ;;  %v4373_v32 = vld [vmem:[#allocation2 + $0x12c] sm:$0xf0] }
 0x15a   :  { %v1009_v41 = vunpack.c.l.b16 %v881_v8  ;;  %v605_v42 = vpop.f32.mrf.mxu0  ;;  %v654_v43 = vpop.f32.mrf.mxu1  ;;  %v1010_v44 = vunpack.c.l.b16 %v882_v40  ;;  %v4361_v8 = vld [vmem:[#allocation2 + $0xcc] sm:$0xf0]  ;;  %v3888_v40 = vld [vmem:[#allocation2 + $0x1c0] sm:$0xf] }
 0x15b   :  { %v606_v45 = vadd.f32 %v605_v42, %v5057_v6  ;;  %v655_v46 = vadd.f32 %v654_v43, %v5059_v7  ;;  %v3761_v42 = vor.u32 %v4361_v8, %v3760_v37  ;;  %v4393_v43 = vld [vmem:[#allocation2 + $0x1cc] sm:$0xf0]  ;;  %v4168_v37 = vld [vmem:[#allocation5 + $0x1e8] sm:$0xf] }
 0x15c   :  { %v1040_v33 = vsel %vm1039_vm4, %v1009_v41, %v1038_v31  ;;  %v1049_v47 = vsel %vm1039_vm4, %v1010_v44, %v1048_v9 }
 0x15d   :  { %v751_v2 = vrot.slane %v606_v45, 4  ;;  %v757_v39 = vrot.slane %v655_v46, 4  ;;  %1391 = vmatpush.bf16.msra.mxu2 %v3761_v42 }
 0x15f   :  { %v752_v50 = vmax.f32 %v606_v45, %v751_v2  ;;  %v758_v1 = vmax.f32 %v655_v46, %v757_v39  ;;  %1920 = vmatmul.bf16.gmra.mxu0 %v5124_v20  ;;  %1969 = vmatmul.bf16.gmra.mxu1 %v5127_v18  ;;  %v4357_v2 = vld [vmem:[#allocation2 + $0xac] sm:$0xf0]  ;;  %v3872_v39 = vld [vmem:[#allocation2 + $0x1a0] sm:$0xf] }
 0x161   :  { %v753_v51 = vrot.slane %v752_v50, 2  ;;  %v759_v52 = vrot.slane %v758_v1, 2 }
 0x162   :  { %v607_v53 = vpop.f32.mrf.mxu0  ;;  %v656_v54 = vpop.f32.mrf.mxu1 }
 0x163   :  { %v754_v48 = vmax.f32 %v752_v50, %v753_v51  ;;  %v760_v26 = vmax.f32 %v758_v1, %v759_v52  ;;  %v608_v55 = vadd.f32 %v607_v53, %v5057_v6  ;;  %v657_v49 = vadd.f32 %v656_v54, %v5059_v7  ;;  %v4389_v51 = vld [vmem:[#allocation2 + $0x1ac] sm:$0xf0] }
 0x164   :  { %v3873_v54 = vor.u32 %v4389_v51, %v3872_v39  ;;  %v4363_v51 = vld [vmem:[#allocation2 + $0xe4] sm:$0xf] }
 0x165   :  { %v755_v57 = vrot.slane %v754_v48, 1  ;;  %v761_v58 = vrot.slane %v760_v26, 1  ;;  %v763_v59 = vrot.slane %v608_v55, 4  ;;  %v769_v60 = vrot.slane %v657_v49, 4 }
 0x166   :  { %v5134_v23 = vpack.c.bf16 %v608_v55, %v606_v45  ;;  %v5136_v10 = vpack.c.bf16 %v657_v49, %v655_v46  ;;  %v3889_v45 = vor.u32 %v4393_v43, %v3888_v40 }
 0x167   :  { %v756_v62 = vmax.f32 %v754_v48, %v755_v57  ;;  %v762_v63 = vmax.f32 %v760_v26, %v761_v58  ;;  %v764_v61 = vmax.f32 %v608_v55, %v763_v59  ;;  %v770_v0 = vmax.f32 %v657_v49, %v769_v60  ;;  %v3728_v55 = vld [vmem:[#allocation2 + $0x80] sm:$0xf]  ;;  %v4353_v49 = vld [vmem:[#allocation2 + $0x8c] sm:$0xf0] }
 0x168   :  { %6354 = vst [vmem:[#allocation16_spill] sm:$0xff] %v5134_v23  ;;  %1405 = vmatpush.bf16.msra.mxu3 %v3889_v45  ;;  %v3856_v57 = vld [vmem:[#allocation2 + $0x180] sm:$0xf]  ;;  %v3729_v58 = vor.u32 %v4353_v49, %v3728_v55  ;;  %v4385_v59 = vld [vmem:[#allocation2 + $0x18c] sm:$0xf0] }
 0x169   :  { %v883_v3 = vpack.c.bf16 %v756_v62, %v756_v62  ;;  %v884_v4 = vpack.c.bf16 %v762_v63, %v762_v63  ;;  %v765_v5 = vrot.slane %v764_v61, 2  ;;  %v771_v11 = vrot.slane %v770_v0, 2  ;;  %6355 = vst [vmem:[#allocation17_spill] sm:$0xff] %v5136_v10 }
 0x16a   :  { %v3857_v63 = vor.u32 %v4385_v59, %v3856_v57  ;;  %v4395_v57 = vld [vmem:[#allocation2 + $0x1e4] sm:$0xf]  ;;  %v4024_v59 = vld [vmem:[#allocation5 + $0xc8] sm:$0xf] }
 0x16b   :  { %v1011_v13 = vunpack.c.l.b16 %v883_v3  ;;  %v1012_v15 = vunpack.c.l.b16 %v884_v4  ;;  %v766_v12 = vmax.f32 %v764_v61, %v765_v5  ;;  %v772_v14 = vmax.f32 %v770_v0, %v771_v11  ;;  %v3712_v3 = vld [vmem:[#allocation2 + $0x60] sm:$0xf]  ;;  %v4349_v4 = vld [vmem:[#allocation2 + $0x6c] sm:$0xf0] }
 0x16c   :  { %v610_v19 = vpop.f32.mrf.mxu0  ;;  %v659_v21 = vpop.f32.mrf.mxu1  ;;  %1406 = vmatpush.bf16.msra.mxu3 %v3873_v54  ;;  %v3840_v5 = vld [vmem:[#allocation2 + $0x160] sm:$0xf]  ;;  %v3778_v54 = vld [vmem:[#allocation2 + $0xf0] sm:$0xf0] }
 0x16d   :  { %v767_v22 = vrot.slane %v766_v12, 1  ;;  %v1042_v28 = vsel %vm1041_vm5, %v1011_v13, %v1040_v33  ;;  %v773_v29 = vrot.slane %v772_v14, 1  ;;  %v1050_v31 = vsel %vm1041_vm5, %v1012_v15, %v1049_v47  ;;  %v3744_v33 = vld [vmem:[#allocation2 + $0xa0] sm:$0xf] }
 0x16e   :  { %v3745_v1 = vor.u32 %v4357_v2, %v3744_v33  ;;  %v5155_v60 = vadd.f32 %v610_v19, %v5057_v6  ;;  %v5158_v62 = vadd.f32 %v659_v21, %v5059_v7  ;;  %v3713_v15 = vor.u32 %v4349_v4, %v3712_v3  ;;  %v3696_v19 = vld [vmem:[#allocation2 + $0x40] sm:$0xf]  ;;  %v4345_v21 = vld [vmem:[#allocation2 + $0x4c] sm:$0xf0] }
 0x16f   :  { %v768_v9 = vmax.f32 %v766_v12, %v767_v22  ;;  %1925 = vmatmul.bf16.gmra.mxu0 %v5134_v23  ;;  %1974 = vmatmul.bf16.gmra.mxu1 %v5136_v10  ;;  %v774_v34 = vmax.f32 %v772_v14, %v773_v29  ;;  %v4381_v12 = vld [vmem:[#allocation2 + $0x16c] sm:$0xf0]  ;;  %v3697_v22 = vor.u32 %v4345_v21, %v3696_v19  ;;  %v3680_v29 = vld [vmem:[#allocation2 + $0x20] sm:$0xf]  ;;  %v3762_v21 = vld [vmem:[#allocation2 + $0xd0] sm:$0xf0] }
 0x170   :  { %1392 = vmatpush.bf16.msra.mxu2 %v3745_v1  ;;  %1407 = vmatpush.bf16.msra.mxu3 %v3857_v63  ;;  %v3841_v14 = vor.u32 %v4381_v12, %v3840_v5  ;;  %v775_v45 = vrot.slane %v5155_v60, 4  ;;  %v4337_v33 = vld [vmem:[#allocation2 + $0xc] sm:$0xf0]  ;;  %v3792_v2 = vld [vmem:[#allocation2 + $0x100] sm:$0xf]  ;;  %v3781_v49 = vor.u32 %v4363_v51, %v3778_v54 }
 0x171   :  { %v885_v35 = vpack.c.bf16 %v768_v9, %v768_v9  ;;  %v886_v41 = vpack.c.bf16 %v774_v34, %v774_v34  ;;  %v3808_v9 = vld [vmem:[#allocation2 + $0x120] sm:$0xf]  ;;  %v4040_v34 = vld [vmem:[#allocation5 + $0xe8] sm:$0xf]  ;;  %v4369_v1 = vld [vmem:[#allocation2 + $0x10c] sm:$0xf0] }
 0x172   :  { %v3809_v8 = vor.u32 %v4373_v32, %v3808_v9  ;;  %v3793_v55 = vor.u32 %v4369_v1, %v3792_v2  ;;  %v4426_v5 = vld [vmem:[#allocation5 + $0xd4] sm:$0xf0]  ;;  %v4120_v51 = vld [vmem:[#allocation5 + $0x188] sm:$0xf] }
 0x173   :  { %v1013_v44 = vunpack.c.l.b16 %v885_v35  ;;  %v1014_v46 = vunpack.c.l.b16 %v886_v41  ;;  %v4430_v35 = vld [vmem:[#allocation5 + $0xf4] sm:$0xf0] }
 0x174   :  { %v612_v47 = vpop.f32.mrf.mxu0  ;;  %v661_v50 = vpop.f32.mrf.mxu1  ;;  %1393 = vmatpush.bf16.msra.mxu2 %v3729_v58  ;;  %1408 = vmatpush.bf16.msra.mxu3 %v3841_v14  ;;  %v4041_v40 = vor.u32 %v4430_v35, %v4040_v34  ;;  %v4462_v41 = vld [vmem:[#allocation5 + $0x1f4] sm:$0xf0]  ;;  %v3906_v58 = vld [vmem:[#allocation2 + $0x1f0] sm:$0xf0]  ;;  %v4359_v14 = vld [vmem:[#allocation2 + $0xc4] sm:$0xf] }
 0x175   :  { %v5143_v52 = vsel %vm6342_vm6, %v1013_v44, %v1042_v28  ;;  %v5146_v53 = vsel %vm6342_vm6, %v1014_v46, %v1050_v31  ;;  %v5149_v48 = vadd.f32 %v612_v47, %v5057_v6  ;;  %v5152_v26 = vadd.f32 %v661_v50, %v5059_v7  ;;  %v3664_v44 = vld [vmem:[#allocation2] sm:$0xf]  ;;  %v4458_v12 = vld [vmem:[#allocation5 + $0x1d4] sm:$0xf0] }
 0x176   :  { %v3825_v28 = vor.u32 %v4377_v27, %v3824_v25  ;;  %v3681_v31 = vor.u32 %v4341_v56, %v3680_v29  ;;  %2098 = vmatpush.bf16.msra.mxu0 %v4041_v40  ;;  %v4169_v46 = vor.u32 %v4462_v41, %v4168_v37  ;;  %v3665_v50 = vor.u32 %v4337_v33, %v3664_v44  ;;  %v3890_v25 = vld [vmem:[#allocation2 + $0x1d0] sm:$0xf0]  ;;  %v4008_v29 = vld [vmem:[#allocation5 + $0xa8] sm:$0xf]  ;;  %v4422_v56 = vld [vmem:[#allocation5 + $0xb4] sm:$0xf0] }
 0x177   :  { %v5162_v61 = vpack.c.bf16 %v5149_v48, %v5155_v60  ;;  %v5166_v0 = vpack.c.bf16 %v5152_v26, %v5158_v62  ;;  %v3909_v4 = vor.u32 %v4395_v57, %v3906_v58  ;;  %v3765_v27 = vor.u32 %v4359_v14, %v3762_v21  ;;  %v3746_v40 = vld [vmem:[#allocation2 + $0xb0] sm:$0xf0]  ;;  %v4387_v41 = vld [vmem:[#allocation2 + $0x1a4] sm:$0xf]  ;;  %v4418_v33 = vld [vmem:[#allocation5 + $0x94] sm:$0xf0] }
 0x178   :  { %1394 = vmatpush.bf16.msra.mxu2 %v3713_v15  ;;  %1409 = vmatpush.bf16.msra.mxu3 %v3825_v28  ;;  %v4025_v15 = vor.u32 %v4426_v5, %v4024_v59  ;;  %v787_v32 = vrot.slane %v5149_v48, 4  ;;  %v4450_v54 = vld [vmem:[#allocation5 + $0x194] sm:$0xf0]  ;;  %v4351_v59 = vld [vmem:[#allocation2 + $0x84] sm:$0xf] }
 0x179   :  { %6356 = vst [vmem:[#allocation18_spill] sm:$0xff] %v5162_v61  ;;  %2147 = vmatpush.bf16.msra.mxu1 %v4169_v46  ;;  %v3992_v46 = vld [vmem:[#allocation5 + $0x88] sm:$0xf]  ;;  %v4121_v58 = vor.u32 %v4450_v54, %v4120_v51  ;;  %v4383_v5 = vld [vmem:[#allocation2 + $0x184] sm:$0xf] }
 0x17a   :  { %6357 = vst [vmem:[#allocation19_spill] sm:$0xff] %v5166_v0  ;;  %2099 = vmatpush.bf16.msra.mxu0 %v4025_v15  ;;  %v3993_v57 = vor.u32 %v4418_v33, %v3992_v46  ;;  %v3976_v15 = vld [vmem:[#allocation5 + $0x68] sm:$0xf]  ;;  %v4446_v21 = vld [vmem:[#allocation5 + $0x174] sm:$0xf0] }
 0x17b   :  { %v4088_v33 = vld [vmem:[#allocation5 + $0x148] sm:$0xf]  ;;  %v4442_v54 = vld [vmem:[#allocation5 + $0x154] sm:$0xf0] }
 0x17c   :  { %1395 = vmatpush.bf16.msra.mxu2 %v3697_v22  ;;  %1410 = vmatpush.bf16.msra.mxu3 %v3809_v8  ;;  %v4391_v22 = vld [vmem:[#allocation2 + $0x1c4] sm:$0xf] }
 0x17d   :  { %v3893_v28 = vor.u32 %v4391_v22, %v3890_v25  ;;  %v4355_v8 = vld [vmem:[#allocation2 + $0xa4] sm:$0xf] }
 0x17e   :  { %v615_v11 = vpop.f32.mrf.mxu0  ;;  %v664_v13 = vpop.f32.mrf.mxu1  ;;  %v3749_v44 = vor.u32 %v4355_v8, %v3746_v40  ;;  %v3842_v8 = vld [vmem:[#allocation2 + $0x170] sm:$0xf0]  ;;  %v3960_v40 = vld [vmem:[#allocation5 + $0x48] sm:$0xf] }
 0x17f   :  { %1930 = vmatmul.bf16.gmra.mxu0 %v5162_v61  ;;  %1979 = vmatmul.bf16.gmra.mxu1 %v5166_v0  ;;  %v5178_v39 = vadd.f32 %v615_v11, %v5057_v6  ;;  %v5181_v47 = vadd.f32 %v664_v13, %v5059_v7  ;;  %v4152_v11 = vld [vmem:[#allocation5 + $0x1c8] sm:$0xf]  ;;  %v776_v13 = vmax.f32 %v5155_v60, %v775_v45  ;;  %v3874_v45 = vld [vmem:[#allocation2 + $0x1b0] sm:$0xf0] }
 0x180   :  { %1396 = vmatpush.bf16.msra.mxu2 %v3681_v31  ;;  %1411 = vmatpush.bf16.msra.mxu3 %v3793_v55  ;;  %v4153_v19 = vor.u32 %v4458_v12, %v4152_v11  ;;  %v4136_v60 = vld [vmem:[#allocation5 + $0x1a8] sm:$0xf]  ;;  %v4454_v31 = vld [vmem:[#allocation5 + $0x1b4] sm:$0xf0]  ;;  %v3877_v1 = vor.u32 %v4387_v41, %v3874_v45  ;;  %v3858_v11 = vld [vmem:[#allocation2 + $0x190] sm:$0xf0] }
 0x181   :  { %v777_v9 = vrot.slane %v776_v13, 2  ;;  %v4137_v37 = vor.u32 %v4454_v31, %v4136_v60  ;;  %v4414_v12 = vld [vmem:[#allocation5 + $0x74] sm:$0xf0]  ;;  %v3714_v31 = vld [vmem:[#allocation2 + $0x70] sm:$0xf0]  ;;  %v805_v45 = vrot.slane %v5181_v47, 4 }
 0x182   :  { %2148 = vmatpush.bf16.msra.mxu1 %v4153_v19  ;;  %v4104_v19 = vld [vmem:[#allocation5 + $0x168] sm:$0xf]  ;;  %v4410_v41 = vld [vmem:[#allocation5 + $0x54] sm:$0xf0] }
 0x183   :  { %v5200_v55 = vmax.f32 %v776_v13, %v777_v9  ;;  %v4379_v9 = vld [vmem:[#allocation2 + $0x164] sm:$0xf]  ;;  %v3961_v51 = vor.u32 %v4410_v41, %v3960_v40  ;;  %v3928_v40 = vld [vmem:[#allocation5 + $0x8] sm:$0xf]  ;;  %v4402_v41 = vld [vmem:[#allocation5 + $0x14] sm:$0xf0] }
 0x184   :  { %1397 = vmatpush.bf16.msra.mxu2 %v3665_v50  ;;  %1432 = vmatpush.bf16.msrb.mxu3 %v3909_v4  ;;  %v793_v50 = vrot.slane %v5152_v26, 4  ;;  %v3730_v4 = vld [vmem:[#allocation2 + $0x90] sm:$0xf0] }
 0x185   :  { %v779_v22 = vrot.slane %v5200_v55, 1 }
 0x186   :  { %v617_v24 = vpop.f32.mrf.mxu0  ;;  %v666_v30 = vpop.f32.mrf.mxu1  ;;  %2149 = vmatpush.bf16.msra.mxu1 %v4137_v37  ;;  %v5207_v13 = vmax.f32 %v5152_v26, %v793_v50 }
 0x187   :  { %v5171_v42 = vadd.f32 %v617_v24, %v5057_v6  ;;  %v5174_v43 = vadd.f32 %v666_v30, %v5059_v7  ;;  %v781_v24 = vrot.slane %v5158_v62, 4  ;;  %v4009_v30 = vor.u32 %v4422_v56, %v4008_v29 }
 0x188   :  { %1418 = vmatpush.bf16.msrb.mxu2 %v3781_v49  ;;  %1433 = vmatpush.bf16.msrb.mxu3 %v3893_v28  ;;  %v5203_v49 = vmax.f32 %v5149_v48, %v787_v32  ;;  %v3861_v48 = vor.u32 %v4383_v5, %v3858_v11  ;;  %v3977_v29 = vor.u32 %v4414_v12, %v3976_v15  ;;  %v3944_v11 = vld [vmem:[#allocation5 + $0x28] sm:$0xf]  ;;  %v4406_v15 = vld [vmem:[#allocation5 + $0x34] sm:$0xf0] }
 0x189   :  { %v5185_v63 = vpack.c.bf16 %v5171_v42, %v5178_v39  ;;  %v5189_v3 = vpack.c.bf16 %v5174_v43, %v5181_v47  ;;  %2100 = vmatpush.bf16.msra.mxu0 %v4009_v30  ;;  %v5197_v2 = vmax.f32 %v5158_v62, %v781_v24  ;;  %v3733_v62 = vor.u32 %v4351_v59, %v3730_v4  ;;  %v4347_v30 = vld [vmem:[#allocation2 + $0x64] sm:$0xf]  ;;  %v3698_v59 = vld [vmem:[#allocation2 + $0x50] sm:$0xf0] }
 0x18a   :  { %2150 = vmatpush.bf16.msra.mxu1 %v4121_v58  ;;  %v789_v25 = vrot.slane %v5203_v49, 2  ;;  %v4105_v56 = vor.u32 %v4446_v21, %v4104_v19  ;;  %v3717_v37 = vor.u32 %v4347_v30, %v3714_v31  ;;  %v4343_v58 = vld [vmem:[#allocation2 + $0x44] sm:$0xf]  ;;  %v3945_v30 = vor.u32 %v4406_v15, %v3944_v11  ;;  %v3666_v15 = vld [vmem:[#allocation2 + $0x10] sm:$0xf0] }
 0x18b   :  { %6358 = vst [vmem:[#allocation20_spill] sm:$0xff] %v5185_v63  ;;  %v783_v14 = vrot.slane %v5197_v2, 2  ;;  %v4375_v4 = vld [vmem:[#allocation2 + $0x144] sm:$0xf]  ;;  %v3701_v5 = vor.u32 %v4343_v58, %v3698_v59  ;;  %v4434_v58 = vld [vmem:[#allocation5 + $0x114] sm:$0xf0] }
 0x18c   :  { %6359 = vst [vmem:[#allocation21_spill] sm:$0xff] %v5189_v3  ;;  %1419 = vmatpush.bf16.msrb.mxu2 %v3765_v27  ;;  %1434 = vmatpush.bf16.msrb.mxu3 %v3877_v1  ;;  %v3845_v1 = vor.u32 %v4379_v9, %v3842_v8  ;;  %v4339_v9 = vld [vmem:[#allocation2 + $0x24] sm:$0xf] }
 0x18d   :  { %2101 = vmatpush.bf16.msra.mxu0 %v3993_v57  ;;  %v4089_v57 = vor.u32 %v4442_v54, %v4088_v33  ;;  %v784_v12 = vmax.f32 %v5197_v2, %v783_v14  ;;  %v4371_v8 = vld [vmem:[#allocation2 + $0x124] sm:$0xf]  ;;  %v3810_v14 = vld [vmem:[#allocation2 + $0x130] sm:$0xf0] }
 0x18e   :  { %2151 = vmatpush.bf16.msra.mxu1 %v4105_v56  ;;  %v3813_v54 = vor.u32 %v4371_v8, %v3810_v14  ;;  %v4335_v11 = vld [vmem:[#allocation2 + $0x4] sm:$0xf] }
 0x18f   :  { %1935 = vmatmul.bf16.gmra.mxu0 %v5185_v63  ;;  %1984 = vmatmul.bf16.gmra.mxu1 %v5189_v3  ;;  %v785_v33 = vrot.slane %v784_v12, 1 }
 0x190   :  { %1420 = vmatpush.bf16.msrb.mxu2 %v3749_v44  ;;  %1435 = vmatpush.bf16.msrb.mxu3 %v3861_v48  ;;  %v799_v44 = vrot.slane %v5178_v39, 4  ;;  %v817_v48 = vrot.slane %v5174_v43, 4 }
 0x191   :  { %2102 = vmatpush.bf16.msra.mxu0 %v3977_v29 }
 0x192   :  { %v620_v34 = vpop.f32.mrf.mxu0  ;;  %v669_v35 = vpop.f32.mrf.mxu1  ;;  %2152 = vmatpush.bf16.msra.mxu1 %v4089_v57  ;;  %v4056_v57 = vld [vmem:[#allocation5 + $0x108] sm:$0xf] }
 0x193   :  { %v5212_v60 = vadd.f32 %v620_v34, %v5057_v6  ;;  %v5221_v32 = vadd.f32 %v669_v35, %v5059_v7  ;;  %v795_v34 = vrot.slane %v5207_v13, 2  ;;  %v811_v35 = vrot.slane %v5171_v42, 4 }
 0x194   :  { %1421 = vmatpush.bf16.msrb.mxu2 %v3733_v62  ;;  %1436 = vmatpush.bf16.msrb.mxu3 %v3845_v1  ;;  %v3826_v62 = vld [vmem:[#allocation2 + $0x150] sm:$0xf0]  ;;  %v800_v1 = vmax.f32 %v5178_v39, %v799_v44  ;;  %v790_v39 = vmax.f32 %v5203_v49, %v789_v25  ;;  %v818_v44 = vmax.f32 %v5174_v43, %v817_v48 }
 0x195   :  { %v823_v19 = vrot.slane %v5212_v60, 4  ;;  %2103 = vmatpush.bf16.msra.mxu0 %v3961_v51  ;;  %v3829_v21 = vor.u32 %v4375_v4, %v3826_v62  ;;  %v829_v29 = vrot.slane %v5221_v32, 4  ;;  %v806_v51 = vmax.f32 %v5181_v47, %v805_v45 }
 0x196   :  { %v812_v59 = vmax.f32 %v5171_v42, %v811_v35  ;;  %v4057_v62 = vor.u32 %v4434_v58, %v4056_v57  ;;  %v796_v47 = vmax.f32 %v5207_v13, %v795_v34  ;;  %v3669_v45 = vor.u32 %v4335_v11, %v3666_v15 }
 0x197   :  { %v824_v42 = vmax.f32 %v5212_v60, %v823_v19  ;;  %v830_v35 = vmax.f32 %v5221_v32, %v829_v29  ;;  %v786_v49 = vmax.f32 %v784_v12, %v785_v33  ;;  %v801_v13 = vrot.slane %v800_v1, 2 }
 0x198   :  { %1422 = vmatpush.bf16.msrb.mxu2 %v3717_v37  ;;  %v3682_v37 = vld [vmem:[#allocation2 + $0x30] sm:$0xf0]  ;;  %1437 = vmatpush.bf16.msrb.mxu3 %v3829_v21  ;;  %v4367_v21 = vld [vmem:[#allocation2 + $0x104] sm:$0xf]  ;;  %v807_v43 = vrot.slane %v806_v51, 2  ;;  %v813_v25 = vrot.slane %v812_v59, 2 }
 0x199   :  { %v3685_v2 = vor.u32 %v4339_v9, %v3682_v37  ;;  %2104 = vmatpush.bf16.msra.mxu0 %v3945_v30  ;;  %v797_v48 = vrot.slane %v796_v47, 1  ;;  %v825_v19 = vrot.slane %v824_v42, 2  ;;  %v802_v8 = vmax.f32 %v800_v1, %v801_v13 }
 0x19a   :  { %v622_v27 = vpop.f32.mrf.mxu0  ;;  %v671_v28 = vpop.f32.mrf.mxu1  ;;  %v814_v14 = vmax.f32 %v812_v59, %v813_v25 }
 0x19b   :  { %v5215_v24 = vadd.f32 %v622_v27, %v5057_v6  ;;  %v5218_v26 = vadd.f32 %v671_v28, %v5059_v7  ;;  %v4072_v27 = vld [vmem:[#allocation5 + $0x128] sm:$0xf]  ;;  %v4438_v28 = vld [vmem:[#allocation5 + $0x134] sm:$0xf0]  ;;  %v826_v58 = vmax.f32 %v824_v42, %v825_v19 }
 0x19c   :  { %1423 = vmatpush.bf16.msrb.mxu2 %v3701_v5  ;;  %v4073_v31 = vor.u32 %v4438_v28, %v4072_v27  ;;  %v3929_v5 = vor.u32 %v4402_v41, %v3928_v40  ;;  %v3794_v27 = vld [vmem:[#allocation2 + $0x110] sm:$0xf0]  ;;  %1438 = vmatpush.bf16.msrb.mxu3 %v3813_v54  ;;  %v798_v41 = vmax.f32 %v796_v47, %v797_v48  ;;  %v815_v1 = vrot.slane %v814_v14, 1 }
 0x19d   :  { %v5228_v46 = vpack.c.bf16 %v5215_v24, %v5212_v60  ;;  %v5233_v50 = vpack.c.bf16 %v5218_v26, %v5221_v32  ;;  %v835_v56 = vrot.slane %v5215_v24, 4  ;;  %v841_v4 = vrot.slane %v5218_v26, 4 }
 0x19e   :  { %2153 = vmatpush.bf16.msra.mxu1 %v4073_v31  ;;  %v3797_v30 = vor.u32 %v4367_v21, %v3794_v27  ;;  %v780_v31 = vmax.f32 %v5200_v55, %v779_v22  ;;  %2105 = vmatpush.bf16.msra.mxu0 %v3929_v5  ;;  %v791_v60 = vrot.slane %v790_v39, 1  ;;  %v819_v32 = vrot.slane %v818_v44, 2 }
 0x19f   :  { %6360 = vst [vmem:[#allocation22_spill] sm:$0xff] %v5228_v46  ;;  %1940 = vmatmul.bf16.gmra.mxu0 %v5228_v46  ;;  %1989 = vmatmul.bf16.gmra.mxu1 %v5233_v50  ;;  %v836_v28 = vmax.f32 %v5215_v24, %v835_v56  ;;  %v842_v34 = vmax.f32 %v5218_v26, %v841_v4  ;;  %v831_v24 = vrot.slane %v830_v35, 2  ;;  %v803_v21 = vrot.slane %v802_v8, 1 }
 0x1a0   :  { %6361 = vst [vmem:[#allocation23_spill] sm:$0xff] %v5233_v50  ;;  %1424 = vmatpush.bf16.msrb.mxu2 %v3685_v2  ;;  %1439 = vmatpush.bf16.msrb.mxu3 %v3797_v30  ;;  %v887_v37 = vpack.c.bf16 %v780_v31, %v780_v31  ;;  %v888_v55 = vpack.c.bf16 %v786_v49, %v786_v49  ;;  %v827_v49 = vrot.slane %v826_v58, 1 }
 0x1a1   :  { %v837_v29 = vrot.slane %v836_v28, 2  ;;  %v808_v2 = vmax.f32 %v806_v51, %v807_v43  ;;  %v843_v26 = vrot.slane %v842_v34, 2  ;;  %v792_v40 = vmax.f32 %v790_v39, %v791_v60 }
 0x1a2   :  { %2154 = vmatpush.bf16.msra.mxu1 %v4057_v62  ;;  %v820_v57 = vmax.f32 %v818_v44, %v819_v32  ;;  %v832_v4 = vmax.f32 %v830_v35, %v831_v24  ;;  %v5260_v62 = vunpack.c.l.b16 %v887_v37  ;;  %v5262_v11 = vunpack.c.l.b16 %v888_v55 }
 0x1a3   :  { %v838_v5 = vmax.f32 %v836_v28, %v837_v29  ;;  %v809_v27 = vrot.slane %v808_v2, 1  ;;  %v844_v51 = vmax.f32 %v842_v34, %v843_v26  ;;  %v889_v59 = vpack.c.bf16 %v792_v40, %v792_v40 }
 0x1a4   :  { %1425 = vmatpush.bf16.msrb.mxu2 %v3669_v45  ;;  %v890_v30 = vpack.c.bf16 %v798_v41, %v798_v41  ;;  %v821_v31 = vrot.slane %v820_v57, 1  ;;  %v833_v44 = vrot.slane %v832_v4, 1  ;;  %v804_v48 = vmax.f32 %v802_v8, %v803_v21 }
 0x1a5   :  { %v839_v42 = vrot.slane %v838_v5, 1  ;;  %v810_v32 = vmax.f32 %v808_v2, %v809_v27  ;;  %v816_v19 = vmax.f32 %v814_v14, %v815_v1  ;;  %v845_v34 = vrot.slane %v844_v51, 1 }
 0x1a6   :  { %v822_v37 = vmax.f32 %v820_v57, %v821_v31  ;;  %v828_v55 = vmax.f32 %v826_v58, %v827_v49  ;;  %v1017_v41 = vunpack.c.l.b16 %v889_v59  ;;  %v1018_v58 = vunpack.c.l.b16 %v890_v30 }
 0x1a7   :  { %v846_v8 = vmax.f32 %v844_v51, %v845_v34 }
 0x1a8   :  { %v894_v21 = vpack.c.bf16 %v822_v37, %v822_v37  ;;  %v1052_v30 = vsel %vm1031_vm0, %v1017_v41, %v5260_v62 }
 0x1a9   :  { %v898_v31 = vpack.c.bf16 %v846_v8, %v846_v8  ;;  %v3784_v8 = vld [vmem:[#allocation2 + $0xe8] sm:$0xf] }
 0x1ac   :  { %v625_v56 = vpop.f32.mrf.mxu0  ;;  %v674_v9 = vpop.f32.mrf.mxu1 }
 0x1ad   :  { %v626_v22 = vadd.f32 %v625_v56, %v5057_v6  ;;  %v675_v12 = vadd.f32 %v674_v9, %v5059_v7 }
 0x1af   :  { %v847_v33 = vrot.slane %v626_v22, 4  ;;  %v853_v54 = vrot.slane %v675_v12, 4 }
 0x1b1   :  { %v848_v15 = vmax.f32 %v626_v22, %v847_v33  ;;  %v854_v45 = vmax.f32 %v675_v12, %v853_v54  ;;  %v834_v33 = vmax.f32 %v832_v4, %v833_v44  ;;  %v840_v54 = vmax.f32 %v838_v5, %v839_v42 }
 0x1b3   :  { %v849_v39 = vrot.slane %v848_v15, 2  ;;  %v855_v47 = vrot.slane %v854_v45, 2  ;;  %v896_v5 = vpack.c.bf16 %v834_v33, %v834_v33  ;;  %v897_v59 = vpack.c.bf16 %v840_v54, %v840_v54 }
 0x1b4   :  { %v627_v35 = vpop.f32.mrf.mxu0  ;;  %v676_v28 = vpop.f32.mrf.mxu1 }
 0x1b5   :  { %v850_v13 = vmax.f32 %v848_v15, %v849_v39  ;;  %v856_v43 = vmax.f32 %v854_v45, %v855_v47  ;;  %v628_v25 = vadd.f32 %v627_v35, %v5057_v6  ;;  %v677_v60 = vadd.f32 %v676_v28, %v5059_v7 }
 0x1b6   :  { %v891_v7 = vpack.c.bf16 %v804_v48, %v804_v48  ;;  %v892_v15 = vpack.c.bf16 %v810_v32, %v810_v32  ;;  %v1059_v48 = vsel %vm1031_vm0, %v1018_v58, %v5262_v11  ;;  %v1024_v32 = vunpack.c.l.b16 %v896_v5 }
 0x1b7   :  { %v851_v24 = vrot.slane %v850_v13, 1  ;;  %v857_v29 = vrot.slane %v856_v43, 1  ;;  %v859_v56 = vrot.slane %v628_v25, 4  ;;  %v5266_v9 = vpack.c.bf16 %v628_v25, %v626_v22 }
 0x1b8   :  { %v865_v26 = vrot.slane %v677_v60, 4  ;;  %v5268_v40 = vpack.c.bf16 %v677_v60, %v675_v12  ;;  %v893_v22 = vpack.c.bf16 %v816_v19, %v816_v19  ;;  %v895_v12 = vpack.c.bf16 %v828_v55, %v828_v55 }
 0x1b9   :  { %6362 = vst [vmem:[#allocation24_spill] sm:$0xff] %v5266_v9  ;;  %v860_v6 = vmax.f32 %v628_v25, %v859_v56  ;;  %1945 = vmatmul.bf16.gmra.mxu0 %v5266_v9  ;;  %v852_v2 = vmax.f32 %v850_v13, %v851_v24  ;;  %v858_v45 = vmax.f32 %v856_v43, %v857_v29  ;;  %v1019_v51 = vunpack.c.l.b16 %v891_v7 }
 0x1ba   :  { %6363 = vst [vmem:[#allocation25_spill] sm:$0xff] %v5268_v40  ;;  %v866_v14 = vmax.f32 %v677_v60, %v865_v26  ;;  %1994 = vmatmul.bf16.gmra.mxu1 %v5268_v40  ;;  %v1020_v42 = vunpack.c.l.b16 %v892_v15  ;;  %v1021_v35 = vunpack.c.l.b16 %v893_v22  ;;  %v1022_v43 = vunpack.c.l.b16 %v894_v21 }
 0x1bb   :  { %v861_v57 = vrot.slane %v860_v6, 2  ;;  %v899_v49 = vpack.c.bf16 %v852_v2, %v852_v2  ;;  %v900_v28 = vpack.c.bf16 %v858_v45, %v858_v45  ;;  %v1023_v25 = vunpack.c.l.b16 %v895_v12  ;;  %v4366_v2 = vld [vmem:[#allocation2 + $0xf4] sm:$0xf0]  ;;  %v3912_v45 = vld [vmem:[#allocation2 + $0x1e8] sm:$0xf] }
 0x1bc   :  { %v867_v27 = vrot.slane %v866_v14, 2  ;;  %v1911_v1 = vpop.f32.mrf.mxu0  ;;  %v1960_v4 = vpop.f32.mrf.mxu1  ;;  %v1025_v19 = vunpack.c.l.b16 %v897_v59  ;;  %v1053_v24 = vsel %vm1033_vm1, %v1019_v51, %v1052_v30  ;;  %v1026_v29 = vunpack.c.l.b16 %v898_v31  ;;  %v3768_v51 = vld [vmem:[#allocation2 + $0xc8] sm:$0xf]  ;;  %v4362_v31 = vld [vmem:[#allocation2 + $0xd4] sm:$0xf0] }
 0x1bd   :  { %v862_v39 = vmax.f32 %v860_v6, %v861_v57  ;;  %v5272_v47 = vadd.f32 %v1960_v4, %v1911_v1  ;;  %v1027_v56 = vunpack.c.l.b16 %v899_v49  ;;  %v1060_v55 = vsel %vm1033_vm1, %v1020_v42, %v1059_v48  ;;  %v4398_v57 = vld [vmem:[#allocation2 + $0x1f4] sm:$0xf0]  ;;  %v3752_v30 = vld [vmem:[#allocation2 + $0xa8] sm:$0xf] }
 0x1be   :  { %v868_v44 = vmax.f32 %v866_v14, %v867_v27  ;;  %v1054_v26 = vsel %vm1035_vm2, %v1021_v35, %v1053_v24  ;;  %v1028_v33 = vunpack.c.l.b16 %v900_v28  ;;  %v1061_v41 = vsel %vm1035_vm2, %v1022_v43, %v1060_v55  ;;  %v4394_v42 = vld [vmem:[#allocation2 + $0x1d4] sm:$0xf0]  ;;  %v3864_v24 = vld [vmem:[#allocation2 + $0x188] sm:$0xf] }
 0x1bf   :  { %v863_v13 = vrot.slane %v862_v39, 1  ;;  %v1055_v54 = vsel %vm1037_vm3, %v1023_v25, %v1054_v26  ;;  %v1062_v14 = vsel %vm1037_vm3, %v1024_v32, %v1061_v41  ;;  %v3785_v4 = vor.u32 %v4366_v2, %v3784_v8  ;;  %v4358_v43 = vld [vmem:[#allocation2 + $0xb4] sm:$0xf0]  ;;  %v3848_v41 = vld [vmem:[#allocation2 + $0x168] sm:$0xf] }
 0x1c0   :  { %v869_v60 = vrot.slane %v868_v44, 1  ;;  %v1056_v22 = vsel %vm1039_vm4, %v1025_v19, %v1055_v54  ;;  %v1063_v12 = vsel %vm1039_vm4, %v1026_v29, %v1062_v14  ;;  %v3753_v48 = vor.u32 %v4358_v43, %v3752_v30  ;;  %v3736_v19 = vld [vmem:[#allocation2 + $0x88] sm:$0xf]  ;;  %v4386_v29 = vld [vmem:[#allocation2 + $0x194] sm:$0xf0] }
 0x1c1   :  { %v864_v34 = vmax.f32 %v862_v39, %v863_v13  ;;  %v1057_v21 = vsel %vm1041_vm5, %v1027_v56, %v1056_v22  ;;  %v1064_v1 = vsel %vm1041_vm5, %v1028_v33, %v1063_v12  ;;  %v3913_v39 = vor.u32 %v4398_v57, %v3912_v45  ;;  %v3720_v33 = vld [vmem:[#allocation2 + $0x68] sm:$0xf]  ;;  %v4382_v54 = vld [vmem:[#allocation2 + $0x174] sm:$0xf0]  ;;  %v3914_v30 = vld [vmem:[#allocation2 + $0x1f8] sm:$0xf0] }
 0x1c2   :  { %v870_v37 = vmax.f32 %v868_v44, %v869_v60  ;;  %v3896_v44 = vld [vmem:[#allocation2 + $0x1c8] sm:$0xf]  ;;  %v4390_v60 = vld [vmem:[#allocation2 + $0x1b4] sm:$0xf0]  ;;  %v3865_v26 = vor.u32 %v4386_v29, %v3864_v24  ;;  %v3849_v8 = vor.u32 %v4382_v54, %v3848_v41  ;;  %v3770_v24 = vld [vmem:[#allocation2 + $0xd8] sm:$0xf0] }
 0x1c3   :  { %v901_v62 = vpack.c.bf16 %v864_v34, %v864_v34  ;;  %v3897_v13 = vor.u32 %v4394_v42, %v3896_v44  ;;  %v4354_v34 = vld [vmem:[#allocation2 + $0x94] sm:$0xf0]  ;;  %v3704_v2 = vld [vmem:[#allocation2 + $0x48] sm:$0xf]  ;;  %v4392_v29 = vld [vmem:[#allocation2 + $0x1cc] sm:$0xf] }
 0x1c4   :  { %v902_v6 = vpack.c.bf16 %v870_v37, %v870_v37  ;;  %v5283_v11 = vpop.f32.mrf.mxu0  ;;  %v5285_v7 = vpop.f32.mrf.mxu1  ;;  %v3737_v56 = vor.u32 %v4354_v34, %v3736_v19  ;;  %v4346_v14 = vld [vmem:[#allocation2 + $0x54] sm:$0xf0]  ;;  %v3688_v12 = vld [vmem:[#allocation2 + $0x28] sm:$0xf]  ;;  %v4360_v34 = vld [vmem:[#allocation2 + $0xcc] sm:$0xf] }
 0x1c5   :  { %v1029_v15 = vunpack.c.l.b16 %v901_v62  ;;  %v4350_v62 = vld [vmem:[#allocation2 + $0x74] sm:$0xf0]  ;;  %v3705_v45 = vor.u32 %v4346_v14, %v3704_v2  ;;  %v3800_v42 = vld [vmem:[#allocation2 + $0x108] sm:$0xf]  ;;  %v3754_v41 = vld [vmem:[#allocation2 + $0xb8] sm:$0xf0] }
 0x1c6   :  { %v1030_v58 = vunpack.c.l.b16 %v902_v6  ;;  %v3721_v6 = vor.u32 %v4350_v62, %v3720_v33  ;;  %v4378_v22 = vld [vmem:[#allocation2 + $0x154] sm:$0xf0]  ;;  %v4356_v62 = vld [vmem:[#allocation2 + $0xac] sm:$0xf] }
 0x1c7   :  { %v1058_v27 = vsel %vm6342_vm6, %v1029_v15, %v1057_v21  ;;  %v3832_v15 = vld [vmem:[#allocation2 + $0x148] sm:$0xf]  ;;  %v4338_v44 = vld [vmem:[#allocation2 + $0x14] sm:$0xf0]  ;;  %v4388_v54 = vld [vmem:[#allocation2 + $0x1ac] sm:$0xf]  ;;  %v3757_v14 = vor.u32 %v4356_v62, %v3754_v41 }
 0x1c8   :  { %v5294_v5 = vpack.c.b16 %v1058_v27, %v5143_v52  ;;  %v1065_v59 = vsel %vm6342_vm6, %v1030_v58, %v1064_v1  ;;  %v3769_v52 = vor.u32 %v4362_v31, %v3768_v51  ;;  %v3833_v21 = vor.u32 %v4378_v22, %v3832_v15  ;;  %v4342_v27 = vld [vmem:[#allocation2 + $0x34] sm:$0xf0]  ;;  %v3672_v31 = vld [vmem:[#allocation2 + $0x8] sm:$0xf]  ;;  %v4336_v62 = vld [vmem:[#allocation2 + $0xc] sm:$0xf] }
 0x1c9   :  { %2106 = vmatmul.bf16.vlgmr.msra.gmra.mxu0 %v5097_v36  ;;  %v5299_v49 = vpack.c.b16 %v1065_v59, %v5146_v53  ;;  %v3880_v53 = vld [vmem:[#allocation2 + $0x1a8] sm:$0xf]  ;;  %v4374_v59 = vld [vmem:[#allocation2 + $0x134] sm:$0xf0]  ;;  %v3673_v43 = vor.u32 %v4338_v44, %v3672_v31  ;;  %v3674_v41 = vld [vmem:[#allocation2 + $0x18] sm:$0xf0] }
 0x1ca   :  { %2155 = vmatmul.bf16.vlgmr.msra.gmra.mxu1 %v5100_v38  ;;  %1398 = vmatmul.bf16.vlgmr.msra.gmra.mxu2 %v5294_v5  ;;  %v3881_v32 = vor.u32 %v4390_v60, %v3880_v53  ;;  %vm2346_vm6 = vcmask 1046529  }
 0x1cb   :  { %1412 = vmatmul.bf16.vlgmr.msra.gmra.mxu3 %v5299_v49  ;;  %1446 = vmatpush.bf16.msra.mxu2 %v3785_v4  ;;  %v3816_v4 = vld [vmem:[#allocation2 + $0x128] sm:$0xf] }
 0x1cc   :  { %1460 = vmatpush.bf16.msra.mxu3 %v3913_v39  ;;  %v1916_v35 = vpop.f32.mrf.mxu0  ;;  %v1965_v28 = vpop.f32.mrf.mxu1  ;;  %v3689_v39 = vor.u32 %v4342_v27, %v3688_v12  ;;  %v3817_v51 = vor.u32 %v4374_v59, %v3816_v4  ;;  %v4348_v4 = vld [vmem:[#allocation2 + $0x6c] sm:$0xf]  ;;  %v3722_v59 = vld [vmem:[#allocation2 + $0x78] sm:$0xf0] }
 0x1cd   :  { %v5304_v25 = vadd.f32 %v1965_v28, %v1916_v35  ;;  %v4364_v35 = vld [vmem:[#allocation2 + $0xec] sm:$0xf]  ;;  %v3786_v28 = vld [vmem:[#allocation2 + $0xf8] sm:$0xf0] }
 0x1cf   :  { %1447 = vmatpush.bf16.msra.mxu2 %v3769_v52  ;;  %v4370_v52 = vld [vmem:[#allocation2 + $0x114] sm:$0xf0] }
 0x1d0   :  { %1461 = vmatpush.bf16.msra.mxu3 %v3897_v13  ;;  %v4396_v13 = vld [vmem:[#allocation2 + $0x1ec] sm:$0xf] }
 0x1d1   :  { %v3917_v19 = vor.u32 %v4396_v13, %v3914_v30  ;;  %v4376_v13 = vld [vmem:[#allocation2 + $0x14c] sm:$0xf]  ;;  %v3834_v30 = vld [vmem:[#allocation2 + $0x158] sm:$0xf0] }
 0x1d3   :  { %1448 = vmatpush.bf16.msra.mxu2 %v3753_v48  ;;  %v3801_v48 = vor.u32 %v4370_v52, %v3800_v42  ;;  %v3725_v42 = vor.u32 %v4348_v4, %v3722_v59  ;;  %v4455_v4 = vld [vmem:[#allocation5 + $0x1c4] sm:$0xf]  ;;  %v4146_v59 = vld [vmem:[#allocation5 + $0x1d0] sm:$0xf0] }
 0x1d4   :  { %1462 = vmatpush.bf16.msra.mxu3 %v3881_v32  ;;  %v5306_v37 = vpop.f32.mrf.mxu0  ;;  %v5308_v55 = vpop.f32.mrf.mxu1  ;;  %v3789_v32 = vor.u32 %v4364_v35, %v3786_v28  ;;  %v4344_v35 = vld [vmem:[#allocation2 + $0x4c] sm:$0xf]  ;;  %v3706_v28 = vld [vmem:[#allocation2 + $0x58] sm:$0xf0] }
 0x1d7   :  { %1449 = vmatpush.bf16.msra.mxu2 %v3737_v56  ;;  %v3898_v56 = vld [vmem:[#allocation2 + $0x1d8] sm:$0xf0] }
 0x1d8   :  { %1463 = vmatpush.bf16.msra.mxu3 %v3865_v26  ;;  %v3773_v26 = vor.u32 %v4360_v34, %v3770_v24  ;;  %v3901_v33 = vor.u32 %v4392_v29, %v3898_v56  ;;  %v4372_v34 = vld [vmem:[#allocation2 + $0x12c] sm:$0xf]  ;;  %v3818_v24 = vld [vmem:[#allocation2 + $0x138] sm:$0xf0] }
 0x1d9   :  { %2111 = vmatmul.bf16.gmra.mxu0 %v5113_v16 }
 0x1da   :  { %2160 = vmatmul.bf16.gmra.mxu1 %v5116_v17  ;;  %1426 = vmatmul.bf16.vlgmr.msrb.gmra.mxu2 %v5294_v5 }
 0x1db   :  { %1440 = vmatmul.bf16.vlgmr.msrb.gmra.mxu3 %v5299_v49  ;;  %1450 = vmatpush.bf16.msra.mxu2 %v3721_v6  ;;  %v3882_v6 = vld [vmem:[#allocation2 + $0x1b8] sm:$0xf0] }
 0x1dc   :  { %1464 = vmatpush.bf16.msra.mxu3 %v3849_v8  ;;  %v1921_v57 = vpop.f32.mrf.mxu0  ;;  %v1970_v58 = vpop.f32.mrf.mxu1  ;;  %v3885_v22 = vor.u32 %v4388_v54, %v3882_v6  ;;  %v4368_v54 = vld [vmem:[#allocation2 + $0x10c] sm:$0xf]  ;;  %v3802_v6 = vld [vmem:[#allocation2 + $0x118] sm:$0xf0] }
 0x1dd   :  { %v5314_v1 = vadd.f32 %v1970_v58, %v1921_v57  ;;  %v3738_v57 = vld [vmem:[#allocation2 + $0x98] sm:$0xf0]  ;;  %v4384_v58 = vld [vmem:[#allocation2 + $0x18c] sm:$0xf] }
 0x1df   :  { %6364 = vst [vmem:[#allocation26_spill] sm:$0xff] %v5314_v1  ;;  %1451 = vmatpush.bf16.msra.mxu2 %v3705_v45  ;;  %v4352_v45 = vld [vmem:[#allocation2 + $0x8c] sm:$0xf] }
 0x1e0   :  { %1465 = vmatpush.bf16.msra.mxu3 %v3833_v21  ;;  %v3866_v21 = vld [vmem:[#allocation2 + $0x198] sm:$0xf0]  ;;  %v3741_v12 = vor.u32 %v4352_v45, %v3738_v57  ;;  %v3677_v45 = vor.u32 %v4336_v62, %v3674_v41  ;;  %v3805_v57 = vor.u32 %v4368_v54, %v3802_v6  ;;  %v3970_v62 = vld [vmem:[#allocation5 + $0x70] sm:$0xf0]  ;;  %v4443_v41 = vld [vmem:[#allocation5 + $0x164] sm:$0xf] }
 0x1e1   :  { %v3869_v27 = vor.u32 %v4384_v58, %v3866_v21 }
 0x1e3   :  { %1452 = vmatpush.bf16.msra.mxu2 %v3689_v39  ;;  %v4380_v39 = vld [vmem:[#allocation2 + $0x16c] sm:$0xf] }
 0x1e4   :  { %1466 = vmatpush.bf16.msra.mxu3 %v3817_v51  ;;  %v5316_v53 = vpop.f32.mrf.mxu0  ;;  %v5318_v60 = vpop.f32.mrf.mxu1  ;;  %v3850_v51 = vld [vmem:[#allocation2 + $0x178] sm:$0xf0] }
 0x1e5   :  { %v3853_v52 = vor.u32 %v4380_v39, %v3850_v51 }
 0x1e7   :  { %1453 = vmatpush.bf16.msra.mxu2 %v3673_v43  ;;  %v3709_v43 = vor.u32 %v4344_v35, %v3706_v28  ;;  %v4002_v35 = vld [vmem:[#allocation5 + $0xb0] sm:$0xf0] }
 0x1e8   :  { %1467 = vmatpush.bf16.msra.mxu3 %v3801_v48  ;;  %v3837_v48 = vor.u32 %v4376_v13, %v3834_v30  ;;  %v4451_v13 = vld [vmem:[#allocation5 + $0x1a4] sm:$0xf]  ;;  %v4130_v30 = vld [vmem:[#allocation5 + $0x1b0] sm:$0xf0] }
 0x1e9   :  { %2116 = vmatmul.bf16.gmra.mxu0 %v5124_v20 }
 0x1ea   :  { %2165 = vmatmul.bf16.gmra.mxu1 %v5127_v18  ;;  %1454 = vmatmul.bf16.vlgmr.msra.gmra.mxu2 %v5294_v5 }
 0x1eb   :  { %1474 = vmatpush.bf16.msrb.mxu2 %v3789_v32  ;;  %1468 = vmatmul.bf16.vlgmr.msra.gmra.mxu3 %v5299_v49  ;;  %v4340_v32 = vld [vmem:[#allocation2 + $0x2c] sm:$0xf] }
 0x1ec   :  { %1488 = vmatpush.bf16.msrb.mxu3 %v3917_v19  ;;  %v1926_v8 = vpop.f32.mrf.mxu0  ;;  %v1975_v2 = vpop.f32.mrf.mxu1  ;;  %v3690_v19 = vld [vmem:[#allocation2 + $0x38] sm:$0xf0] }
 0x1ed   :  { %v5324_v15 = vadd.f32 %v1975_v2, %v1926_v8  ;;  %v3693_v56 = vor.u32 %v4340_v32, %v3690_v19  ;;  %v4427_v8 = vld [vmem:[#allocation5 + $0xe4] sm:$0xf]  ;;  %v4034_v2 = vld [vmem:[#allocation5 + $0xf0] sm:$0xf0] }
 0x1ee   :  { %v4037_v58 = vor.u32 %v4427_v8, %v4034_v2  ;;  %v4415_v32 = vld [vmem:[#allocation5 + $0x84] sm:$0xf]  ;;  %v3986_v19 = vld [vmem:[#allocation5 + $0x90] sm:$0xf0] }
 0x1ef   :  { %1475 = vmatpush.bf16.msrb.mxu2 %v3773_v26  ;;  %6365 = vst [vmem:[#allocation27_spill] sm:$0xff] %v5324_v15  ;;  %v4058_v15 = vld [vmem:[#allocation5 + $0x118] sm:$0xf0] }
 0x1f0   :  { %1489 = vmatpush.bf16.msrb.mxu3 %v3901_v33  ;;  %v3821_v33 = vor.u32 %v4372_v34, %v3818_v24  ;;  %v4447_v34 = vld [vmem:[#allocation5 + $0x184] sm:$0xf]  ;;  %v4114_v24 = vld [vmem:[#allocation5 + $0x190] sm:$0xf0] }
 0x1f3   :  { %1476 = vmatpush.bf16.msrb.mxu2 %v3757_v14  ;;  %v4459_v14 = vld [vmem:[#allocation5 + $0x1e4] sm:$0xf] }
 0x1f4   :  { %1490 = vmatpush.bf16.msrb.mxu3 %v3885_v22  ;;  %v5326_v31 = vpop.f32.mrf.mxu0  ;;  %v5328_v44 = vpop.f32.mrf.mxu1  ;;  %v4162_v22 = vld [vmem:[#allocation5 + $0x1f0] sm:$0xf0] }
 0x1f5   :  { %v4165_v21 = vor.u32 %v4459_v14, %v4162_v22  ;;  %v4407_v14 = vld [vmem:[#allocation5 + $0x44] sm:$0xf]  ;;  %v3954_v22 = vld [vmem:[#allocation5 + $0x50] sm:$0xf0] }
 0x1f7   :  { %1477 = vmatpush.bf16.msrb.mxu2 %v3741_v12  ;;  %v4423_v12 = vld [vmem:[#allocation5 + $0xc4] sm:$0xf] }
 0x1f8   :  { %1491 = vmatpush.bf16.msrb.mxu3 %v3869_v27  ;;  %v4018_v27 = vld [vmem:[#allocation5 + $0xd0] sm:$0xf0] }
 0x1f9   :  { %2121 = vmatmul.bf16.gmra.mxu0 %v5134_v23  ;;  %v4021_v39 = vor.u32 %v4423_v12, %v4018_v27  ;;  %v4403_v12 = vld [vmem:[#allocation5 + $0x24] sm:$0xf]  ;;  %v3938_v27 = vld [vmem:[#allocation5 + $0x30] sm:$0xf0] }
 0x1fa   :  { %2170 = vmatmul.bf16.gmra.mxu1 %v5136_v10 }
 0x1fb   :  { %1478 = vmatpush.bf16.msrb.mxu2 %v3725_v42  ;;  %v4149_v42 = vor.u32 %v4455_v4, %v4146_v59  ;;  %v4435_v4 = vld [vmem:[#allocation5 + $0x124] sm:$0xf]  ;;  %v4066_v59 = vld [vmem:[#allocation5 + $0x130] sm:$0xf0] }
 0x1fc   :  { %1492 = vmatpush.bf16.msrb.mxu3 %v3853_v52  ;;  %v5332_v29 = vpop.f32.mrf.mxu0  ;;  %v5334_v26 = vpop.f32.mrf.mxu1  ;;  %v4419_v52 = vld [vmem:[#allocation5 + $0xa4] sm:$0xf] }
 0x1ff   :  { %1479 = vmatpush.bf16.msrb.mxu2 %v3709_v43  ;;  %v4005_v43 = vor.u32 %v4419_v52, %v4002_v35  ;;  %v4069_v52 = vor.u32 %v4435_v4, %v4066_v59  ;;  %v4399_v35 = vld [vmem:[#allocation5 + $0x4] sm:$0xf]  ;;  %v4138_v4 = vld [vmem:[#allocation5 + $0x1b8] sm:$0xf0] }
 0x200   :  { %1493 = vmatpush.bf16.msrb.mxu3 %v3837_v48  ;;  %v4133_v48 = vor.u32 %v4451_v13, %v4130_v30  ;;  %v3922_v13 = vld [vmem:[#allocation5 + $0x10] sm:$0xf0]  ;;  %v4431_v30 = vld [vmem:[#allocation5 + $0x104] sm:$0xf] }
 0x203   :  { %1480 = vmatpush.bf16.msrb.mxu2 %v3693_v56  ;;  %v3989_v56 = vor.u32 %v4415_v32, %v3986_v19  ;;  %v4428_v32 = vld [vmem:[#allocation5 + $0xec] sm:$0xf]  ;;  %v4042_v19 = vld [vmem:[#allocation5 + $0xf8] sm:$0xf0] }
 0x204   :  { %1494 = vmatpush.bf16.msrb.mxu3 %v3821_v33  ;;  %v5336_v51 = vpop.f32.mrf.mxu0  ;;  %v5338_v28 = vpop.f32.mrf.mxu1  ;;  %v4411_v33 = vld [vmem:[#allocation5 + $0x64] sm:$0xf] }
 0x205   :  { %v3973_v8 = vor.u32 %v4411_v33, %v3970_v62  ;;  %v4045_v33 = vor.u32 %v4428_v32, %v4042_v19  ;;  %v4122_v19 = vld [vmem:[#allocation5 + $0x198] sm:$0xf0] }
 0x207   :  { %1481 = vmatpush.bf16.msrb.mxu2 %v3677_v45  ;;  %v4439_v45 = vld [vmem:[#allocation5 + $0x144] sm:$0xf] }
 0x208   :  { %1495 = vmatpush.bf16.msrb.mxu3 %v3805_v57  ;;  %v4082_v57 = vld [vmem:[#allocation5 + $0x150] sm:$0xf0] }
 0x209   :  { %2126 = vmatmul.bf16.gmra.mxu0 %v5162_v61 }
 0x20a   :  { %1482 = vmatmul.bf16.vlgmr.msrb.gmra.mxu2 %v5294_v5  ;;  %2175 = vmatmul.bf16.gmra.mxu1 %v5166_v0  ;;  %v4117_v5 = vor.u32 %v4447_v34, %v4114_v24  ;;  %v4460_v34 = vld [vmem:[#allocation5 + $0x1ec] sm:$0xf]  ;;  %v4170_v24 = vld [vmem:[#allocation5 + $0x1f8] sm:$0xf0] }
 0x20b   :  { %2000 = vmatpush.bf16.msra.mxu2 %v4037_v58  ;;  %1496 = vmatmul.bf16.vlgmr.msrb.gmra.mxu3 %v5299_v49  ;;  %v4098_v49 = vld [vmem:[#allocation5 + $0x170] sm:$0xf0]  ;;  %v3957_v58 = vor.u32 %v4407_v14, %v3954_v22  ;;  %v4173_v62 = vor.u32 %v4460_v34, %v4170_v24 }
 0x20c   :  { %2049 = vmatpush.bf16.msra.mxu3 %v4165_v21  ;;  %v5344_v54 = vpop.f32.mrf.mxu0  ;;  %v5346_v6 = vpop.f32.mrf.mxu1  ;;  %v4101_v2 = vor.u32 %v4443_v41, %v4098_v49  ;;  %v4085_v21 = vor.u32 %v4439_v45, %v4082_v57  ;;  %v4424_v41 = vld [vmem:[#allocation5 + $0xcc] sm:$0xf]  ;;  %v4026_v49 = vld [vmem:[#allocation5 + $0xd8] sm:$0xf0] }
 0x20d   :  { %v4029_v14 = vor.u32 %v4424_v41, %v4026_v49  ;;  %v4444_v41 = vld [vmem:[#allocation5 + $0x16c] sm:$0xf] }
 0x20f   :  { %2001 = vmatpush.bf16.msra.mxu2 %v4021_v39  ;;  %v3941_v39 = vor.u32 %v4403_v12, %v3938_v27  ;;  %v4452_v12 = vld [vmem:[#allocation5 + $0x1ac] sm:$0xf] }
 0x210   :  { %2050 = vmatpush.bf16.msra.mxu3 %v4149_v42  ;;  %v4141_v59 = vor.u32 %v4452_v12, %v4138_v4  ;;  %v4408_v4 = vld [vmem:[#allocation5 + $0x4c] sm:$0xf] }
 0x213   :  { %2002 = vmatpush.bf16.msra.mxu2 %v4005_v43 }
 0x214   :  { %2051 = vmatpush.bf16.msra.mxu3 %v4133_v48  ;;  %v5349_v42 = vpop.f32.mrf.mxu0  ;;  %v5352_v43 = vpop.f32.mrf.mxu1  ;;  %v4050_v48 = vld [vmem:[#allocation5 + $0x110] sm:$0xf0] }
 0x217   :  { %2003 = vmatpush.bf16.msra.mxu2 %v3989_v56  ;;  %v3925_v56 = vor.u32 %v4399_v35, %v3922_v13  ;;  %v4416_v35 = vld [vmem:[#allocation5 + $0x8c] sm:$0xf]  ;;  %v3994_v13 = vld [vmem:[#allocation5 + $0x98] sm:$0xf0] }
 0x218   :  { %2052 = vmatpush.bf16.msra.mxu3 %v4117_v5  ;;  %v4053_v5 = vor.u32 %v4431_v30, %v4050_v48  ;;  %v4448_v30 = vld [vmem:[#allocation5 + $0x18c] sm:$0xf]  ;;  %v3997_v32 = vor.u32 %v4416_v35, %v3994_v13 }
 0x219   :  { %2131 = vmatmul.bf16.gmra.mxu0 %v5185_v63  ;;  %v4125_v24 = vor.u32 %v4448_v30, %v4122_v19  ;;  %v4440_v35 = vld [vmem:[#allocation5 + $0x14c] sm:$0xf] }
 0x21a   :  { %2180 = vmatmul.bf16.gmra.mxu1 %v5189_v3 }
 0x21b   :  { %2004 = vmatpush.bf16.msra.mxu2 %v3973_v8  ;;  %v4456_v8 = vld [vmem:[#allocation5 + $0x1cc] sm:$0xf] }
 0x21c   :  { %2053 = vmatpush.bf16.msra.mxu3 %v4101_v2  ;;  %v4154_v2 = vld [vmem:[#allocation5 + $0x1d8] sm:$0xf0]  ;;  %v5354_v45 = vpop.f32.mrf.mxu0  ;;  %v5357_v57 = vpop.f32.mrf.mxu1 }
 0x21d   :  { %v4157_v22 = vor.u32 %v4456_v8, %v4154_v2  ;;  %v4106_v2 = vld [vmem:[#allocation5 + $0x178] sm:$0xf0] }
 0x21f   :  { %2005 = vmatpush.bf16.msra.mxu2 %v3957_v58  ;;  %v4420_v58 = vld [vmem:[#allocation5 + $0xac] sm:$0xf] }
 0x220   :  { %2054 = vmatpush.bf16.msra.mxu3 %v4085_v21  ;;  %v4010_v21 = vld [vmem:[#allocation5 + $0xb8] sm:$0xf0] }
 0x221   :  { %v4013_v27 = vor.u32 %v4420_v58, %v4010_v21 }
 0x223   :  { %2006 = vmatpush.bf16.msra.mxu2 %v3941_v39 }
 0x224   :  { %2055 = vmatpush.bf16.msra.mxu3 %v4069_v52  ;;  %v5362_v39 = vpop.f32.mrf.mxu0  ;;  %v5364_v52 = vpop.f32.mrf.mxu1 }
 0x227   :  { %2007 = vmatpush.bf16.msra.mxu2 %v3925_v56 }
 0x228   :  { %2056 = vmatpush.bf16.msra.mxu3 %v4053_v5 }
 0x229   :  { %2136 = vmatmul.bf16.gmra.mxu0 %v5228_v46 }
 0x22a   :  { %2008 = vmatmul.bf16.vlgmr.msra.gmra.mxu2 %v5097_v36  ;;  %2185 = vmatmul.bf16.gmra.mxu1 %v5233_v50 }
 0x22b   :  { %2196 = vmatpush.bf16.msrb.mxu2 %v4045_v33  ;;  %2057 = vmatmul.bf16.vlgmr.msra.gmra.mxu3 %v5100_v38  ;;  %v4412_v33 = vld [vmem:[#allocation5 + $0x6c] sm:$0xf] }
 0x22c   :  { %2245 = vmatpush.bf16.msrb.mxu3 %v4173_v62  ;;  %v3978_v62 = vld [vmem:[#allocation5 + $0x78] sm:$0xf0] }
 0x22d   :  { %v3981_v8 = vor.u32 %v4412_v33, %v3978_v62 }
 0x22f   :  { %2197 = vmatpush.bf16.msrb.mxu2 %v4029_v14 }
 0x230   :  { %2246 = vmatpush.bf16.msrb.mxu3 %v4157_v22  ;;  %v4109_v22 = vor.u32 %v4444_v41, %v4106_v2  ;;  %v4470_v2 = vld [vmem:[%s6323_s12 + $0x38] sm:$0xff] }
 0x231   :  { %3150 = vmatpush.bf16.msrb.mxu0 %v4470_v2 }
 0x233   :  { %2198 = vmatpush.bf16.msrb.mxu2 %v4013_v27 }
 0x234   :  { %2247 = vmatpush.bf16.msrb.mxu3 %v4141_v59  ;;  %v3962_v59 = vld [vmem:[#allocation5 + $0x58] sm:$0xf0] }
 0x235   :  { %v3965_v30 = vor.u32 %v4408_v4, %v3962_v59  ;;  %v4404_v59 = vld [vmem:[#allocation5 + $0x2c] sm:$0xf] }
 0x236   :  { %v5368_v48 = vpop.f32.mrf.mxu0 }
 0x237   :  { %v5370_v34 = vpop.f32.mrf.mxu1  ;;  %2199 = vmatpush.bf16.msrb.mxu2 %v3997_v32  ;;  %v4090_v32 = vld [vmem:[#allocation5 + $0x158] sm:$0xf0] }
 0x238   :  { %2248 = vmatpush.bf16.msrb.mxu3 %v4125_v24  ;;  %v4093_v24 = vor.u32 %v4440_v35, %v4090_v32  ;;  %v3946_v35 = vld [vmem:[#allocation5 + $0x38] sm:$0xf0] }
 0x239   :  { %2141 = vmatmul.bf16.gmra.mxu0 %v5266_v9 }
 0x23a   :  { %2013 = vmatmul.bf16.gmra.mxu2 %v5113_v16  ;;  %2190 = vmatmul.bf16.gmra.mxu1 %v5268_v40 }
 0x23b   :  { %2062 = vmatmul.bf16.gmra.mxu3 %v5116_v17  ;;  %2200 = vmatpush.bf16.msrb.mxu2 %v3981_v8 }
 0x23c   :  { %2249 = vmatpush.bf16.msrb.mxu3 %v4109_v22 }
 0x23e   :  { %v5374_v56 = vpop.f32.mrf.mxu0 }
 0x23f   :  { %v5376_v5 = vpop.f32.mrf.mxu1  ;;  %2201 = vmatpush.bf16.msrb.mxu2 %v3965_v30  ;;  %v4436_v30 = vld [vmem:[#allocation5 + $0x12c] sm:$0xf] }
 0x240   :  { %2250 = vmatpush.bf16.msrb.mxu3 %v4093_v24  ;;  %v3949_v24 = vor.u32 %v4404_v59, %v3946_v35  ;;  %v4467_v59 = vld [vmem:[%s6323_s12 + $0x20] sm:$0xff] }
 0x243   :  { %2202 = vmatpush.bf16.msrb.mxu2 %v3949_v24  ;;  %v3930_v24 = vld [vmem:[#allocation5 + $0x18] sm:$0xf0] }
 0x246   :  { %v5380_v49 = vpop.f32.mrf.mxu0 }
 0x247   :  { %v5382_v14 = vpop.f32.mrf.mxu1 }
 0x24a   :  { %2018 = vmatmul.bf16.gmra.mxu2 %v5124_v20 }
 0x24b   :  { %2067 = vmatmul.bf16.gmra.mxu3 %v5127_v18 }
 0x24d   :  { %v5388_v12 = vpop.f32.mrf.mxu2 }
 0x24e   :  { %v5384_v58 = vpop.f32.mrf.mxu0  ;;  %v5390_v27 = vpop.f32.mrf.mxu3 }
 0x24f   :  { %v5386_v21 = vpop.f32.mrf.mxu1 }
 0x255   :  { %v5398_v33 = vpop.f32.mrf.mxu2 }
 0x256   :  { %v5394_v13 = vpop.f32.mrf.mxu0  ;;  %v5400_v62 = vpop.f32.mrf.mxu3 }
 0x257   :  { %v5396_v19 = vpop.f32.mrf.mxu1 }
 0x25a   :  { %2023 = vmatmul.bf16.gmra.mxu2 %v5134_v23  ;;  %v4469_v23 = vld [vmem:[%s6323_s12 + $0x30] sm:$0xff] }
 0x25b   :  { %2072 = vmatmul.bf16.gmra.mxu3 %v5136_v10  ;;  %v4074_v10 = vld [vmem:[#allocation5 + $0x138] sm:$0xf0]  ;;  %3151 = vmatpush.bf16.msrb.mxu0 %v4469_v23 }
 0x25c   :  { %v4077_v2 = vor.u32 %v4436_v30, %v4074_v10  ;;  %v4466_v23 = vld [vmem:[%s6323_s12 + $0x18] sm:$0xff]  ;;  %v4465_v10 = vld [vmem:[%s6323_s12 + $0x10] sm:$0xff]  ;;  %v4400_v30 = vld [vmem:[#allocation5 + $0xc] sm:$0xf] }
 0x25d   :  { %v1427_v22 = vpop.f32.mrf.mxu2 }
 0x25e   :  { %v5402_v41 = vpop.f32.mrf.mxu0  ;;  %v1441_v4 = vpop.f32.mrf.mxu3  ;;  %2251 = vmatpush.bf16.msrb.mxu3 %v4077_v2  ;;  %v4432_v2 = vld [vmem:[#allocation5 + $0x10c] sm:$0xf] }
 0x25f   :  { %v5404_v8 = vpop.f32.mrf.mxu1  ;;  %v4061_v38 = vor.u32 %v4432_v2, %v4058_v15 }
 0x262   :  { %2252 = vmatpush.bf16.msrb.mxu3 %v4061_v38  ;;  %v4477_v38 = vld [vmem:[%s6323_s12 + $0x70] sm:$0xff] }
 0x265   :  { %v1429_v35 = vpop.f32.mrf.mxu2 }
 0x266   :  { %v5411_v32 = vpop.f32.mrf.mxu0  ;;  %v1443_v20 = vpop.f32.mrf.mxu3 }
 0x267   :  { %v5416_v18 = vpop.f32.mrf.mxu1 }
 0x26a   :  { %2028 = vmatmul.bf16.gmra.mxu2 %v5162_v61 }
 0x26b   :  { %2077 = vmatmul.bf16.gmra.mxu3 %v5166_v0  ;;  %v4468_v0 = vld [vmem:[%s6323_s12 + $0x28] sm:$0xff] }
 0x26c   :  { %3152 = vmatpush.bf16.msrb.mxu0 %v4468_v0 }
 0x26d   :  { %v1455_v1 = vpop.f32.mrf.mxu2 }
 0x26e   :  { %v5424_v61 = vpop.f32.mrf.mxu0 }
 0x26f   :  { %v5426_v17 = vpop.f32.mrf.mxu1 }
 0x270   :  { %3153 = vmatpush.bf16.msrb.mxu0 %v4467_v59  ;;  %v3933_v59 = vor.u32 %v4400_v30, %v3930_v24  ;;  %v4478_v30 = vld [vmem:[%s6323_s12 + $0x78] sm:$0xff] }
 0x271   :  { %3199 = vmatpush.bf16.msrb.mxu1 %v4478_v30 }
 0x272   :  { %2203 = vmatpush.bf16.msrb.mxu2 %v3933_v59  ;;  %v5462_v59 = vadd.f32 %v5285_v7, %v5283_v11  ;;  %v1444_v11 = vadd.f32 %v1443_v20, %v1429_v35  ;;  %v5484_v7 = vadd.f32 %v5338_v28, %v5336_v51  ;;  %v5498_v20 = vadd.f32 %v5357_v57, %v5354_v45  ;;  %v4476_v45 = vld [vmem:[%s6323_s12 + $0x68] sm:$0xff] }
 0x273   :  { %v5516_v51 = vadd.f32 %v5382_v14, %v5380_v49  ;;  %v1414_v28 = vadd.f32 %v5390_v27, %v5388_v12  ;;  %v5535_v57 = vadd.f32 %v5404_v8, %v5402_v41 }
 0x274   :  { %3154 = vmatpush.bf16.msrb.mxu0 %v4466_v23  ;;  %v4464_v23 = vld [vmem:[%s6323_s12 + $0x8] sm:$0xff] }
 0x275   :  { %v5453_v24 = vpop.f32.mrf.mxu2  ;;  %3200 = vmatpush.bf16.msrb.mxu1 %v4477_v38  ;;  %6373 = vst [vmem:[#allocation35_spill] sm:$0xff] %v5535_v57 }
 0x276   :  { %v5436_v0 = vpop.f32.mrf.mxu0 }
 0x277   :  { %6366 = vst [vmem:[#allocation28_spill] sm:$0xff] %v5436_v0  ;;  %v5438_v16 = vpop.f32.mrf.mxu1 }
 0x278   :  { %6367 = vst [vmem:[#allocation29_spill] sm:$0xff] %v5438_v16  ;;  %3155 = vmatpush.bf16.msrb.mxu0 %v4465_v10  ;;  %v1442_v10 = vadd.f32 %v1441_v4, %v1427_v22  ;;  %v5475_v22 = vadd.f32 %v5328_v44, %v5326_v31  ;;  %v5479_v4 = vadd.f32 %v5334_v26, %v5332_v29 }
 0x279   :  { %v5502_v31 = vadd.f32 %v5364_v52, %v5362_v39  ;;  %v5506_v44 = vadd.f32 %v5370_v34, %v5368_v48  ;;  %v5510_v29 = vadd.f32 %v5376_v5, %v5374_v56  ;;  %3201 = vmatpush.bf16.msrb.mxu1 %v4476_v45 }
 0x27a   :  { %2033 = vmatmul.bf16.gmra.mxu2 %v5185_v63  ;;  %v1469_v63 = vpop.f32.mrf.mxu3 }
 0x27b   :  { %2082 = vmatmul.bf16.gmra.mxu3 %v5189_v3  ;;  %v4463_v3 = vld [vmem:[%s6323_s12] sm:$0xff]  ;;  %v1470_v39 = vadd.f32 %v1469_v63, %v1455_v1  ;;  %v5549_v63 = vadd.f32 %v5416_v18, %v5411_v32 }
 0x27c   :  { %3156 = vmatpush.bf16.msrb.mxu0 %v4464_v23  ;;  %v5466_v23 = vadd.f32 %v5308_v55, %v5306_v37  ;;  %v5488_v37 = vadd.f32 %v5346_v6, %v5344_v54  ;;  %v5492_v55 = vadd.f32 %v5352_v43, %v5349_v42  ;;  %v5522_v54 = vadd.f32 %v5386_v21, %v5384_v58  ;;  %v4475_v18 = vld [vmem:[%s6323_s12 + $0x60] sm:$0xff] }
 0x27d   :  { %v1416_v6 = vadd.f32 %v5400_v62, %v5398_v33  ;;  %v5528_v42 = vadd.f32 %v5396_v19, %v5394_v13  ;;  %v2305_v43 = vrot.slane %v1444_v11, 7  ;;  %6374 = vst [vmem:[#allocation36_spill] sm:$0xff] %v5549_v63  ;;  %v5572_v62 = vrot.slane %v1470_v39, 6  ;;  %v5581_v32 = vld [vmem:[%s6320_s9] sm:$0xf]  ;;  %3202 = vmatpush.bf16.msrb.mxu1 %v4475_v18  ;;  %v4474_v18 = vld [vmem:[%s6323_s12 + $0x58] sm:$0xff] }
 0x27e   :  { %v5446_v0 = vpop.f32.mrf.mxu0  ;;  %v5605_v39 = vperm.slane %v5581_v32, 0 }
 0x27f   :  { %6368 = vst [vmem:[#allocation30_spill] sm:$0xff] %v5446_v0  ;;  %v5451_v15 = vpop.f32.mrf.mxu1  ;;  %v5558_v27 = vsel %vm1033_vm1, %v1416_v6, %v2305_v43  ;;  %v5561_v13 = vsel %vm1035_vm2, %v1416_v6, %v2305_v43  ;;  %v5564_v19 = vsel %vm1037_vm3, %v1416_v6, %v2305_v43  ;;  %v5570_v33 = vsel %vm1039_vm4, %v1416_v6, %v2305_v43 }
 0x280   :  { %6369 = vst [vmem:[#allocation31_spill] sm:$0xff] %v5451_v15  ;;  %3157 = vmatpush.bf16.msrb.mxu0 %v4463_v3  ;;  %v5470_v3 = vadd.f32 %v5318_v60, %v5316_v53  ;;  %v2302_v53 = vrot.slane %v1442_v10, 7  ;;  %v5586_v30 = vsel %vm1041_vm5, %v1416_v6, %v2305_v43  ;;  %v5589_v10 = vsel %vm2334_vm8, %v2305_v43, %v1416_v6  ;;  %v4473_v15 = vld [vmem:[%s6323_s12 + $0x50] sm:$0xff] }
 0x281   :  { %6372 = vst [vmem:[#allocation34_spill] sm:$0xff] %v5528_v42  ;;  %3203 = vmatpush.bf16.msrb.mxu1 %v4474_v18 }
 0x282   :  { %v5455_v2 = vpop.f32.mrf.mxu3  ;;  %v2318_v48 = vsel %vm1033_vm1, %v1414_v28, %v2302_v53  ;;  %v2323_v34 = vsel %vm1035_vm2, %v1414_v28, %v2302_v53  ;;  %v2309_v5 = vsel %vm2308_vm7, %v1414_v28, %v2302_v53  ;;  %v2313_v49 = vsel %vm1031_vm0, %v1414_v28, %v2302_v53 }
 0x283   :  { %v5542_v14 = vsel %vm1037_vm3, %v1414_v28, %v2302_v53  ;;  %v5545_v58 = vsel %vm1039_vm4, %v1414_v28, %v2302_v53  ;;  %v5552_v21 = vsel %vm1041_vm5, %v1414_v28, %v2302_v53  ;;  %v5555_v12 = vsel %vm2334_vm8, %v2302_v53, %v1414_v28 }
 0x284   :  { %v5601_v28 = vsel %vm2308_vm7, %v1416_v6, %v2305_v43 }
 0x285   :  { %3204 = vmatpush.bf16.msrb.mxu1 %v4473_v15 }
 0x286   :  { %v5494_v60 = vpop.f32.mrf.mxu0 }
 0x287   :  { %6370 = vst [vmem:[#allocation32_spill] sm:$0xff] %v5494_v60  ;;  %v5512_v26 = vpop.f32.mrf.mxu1 }
 0x288   :  { %6371 = vst [vmem:[#allocation33_spill] sm:$0xff] %v5512_v26  ;;  %v5631_v26 = vsel %vm1031_vm0, %v1416_v6, %v2305_v43 }
 0x28a   :  { %2038 = vmatmul.bf16.gmra.mxu2 %v5228_v46 }
 0x28b   :  { %2087 = vmatmul.bf16.gmra.mxu3 %v5233_v50 }
 0x28d   :  { %v1483_v52 = vpop.f32.mrf.mxu2 }
 0x28e   :  { %v1497_v56 = vpop.f32.mrf.mxu3  ;;  %v5576_v8 = vpop.f32.mrf.mxu0 }
 0x28f   :  { %v1498_v1 = vadd.f32 %v1497_v56, %v1483_v52  ;;  %6375 = vst [vmem:[#allocation37_spill] sm:$0xff] %v5576_v8  ;;  %v5583_v35 = vpop.f32.mrf.mxu1  ;;  %v5610_v52 = vld [vmem:[%s6321_s10] sm:$0xf] }
 0x290   :  { %6376 = vst [vmem:[#allocation38_spill] sm:$0xff] %v5583_v35  ;;  %v5648_v6 = vperm.slane %v5610_v52, 2 }
 0x291   :  { %v5574_v41 = vrot.slane %v1498_v1, 5 }
 0x293   :  { %v2319_v38 = vsel %vm1037_vm3, %v5572_v62, %v5574_v41  ;;  %v2324_v11 = vsel %vm1039_vm4, %v5572_v62, %v5574_v41  ;;  %v2310_v53 = vsel %vm1033_vm1, %v5572_v62, %v5574_v41  ;;  %v2314_v1 = vsel %vm1035_vm2, %v5572_v62, %v5574_v41 }
 0x294   :  { %v2321_v45 = vsel %vm2320_vm9, %v2318_v48, %v2319_v38  ;;  %v5613_v56 = vsel %vm2311_vm10, %v2309_v5, %v2310_v53  ;;  %v1472_v48 = vadd.f32 %v5455_v2, %v5453_v24  ;;  %v2326_v50 = vsel %vm2325_vm11, %v2323_v34, %v2324_v11  ;;  %v5641_v34 = vld [vmem:[%s6322_s11] sm:$0xf] }
 0x295   :  { %v1485_v38 = vpop.f32.mrf.mxu2  ;;  %v2316_v46 = vsel %vm2315_vm12, %v2313_v49, %v2314_v1  ;;  %v2380_v35 = vperm.slane %v5613_v56, 0  ;;  %v5626_v53 = vrot.slane %v2321_v45, 2  ;;  %v5635_v24 = vperm.slane %v5610_v52, 0 }
 0x296   :  { %v1499_v5 = vpop.f32.mrf.mxu3  ;;  %v5628_v8 = vrot.slane %v2316_v46, 1  ;;  %v5645_v46 = vperm.slane %v5581_v32, 2  ;;  %v5650_v43 = vrot.slane %v2326_v50, 3  ;;  %v5653_v11 = vrot.slane %v1472_v48, 6 }
 0x297   :  { %v1500_v60 = vadd.f32 %v1499_v5, %v1485_v38  ;;  %v2508_v2 = vadd.f32 %v2380_v35, %v5272_v47  ;;  %v2132_v35 = vpop.f32.mrf.mxu0  ;;  %v2181_v1 = vpop.f32.mrf.mxu1  ;;  %v5660_v38 = vperm.slane %v5641_v34, 0  ;;  %v2329_v50 = vsel %vm1041_vm5, %v5572_v62, %v5574_v41 }
 0x298   :  { %v2384_v49 = vperm.slane %v5628_v8, 0  ;;  %v2388_v5 = vperm.slane %v5626_v53, 0  ;;  %v2392_v63 = vperm.slane %v5650_v43, 0  ;;  %v2331_v16 = vsel %vm2330_vm13, %v5542_v14, %v2329_v50 }
 0x299   :  { %v5655_v47 = vrot.slane %v1500_v60, 5  ;;  %v2582_v45 = vadd.f32 %v5605_v39, %v2508_v2 }
 0x29a   :  { %2043 = vmatmul.bf16.gmra.mxu2 %v5266_v9  ;;  %v2512_v18 = vadd.f32 %v2384_v49, %v5462_v59  ;;  %v2335_v59 = vsel %vm2334_vm8, %v5574_v41, %v5572_v62 }
 0x29b   :  { %2092 = vmatmul.bf16.gmra.mxu3 %v5268_v40  ;;  %v2357_v60 = vsel %vm1037_vm3, %v5653_v11, %v5655_v47  ;;  %v2361_v48 = vsel %vm1039_vm4, %v5653_v11, %v5655_v47  ;;  %v2656_v2 = vmul.f32 %v5635_v24, %v2582_v45  ;;  %v2337_v57 = vsel %vm2336_vm14, %v5545_v58, %v2335_v59 }
 0x29c   :  { %v2358_v49 = vsel %vm2320_vm9, %v5558_v27, %v2357_v60  ;;  %v2362_v40 = vsel %vm2325_vm11, %v5561_v13, %v2361_v48  ;;  %v2586_v9 = vadd.f32 %v5605_v39, %v2512_v18  ;;  %v2365_v27 = vsel %vm1041_vm5, %v5653_v11, %v5655_v47 }
 0x29d   :  { %v5685_v45 = vrot.slane %v2358_v49, 2  ;;  %v5687_v0 = vrot.slane %v2362_v40, 3  ;;  %v2730_v18 = vadd.f32 %v5660_v38, %v2656_v2  ;;  %v2369_v60 = vsel %vm2334_vm8, %v5655_v47, %v5653_v11 }
 0x29e   :  { %v2660_v13 = vmul.f32 %v5635_v24, %v2586_v9  ;;  %v2516_v48 = vadd.f32 %v2388_v5, %v5304_v25  ;;  %v2182_v40 = vadd.f32 %v2181_v1, %v2132_v35  ;;  %v5703_v14 = vsel %vm2336_vm14, %v5570_v33, %v2369_v60 }
 0x29f   :  { %v2422_v49 = vperm.slane %v5685_v45, 2  ;;  %v2340_v9 = vsel %vm2308_vm7, %v5572_v62, %v5574_v41  ;;  %v5709_v2 = vrot.slane %v2331_v16, 4  ;;  %v2520_v25 = vadd.f32 %v2392_v63, %v5466_v23  ;;  %v2134_v35 = vpop.f32.mrf.mxu0  ;;  %v2183_v60 = vpop.f32.mrf.mxu1  ;;  %v4472_v23 = vld [vmem:[%s6323_s12 + $0x48] sm:$0xff]  ;;  %v4486_v63 = vld [vmem:[%s6323_s12 + $0xb8] sm:$0xff] }
 0x2a0   :  { %v2734_v50 = vadd.f32 %v5660_v38, %v2660_v13  ;;  %v2426_v1 = vperm.slane %v5687_v0, 2  ;;  %v2366_v33 = vsel %vm2330_vm13, %v5564_v19, %v2365_v27  ;;  %v2373_v5 = vsel %vm2308_vm7, %v5653_v11, %v5655_v47  ;;  %3205 = vmatpush.bf16.msrb.mxu1 %v4472_v23  ;;  %3248 = vmatpush.bf16.msra.mxu2 %v4486_v63  ;;  %v6378_v23 = vld [vmem:[#allocation26_spill] sm:$0xff] }
 0x2a1   :  { %v2550_v15 = vadd.f32 %v2422_v49, %v2182_v40  ;;  %v2794_v13 = vmax.f32 %v2730_v18, 0.0  ;;  %v2590_v42 = vadd.f32 %v5605_v39, %v2516_v48  ;;  %v2342_v58 = vsel %vm2341_vm15, %v2340_v9, %v5552_v21  ;;  %v4494_v21 = vld [vmem:[%s6323_s12 + $0xf8] sm:$0xff]  ;;  %v4471_v9 = vld [vmem:[%s6323_s12 + $0x40] sm:$0xff] }
 0x2a2   :  { %v2798_v16 = vmax.f32 %v2734_v50, 0.0  ;;  %v2184_v59 = vadd.f32 %v2183_v60, %v2134_v35  ;;  %v2594_v27 = vadd.f32 %v5605_v39, %v2520_v25  ;;  %v2374_v18 = vsel %vm2341_vm15, %v2373_v5, %v5586_v30  ;;  %3297 = vmatpush.bf16.msra.mxu3 %v4494_v21 }
 0x2a3   :  { %v2624_v19 = vadd.f32 %v5645_v46, %v2550_v15  ;;  %v5738_v48 = vadd.f32 %v5426_v17, %v5424_v61  ;;  %v5740_v49 = vrot.slane %v2337_v57, 5  ;;  %v2345_v30 = vsel %vm1031_vm0, %v5572_v62, %v5574_v41 }
 0x2a4   :  { %v2858_v40 = vpack.c.bf16 %v2798_v16, %v2794_v13  ;;  %v2554_v25 = vadd.f32 %v2426_v1, %v2184_v59  ;;  %v5752_v17 = vperm.slane %v5581_v32, 1  ;;  %v5754_v61 = vrot.slane %v2366_v33, 4  ;;  %v6377_v33 = vld [vmem:[#allocation11_spill] sm:$0xff]  ;;  %3206 = vmatpush.bf16.msrb.mxu1 %v4471_v9 }
 0x2a5   :  { %v5749_v50 = vmul.f32 %v5648_v6, %v2624_v19  ;;  %v2664_v57 = vmul.f32 %v5635_v24, %v2590_v42  ;;  %v5757_v15 = vrot.slane %v2342_v58, 6  ;;  %v2347_v35 = vsel %vm2346_vm6, %v2345_v30, %v5555_v12 }
 0x2a6   :  { %3158 = vmatmul.bf16.vlgmr.msrb.gmra.mxu0 %v2858_v40  ;;  %v2377_v62 = vsel %vm1031_vm0, %v5653_v11, %v5655_v47  ;;  %v2628_v41 = vadd.f32 %v5645_v46, %v2554_v25  ;;  %v2668_v32 = vmul.f32 %v5635_v24, %v2594_v27  ;;  %v2396_v42 = vperm.slane %v5709_v2, 0 }
 0x2a7   :  { %v2378_v1 = vsel %vm2346_vm6, %v2377_v62, %v5589_v10  ;;  %v2381_v5 = vperm.slane %v5613_v56, 1  ;;  %v5773_v12 = vperm.slane %v5610_v52, 1  ;;  %v5776_v60 = vperm.slane %v5641_v34, 1  ;;  %v2137_v16 = vpop.f32.mrf.mxu0  ;;  %v2186_v59 = vpop.f32.mrf.mxu1 }
 0x2a8   :  { %v5780_v13 = vmul.f32 %v5648_v6, %v2628_v41  ;;  %v2385_v10 = vperm.slane %v5628_v8, 1  ;;  %v5783_v58 = vrot.slane %v2347_v35, 7  ;;  %v2524_v63 = vadd.f32 %v2396_v42, %v6378_v23 }
 0x2a9   :  { %v2430_v52 = vperm.slane %v5754_v61, 2  ;;  %v2404_v40 = vperm.slane %v5757_v15, 0  ;;  %v2187_v30 = vadd.f32 %v2186_v59, %v2137_v16  ;;  %v2738_v25 = vadd.f32 %v5660_v38, %v2664_v57 }
 0x2aa   :  { %2204 = vmatmul.bf16.vlgmr.msrb.gmra.mxu2 %v5097_v36  ;;  %v2400_v36 = vperm.slane %v5740_v49, 0  ;;  %v2742_v62 = vadd.f32 %v5660_v38, %v2668_v32  ;;  %v2598_v35 = vadd.f32 %v5605_v39, %v2524_v63  ;;  %v5794_v42 = vrot.slane %v5703_v14, 5  ;;  %v6380_v63 = vld [vmem:[#allocation27_spill] sm:$0xff] }
 0x2ab   :  { %2253 = vmatmul.bf16.vlgmr.msrb.gmra.mxu3 %v6377_v33  ;;  %v2558_v27 = vadd.f32 %v2430_v52, %v2187_v30  ;;  %v2350_v57 = vsel %vm1033_vm1, %v5653_v11, %v5655_v47  ;;  %v2802_v52 = vmax.f32 %v2738_v25, 0.0  ;;  %v5815_v30 = vrot.slane %v2378_v1, 7 }
 0x2ac   :  { %v2528_v21 = vadd.f32 %v2400_v36, %v5470_v3  ;;  %6379 = vst [vmem:[#allocation11_spill] sm:$0xff] %v5794_v42  ;;  %v5798_v3 = vrot.slane %v2374_v18, 6  ;;  %v2408_v36 = vperm.slane %v5783_v58, 0  ;;  %v2672_v16 = vmul.f32 %v5635_v24, %v2598_v35 }
 0x2ad   :  { %v2009_v19 = vpop.f32.mrf.mxu2  ;;  %v5808_v14 = vsel %vm2311_vm10, %v5601_v28, %v2350_v57  ;;  %v2632_v59 = vadd.f32 %v5645_v46, %v2558_v27  ;;  %v2806_v18 = vmax.f32 %v2742_v62, 0.0  ;;  %v2434_v27 = vperm.slane %v5794_v42, 2 }
 0x2ae   :  { %v2058_v9 = vpop.f32.mrf.mxu3  ;;  %v2602_v23 = vadd.f32 %v5605_v39, %v2528_v21  ;;  %v2353_v21 = vsel %vm1035_vm2, %v5653_v11, %v5655_v47  ;;  %v2536_v25 = vadd.f32 %v2408_v36, %v5475_v22  ;;  %v2412_v22 = vperm.slane %v5808_v14, 0 }
 0x2af   :  { %v2059_v41 = vadd.f32 %v2058_v9, %v2009_v19  ;;  %v2532_v19 = vadd.f32 %v2404_v40, %v6380_v63  ;;  %v2354_v40 = vsel %vm2315_vm12, %v5631_v26, %v2353_v21  ;;  %v5821_v28 = vmul.f32 %v5648_v6, %v2632_v59  ;;  %v2139_v35 = vpop.f32.mrf.mxu0  ;;  %v2188_v1 = vpop.f32.mrf.mxu1  ;;  %v4485_v26 = vld [vmem:[%s6323_s12 + $0xb0] sm:$0xff] }
 0x2b0   :  { %v5825_v62 = vrot.slane %v2354_v40, 1  ;;  %v2862_v63 = vpack.c.bf16 %v2806_v18, %v2802_v52  ;;  %v2438_v59 = vperm.slane %v5798_v3, 2  ;;  %3249 = vmatpush.bf16.msra.mxu2 %v4485_v26  ;;  %vm3346_vm6 = vcmask 523264  }
 0x2b1   :  { %v2509_v32 = vadd.f32 %v2381_v5, %v2059_v41  ;;  %v2676_v5 = vmul.f32 %v5635_v24, %v2602_v23  ;;  %6381 = vst [vmem:[#allocation26_spill] sm:$0xff] %v5821_v28  ;;  %v5829_v41 = vadd.f32 %v5660_v38, %v2672_v16  ;;  %v4493_v23 = vld [vmem:[%s6323_s12 + $0xf0] sm:$0xff]  ;;  %v2606_v57 = vadd.f32 %v5605_v39, %v2532_v19 }
 0x2b2   :  { %v2416_v16 = vperm.slane %v5825_v62, 0  ;;  %3298 = vmatpush.bf16.msra.mxu3 %v4493_v23  ;;  %v2610_v28 = vadd.f32 %v5605_v39, %v2536_v25  ;;  %vm6413_vm7 = vcmask 1047559  }
 0x2b3   :  { %v2583_v9 = vadd.f32 %v5752_v17, %v2509_v32  ;;  %v2189_v32 = vadd.f32 %v2188_v1, %v2139_v35  ;;  %v5844_v33 = vadd.f32 %v5660_v38, %v2676_v5  ;;  %v2540_v35 = vadd.f32 %v2412_v22, %v5479_v4  ;;  %vm6414_vm8 = vmmov %vm6413_vm7 }
 0x2b4   :  { %v2544_v52 = vadd.f32 %v2416_v16, %v5484_v7  ;;  %v2424_v4 = vperm.slane %v5687_v0, 0 }
 0x2b5   :  { %v2657_v11 = vmul.f32 %v5773_v12, %v2583_v9  ;;  %v2011_v47 = vpop.f32.mrf.mxu2  ;;  %v2562_v19 = vadd.f32 %v2434_v27, %v2189_v32  ;;  %v2614_v27 = vadd.f32 %v5605_v39, %v2540_v35  ;;  %v2814_v23 = vmax.f32 %v5844_v33, 0.0 }
 0x2b6   :  { %v2060_v36 = vpop.f32.mrf.mxu3  ;;  %3163 = vmatmul.bf16.gmra.mxu0 %v2862_v63  ;;  %v2618_v25 = vadd.f32 %v5605_v39, %v2544_v52  ;;  %v2428_v33 = vperm.slane %v5754_v61, 0 }
 0x2b7   :  { %v2731_v21 = vadd.f32 %v5776_v60, %v2657_v11  ;;  %v2061_v9 = vadd.f32 %v2060_v36, %v2011_v47  ;;  %v2680_v11 = vmul.f32 %v5635_v24, %v2606_v57  ;;  %v2420_v47 = vperm.slane %v5685_v45, 0  ;;  %v6382_v36 = vld [vmem:[#allocation12_spill] sm:$0xff]  ;;  %v2142_v32 = vpop.f32.mrf.mxu0  ;;  %v2191_v35 = vpop.f32.mrf.mxu1 }
 0x2b8   :  { %v2636_v5 = vadd.f32 %v5645_v46, %v2562_v19  ;;  %v2688_v63 = vmul.f32 %v5635_v24, %v2614_v27  ;;  %v2692_v16 = vmul.f32 %v5635_v24, %v2618_v25 }
 0x2b9   :  { %v2513_v18 = vadd.f32 %v2385_v10, %v2061_v9  ;;  %v2795_v26 = vmax.f32 %v2731_v21, 0.0  ;;  %v6383_v10 = vld [vmem:[#allocation13_spill] sm:$0xff]  ;;  %v2548_v57 = vadd.f32 %v2420_v47, %v5488_v37  ;;  %v2552_v9 = vadd.f32 %v2424_v4, %v5492_v55 }
 0x2ba   :  { %2209 = vmatmul.bf16.gmra.mxu2 %v6382_v36  ;;  %v5862_v22 = vmul.f32 %v5648_v6, %v2636_v5  ;;  %v2432_v37 = vperm.slane %v5794_v42, 0  ;;  %v2192_v47 = vadd.f32 %v2191_v35, %v2142_v32  ;;  %v2762_v5 = vadd.f32 %v5660_v38, %v2688_v63 }
 0x2bb   :  { %v2587_v7 = vadd.f32 %v5752_v17, %v2513_v18  ;;  %2258 = vmatmul.bf16.gmra.mxu3 %v6383_v10  ;;  %v2622_v52 = vadd.f32 %v5605_v39, %v2548_v57  ;;  %v2766_v36 = vadd.f32 %v5660_v38, %v2692_v16  ;;  %v2626_v27 = vadd.f32 %v5605_v39, %v2552_v9 }
 0x2bc   :  { %v2566_v10 = vadd.f32 %v2438_v59, %v2192_v47  ;;  %v2826_v57 = vmax.f32 %v2762_v5, 0.0  ;;  %v6384_v32 = vperm.slane %v5626_v53, 1  ;;  %v2560_v9 = vadd.f32 %v2432_v37, %v5502_v31 }
 0x2bd   :  { %v2661_v21 = vmul.f32 %v5773_v12, %v2587_v7  ;;  %v2014_v19 = vpop.f32.mrf.mxu2  ;;  %v2696_v4 = vmul.f32 %v5635_v24, %v2622_v52  ;;  %v2556_v7 = vadd.f32 %v2428_v33, %v5498_v20  ;;  %v2830_v40 = vmax.f32 %v2766_v36, 0.0 }
 0x2be   :  { %v2063_v18 = vpop.f32.mrf.mxu3  ;;  %v2700_v1 = vmul.f32 %v5635_v24, %v2626_v27  ;;  %v2684_v31 = vmul.f32 %v5635_v24, %v2610_v28 }
 0x2bf   :  { %v2735_v55 = vadd.f32 %v5776_v60, %v2661_v21  ;;  %v2064_v25 = vadd.f32 %v2063_v18, %v2014_v19  ;;  %v2770_v16 = vadd.f32 %v5660_v38, %v2696_v4  ;;  %v2640_v21 = vadd.f32 %v5645_v46, %v2566_v10  ;;  %v2144_v5 = vpop.f32.mrf.mxu0  ;;  %v2193_v27 = vpop.f32.mrf.mxu1 }
 0x2c0   :  { %v5883_v19 = vpack.c.bf16 %v2830_v40, %v2826_v57  ;;  %v2774_v35 = vadd.f32 %v5660_v38, %v2700_v1  ;;  %v2630_v20 = vadd.f32 %v5605_v39, %v2556_v7  ;;  %v2634_v18 = vadd.f32 %v5605_v39, %v2560_v9 }
 0x2c1   :  { %v2799_v42 = vmax.f32 %v2735_v55, 0.0  ;;  %v2517_v63 = vadd.f32 %v6384_v32, %v2064_v25  ;;  %v2834_v33 = vmax.f32 %v2770_v16, 0.0  ;;  %v5890_v47 = vmul.f32 %v5648_v6, %v2640_v21 }
 0x2c2   :  { %v2838_v37 = vmax.f32 %v2774_v35, 0.0  ;;  %v2704_v40 = vmul.f32 %v5635_v24, %v2630_v20  ;;  %v5896_v55 = vadd.f32 %v5660_v38, %v2680_v11  ;;  %v2708_v28 = vmul.f32 %v5635_v24, %v2634_v18 }
 0x2c3   :  { %v2591_v59 = vadd.f32 %v5752_v17, %v2517_v63  ;;  %v2859_v52 = vpack.c.bf16 %v2799_v42, %v2795_v26  ;;  %v4484_v42 = vld [vmem:[%s6323_s12 + $0xa8] sm:$0xff]  ;;  %v2436_v25 = vperm.slane %v5798_v3, 0  ;;  %v2194_v7 = vadd.f32 %v2193_v27, %v2144_v5 }
 0x2c4   :  { %v4492_v26 = vld [vmem:[%s6323_s12 + $0xe8] sm:$0xff]  ;;  %v5906_v10 = vpack.c.bf16 %v2838_v37, %v2834_v33  ;;  %v2778_v57 = vadd.f32 %v5660_v38, %v2704_v40  ;;  %v2440_v11 = vperm.slane %v5815_v30, 0  ;;  %v6385_v63 = vmax.f32 %v5829_v41, 0.0  ;;  %3250 = vmatpush.bf16.msra.mxu2 %v4484_v42 }
 0x2c5   :  { %v2665_v36 = vmul.f32 %v5773_v12, %v2591_v59  ;;  %3207 = vmatmul.bf16.vlgmr.msrb.gmra.mxu1 %v2859_v52  ;;  %v2016_v1 = vpop.f32.mrf.mxu2  ;;  %v2397_v9 = vperm.slane %v5709_v2, 1  ;;  %3299 = vmatpush.bf16.msra.mxu3 %v4492_v26  ;;  %v2782_v21 = vadd.f32 %v5660_v38, %v2708_v28  ;;  %v6386_v35 = vperm.slane %v5815_v30, 2  ;;  %v6389_v26 = vld [vmem:[#allocation15_spill] sm:$0xff] }
 0x2c6   :  { %v2065_v4 = vpop.f32.mrf.mxu3  ;;  %v2866_v16 = vpack.c.bf16 %v2814_v23, %v6385_v63  ;;  %v2842_v59 = vmax.f32 %v2778_v57, 0.0  ;;  %v2564_v52 = vadd.f32 %v2436_v25, %v5506_v44  ;;  %v2568_v33 = vadd.f32 %v2440_v11, %v5510_v29 }
 0x2c7   :  { %v2066_v32 = vadd.f32 %v2065_v4, %v2016_v1  ;;  %v2570_v20 = vadd.f32 %v6386_v35, %v2194_v7  ;;  %v6387_v18 = vperm.slane %v5650_v43, 1  ;;  %v2739_v41 = vadd.f32 %v5776_v60, %v2665_v36  ;;  %v6388_v1 = vld [vmem:[#allocation14_spill] sm:$0xff] }
 0x2c8   :  { %3168 = vmatmul.bf16.gmra.mxu0 %v2866_v16  ;;  %v2758_v23 = vadd.f32 %v5660_v38, %v2684_v31  ;;  %v2846_v37 = vmax.f32 %v2782_v21, 0.0  ;;  %v2638_v27 = vadd.f32 %v5605_v39, %v2564_v52  ;;  %v2642_v42 = vadd.f32 %v5605_v39, %v2568_v33 }
 0x2c9   :  { %v2521_v5 = vadd.f32 %v6387_v18, %v2066_v32  ;;  %v2644_v40 = vadd.f32 %v5645_v46, %v2570_v20  ;;  %v2382_v44 = vperm.slane %v5613_v56, 2  ;;  %v2818_v28 = vmax.f32 %v5896_v55, 0.0 }
 0x2ca   :  { %2214 = vmatmul.bf16.gmra.mxu2 %v6388_v1  ;;  %v5930_v36 = vpack.c.bf16 %v2846_v37, %v2842_v59  ;;  %v2386_v31 = vperm.slane %v5628_v8, 2  ;;  %v2712_v4 = vmul.f32 %v5635_v24, %v2638_v27  ;;  %v2716_v7 = vmul.f32 %v5635_v24, %v2642_v42  ;;  %v6391_v1 = vld [vmem:[#allocation35_spill] sm:$0xff] }
 0x2cb   :  { %v2595_v29 = vadd.f32 %v5752_v17, %v2521_v5  ;;  %2263 = vmatmul.bf16.gmra.mxu3 %v6389_v26  ;;  %v5934_v25 = vmul.f32 %v5648_v6, %v2644_v40  ;;  %v2510_v39 = vadd.f32 %v2382_v44, %v5516_v51  ;;  %v2803_v32 = vmax.f32 %v2739_v41, 0.0  ;;  %v6390_v5 = vld [vmem:[#allocation34_spill] sm:$0xff] }
 0x2cc   :  { %v2514_v63 = vadd.f32 %v2386_v31, %v5522_v54  ;;  %v5942_v55 = vperm.slane %v5641_v34, 2  ;;  %v2786_v21 = vadd.f32 %v5660_v38, %v2712_v4  ;;  %v2790_v35 = vadd.f32 %v5660_v38, %v2716_v7 }
 0x2cd   :  { %v2669_v57 = vmul.f32 %v5773_v12, %v2595_v29  ;;  %v2019_v11 = vpop.f32.mrf.mxu2  ;;  %v2584_v20 = vadd.f32 %v5645_v46, %v2510_v39  ;;  %v2390_v24 = vperm.slane %v5626_v53, 2  ;;  %v2394_v33 = vperm.slane %v5650_v43, 2 }
 0x2ce   :  { %v2068_v16 = vpop.f32.mrf.mxu3  ;;  %v2588_v52 = vadd.f32 %v5645_v46, %v2514_v63  ;;  %v2850_v54 = vmax.f32 %v2786_v21, 0.0  ;;  %v2854_v18 = vmax.f32 %v2790_v35, 0.0  ;;  %v2822_v42 = vmax.f32 %v2758_v23, 0.0  ;;  %v6394_v63 = vld [vmem:[#allocation30_spill] sm:$0xff] }
 0x2cf   :  { %v2069_v59 = vadd.f32 %v2068_v16, %v2019_v11  ;;  %v2743_v51 = vadd.f32 %v5776_v60, %v2669_v57  ;;  %v2658_v34 = vmul.f32 %v5648_v6, %v2584_v20  ;;  %v2518_v41 = vadd.f32 %v2390_v24, %v6390_v5  ;;  %v6393_v57 = vld [vmem:[#allocation29_spill] sm:$0xff]  ;;  %v6395_v16 = vld [vmem:[#allocation31_spill] sm:$0xff] }
 0x2d0   :  { %v2662_v38 = vmul.f32 %v5648_v6, %v2588_v52  ;;  %v2522_v27 = vadd.f32 %v2394_v33, %v6391_v1  ;;  %v5955_v44 = vpack.c.bf16 %v2854_v18, %v2850_v54  ;;  %v2174_v21 = vadd.f32 %v6395_v16, %v6394_v63  ;;  %v4491_v24 = vld [vmem:[%s6323_s12 + $0xe0] sm:$0xff]  ;;  %v6400_v16 = vld [vmem:[#allocation38_spill] sm:$0xff] }
 0x2d1   :  { %v2525_v37 = vadd.f32 %v2397_v9, %v2069_v59  ;;  %v2807_v40 = vmax.f32 %v2743_v51, 0.0  ;;  %v2732_v29 = vadd.f32 %v5942_v55, %v2658_v34  ;;  %v2592_v26 = vadd.f32 %v5645_v46, %v2518_v41  ;;  %v6392_v9 = vld [vmem:[#allocation28_spill] sm:$0xff]  ;;  %3300 = vmatpush.bf16.msra.mxu3 %v4491_v24  ;;  %v6399_v63 = vld [vmem:[#allocation37_spill] sm:$0xff] }
 0x2d2   :  { %v2736_v7 = vadd.f32 %v5942_v55, %v2662_v38  ;;  %v2596_v39 = vadd.f32 %v5645_v46, %v2522_v27  ;;  %v2172_v11 = vadd.f32 %v6393_v57, %v6392_v9  ;;  %v2398_v35 = vperm.slane %v5709_v2, 2  ;;  %v6396_v41 = vld [vmem:[#allocation36_spill] sm:$0xff] }
 0x2d3   :  { %v2599_v31 = vadd.f32 %v5752_v17, %v2525_v37  ;;  %v2863_v4 = vpack.c.bf16 %v2807_v40, %v2803_v32  ;;  %v2666_v23 = vmul.f32 %v5648_v6, %v2592_v26  ;;  %v4483_v32 = vld [vmem:[%s6323_s12 + $0xa0] sm:$0xff]  ;;  %v2796_v59 = vmax.f32 %v2732_v29, 0.0 }
 0x2d4   :  { %v2800_v51 = vmax.f32 %v2736_v7, 0.0  ;;  %v2670_v52 = vmul.f32 %v5648_v6, %v2596_v39  ;;  %v2402_v33 = vperm.slane %v5740_v49, 2  ;;  %v2401_v18 = vperm.slane %v5740_v49, 1  ;;  %3251 = vmatpush.bf16.msra.mxu2 %v4483_v32  ;;  %v6398_v7 = vld [vmem:[#allocation33_spill] sm:$0xff] }
 0x2d5   :  { %3212 = vmatmul.bf16.gmra.mxu1 %v2863_v4  ;;  %v2021_v20 = vpop.f32.mrf.mxu2  ;;  %v2870_v34 = vpack.c.bf16 %v2822_v42, %v2818_v28  ;;  %v2740_v5 = vadd.f32 %v5942_v55, %v2666_v23  ;;  %v2526_v37 = vadd.f32 %v2398_v35, %v6396_v41  ;;  %v2673_v40 = vmul.f32 %v5773_v12, %v2599_v31  ;;  %v6397_v42 = vld [vmem:[#allocation32_spill] sm:$0xff] }
 0x2d6   :  { %v2070_v54 = vpop.f32.mrf.mxu3  ;;  %v5980_v1 = vpack.c.bf16 %v2800_v51, %v2796_v59  ;;  %v2406_v27 = vperm.slane %v5757_v15, 2  ;;  %v2744_v29 = vadd.f32 %v5942_v55, %v2670_v52  ;;  %v2530_v4 = vadd.f32 %v2402_v33, %v5738_v48  ;;  %v6401_v35 = vld [vmem:[#allocation16_spill] sm:$0xff]  ;;  %v6402_v59 = vld [vmem:[#allocation17_spill] sm:$0xff] }
 0x2d7   :  { %v2071_v38 = vadd.f32 %v2070_v54, %v2021_v20  ;;  %v2804_v26 = vmax.f32 %v2740_v5, 0.0  ;;  %v2600_v28 = vadd.f32 %v5645_v46, %v2526_v37  ;;  %v2177_v39 = vadd.f32 %v6398_v7, %v6397_v42 }
 0x2d8   :  { %3173 = vmatmul.bf16.gmra.mxu0 %v2870_v34  ;;  %v2410_v31 = vperm.slane %v5783_v58, 2  ;;  %v2534_v57 = vadd.f32 %v2406_v27, %v2172_v11  ;;  %v2179_v23 = vadd.f32 %v6400_v16, %v6399_v63  ;;  %v2808_v20 = vmax.f32 %v2744_v29, 0.0 }
 0x2d9   :  { %v2529_v9 = vadd.f32 %v2401_v18, %v2071_v38  ;;  %v2604_v32 = vadd.f32 %v5645_v46, %v2530_v4  ;;  %v2674_v48 = vmul.f32 %v5648_v6, %v2600_v28  ;;  %v2747_v51 = vadd.f32 %v5776_v60, %v2673_v40 }
 0x2da   :  { %2219 = vmatmul.bf16.gmra.mxu2 %v6401_v35  ;;  %v2538_v52 = vadd.f32 %v2410_v31, %v2174_v21  ;;  %v2608_v33 = vadd.f32 %v5645_v46, %v2534_v57  ;;  %v5998_v11 = vpack.c.bf16 %v2808_v20, %v2804_v26  ;;  %v2414_v34 = vperm.slane %v5808_v14, 2 }
 0x2db   :  { %v2603_v24 = vadd.f32 %v5752_v17, %v2529_v9  ;;  %2268 = vmatmul.bf16.gmra.mxu3 %v6402_v59  ;;  %v2678_v54 = vmul.f32 %v5648_v6, %v2604_v32  ;;  %v2748_v18 = vadd.f32 %v5942_v55, %v2674_v48  ;;  %v2418_v40 = vperm.slane %v5825_v62, 2 }
 0x2dc   :  { %v2612_v37 = vadd.f32 %v5645_v46, %v2538_v52  ;;  %v2682_v38 = vmul.f32 %v5648_v6, %v2608_v33  ;;  %v2405_v27 = vperm.slane %v5757_v15, 1  ;;  %v2542_v4 = vadd.f32 %v2414_v34, %v2177_v39 }
 0x2dd   :  { %v2677_v5 = vmul.f32 %v5773_v12, %v2603_v24  ;;  %v2024_v41 = vpop.f32.mrf.mxu2  ;;  %v2752_v29 = vadd.f32 %v5942_v55, %v2678_v54  ;;  %v2812_v26 = vmax.f32 %v2748_v18, 0.0  ;;  %v2811_v31 = vmax.f32 %v2747_v51, 0.0 }
 0x2de   :  { %v2073_v21 = vpop.f32.mrf.mxu3  ;;  %v2686_v7 = vmul.f32 %v5648_v6, %v2612_v37  ;;  %v2756_v9 = vadd.f32 %v5942_v55, %v2682_v38  ;;  %v2546_v63 = vadd.f32 %v2418_v40, %v2179_v23  ;;  %v2616_v16 = vadd.f32 %v5645_v46, %v2542_v4  ;;  %v6403_v40 = vld [vmem:[#allocation26_spill] sm:$0xff] }
 0x2df   :  { %v2074_v28 = vadd.f32 %v2073_v21, %v2024_v41  ;;  %v2751_v42 = vadd.f32 %v5776_v60, %v2677_v5  ;;  %v2816_v57 = vmax.f32 %v2752_v29, 0.0  ;;  %v2772_v52 = vadd.f32 %v5942_v55, %v5749_v50  ;;  %v4490_v50 = vld [vmem:[%s6323_s12 + $0xd8] sm:$0xff] }
 0x2e0   :  { %v2760_v32 = vadd.f32 %v5942_v55, %v2686_v7  ;;  %v2820_v48 = vmax.f32 %v2756_v9, 0.0  ;;  %v2620_v39 = vadd.f32 %v5645_v46, %v2546_v63  ;;  %v2690_v59 = vmul.f32 %v5648_v6, %v2616_v16  ;;  %v4482_v46 = vld [vmem:[%s6323_s12 + $0x98] sm:$0xff]  ;;  %3301 = vmatpush.bf16.msra.mxu3 %v4490_v50  ;;  %v6404_v63 = vld [vmem:[#allocation18_spill] sm:$0xff]  ;;  %v4481_v50 = vld [vmem:[%s6323_s12 + $0x90] sm:$0xff] }
 0x2e1   :  { %v2533_v35 = vadd.f32 %v2405_v27, %v2074_v28  ;;  %v2815_v20 = vmax.f32 %v2751_v42, 0.0  ;;  %v6014_v24 = vpack.c.bf16 %v2816_v57, %v2812_v26  ;;  %v2776_v23 = vadd.f32 %v5942_v55, %v5780_v13  ;;  %3252 = vmatpush.bf16.msra.mxu2 %v4482_v46 }
 0x2e2   :  { %v2824_v51 = vmax.f32 %v2760_v32, 0.0  ;;  %v2694_v54 = vmul.f32 %v5648_v6, %v2620_v39  ;;  %v2764_v18 = vadd.f32 %v5942_v55, %v2690_v59  ;;  %v2836_v37 = vmax.f32 %v2772_v52, 0.0 }
 0x2e3   :  { %v2867_v33 = vpack.c.bf16 %v2815_v20, %v2811_v31  ;;  %v2607_v34 = vadd.f32 %v5752_v17, %v2533_v35  ;;  %v2840_v13 = vmax.f32 %v2776_v23, 0.0  ;;  %v2780_v21 = vadd.f32 %v5942_v55, %v6403_v40  ;;  %v6405_v20 = vld [vmem:[#allocation19_spill] sm:$0xff] }
 0x2e4   :  { %v6031_v41 = vpack.c.bf16 %v2824_v51, %v2820_v48  ;;  %v2768_v6 = vadd.f32 %v5942_v55, %v2694_v54  ;;  %v2784_v27 = vadd.f32 %v5942_v55, %v5862_v22  ;;  %v2409_v26 = vperm.slane %v5783_v58, 1 }
 0x2e5   :  { %3217 = vmatmul.bf16.gmra.mxu1 %v2867_v33  ;;  %v2026_v5 = vpop.f32.mrf.mxu2  ;;  %v6039_v4 = vpack.c.bf16 %v2840_v13, %v2836_v37  ;;  %v2828_v28 = vmax.f32 %v2764_v18, 0.0  ;;  %v2844_v7 = vmax.f32 %v2780_v21, 0.0  ;;  %v2681_v31 = vmul.f32 %v5773_v12, %v2607_v34  ;;  %3253 = vmatpush.bf16.msra.mxu2 %v4481_v50 }
 0x2e6   :  { %v2075_v38 = vpop.f32.mrf.mxu3  ;;  %v2832_v42 = vmax.f32 %v2768_v6, 0.0  ;;  %v2848_v9 = vmax.f32 %v2784_v27, 0.0  ;;  %v2788_v59 = vadd.f32 %v5942_v55, %v5890_v47  ;;  %v2413_v33 = vperm.slane %v5808_v14, 1  ;;  %v4489_v47 = vld [vmem:[%s6323_s12 + $0xd0] sm:$0xff] }
 0x2e7   :  { %v2076_v29 = vadd.f32 %v2075_v38, %v2026_v5  ;;  %v2755_v39 = vadd.f32 %v5776_v60, %v2681_v31  ;;  %v2792_v37 = vadd.f32 %v5942_v55, %v5934_v25  ;;  %v2417_v6 = vperm.slane %v5825_v62, 1  ;;  %3302 = vmatpush.bf16.msra.mxu3 %v4489_v47  ;;  %v6407_v25 = vld [vmem:[#allocation21_spill] sm:$0xff] }
 0x2e8   :  { %3178 = vmatmul.bf16.gmra.mxu0 %v5883_v19  ;;  %v6044_v16 = vpack.c.bf16 %v2832_v42, %v2828_v28  ;;  %v6046_v22 = vpack.c.bf16 %v2848_v9, %v2844_v7  ;;  %v2852_v40 = vmax.f32 %v2788_v59, 0.0  ;;  %v6406_v28 = vld [vmem:[#allocation20_spill] sm:$0xff] }
 0x2e9   :  { %v2537_v57 = vadd.f32 %v2409_v26, %v2076_v29  ;;  %v2819_v54 = vmax.f32 %v2755_v39, 0.0  ;;  %v2856_v21 = vmax.f32 %v2792_v37, 0.0 }
 0x2ea   :  { %2224 = vmatmul.bf16.gmra.mxu2 %v6404_v63  ;;  %v2421_v63 = vperm.slane %v5685_v45, 1 }
 0x2eb   :  { %v2611_v35 = vadd.f32 %v5752_v17, %v2537_v57  ;;  %2273 = vmatmul.bf16.gmra.mxu3 %v6405_v20  ;;  %v6068_v26 = vpack.c.bf16 %v2856_v21, %v2852_v40 }
 0x2ed   :  { %v2685_v32 = vmul.f32 %v5773_v12, %v2611_v35  ;;  %v2029_v48 = vpop.f32.mrf.mxu2 }
 0x2ee   :  { %v2078_v52 = vpop.f32.mrf.mxu3 }
 0x2ef   :  { %v2079_v19 = vadd.f32 %v2078_v52, %v2029_v48  ;;  %v2759_v51 = vadd.f32 %v5776_v60, %v2685_v32  ;;  %v4480_v52 = vld [vmem:[%s6323_s12 + $0x88] sm:$0xff] }
 0x2f0   :  { %3254 = vmatpush.bf16.msra.mxu2 %v4480_v52 }
 0x2f1   :  { %v2541_v23 = vadd.f32 %v2413_v33, %v2079_v19  ;;  %v2823_v18 = vmax.f32 %v2759_v51, 0.0  ;;  %v2425_v51 = vperm.slane %v5687_v0, 1 }
 0x2f3   :  { %v2871_v34 = vpack.c.bf16 %v2823_v18, %v2819_v54  ;;  %v2615_v5 = vadd.f32 %v5752_v17, %v2541_v23  ;;  %v4488_v23 = vld [vmem:[%s6323_s12 + $0xc8] sm:$0xff] }
 0x2f4   :  { %3303 = vmatpush.bf16.msra.mxu3 %v4488_v23 }
 0x2f5   :  { %3222 = vmatmul.bf16.gmra.mxu1 %v2871_v34  ;;  %v2031_v46 = vpop.f32.mrf.mxu2  ;;  %v2689_v27 = vmul.f32 %v5773_v12, %v2615_v5  ;;  %v6408_v34 = vld [vmem:[#allocation22_spill] sm:$0xff] }
 0x2f6   :  { %v2080_v13 = vpop.f32.mrf.mxu3 }
 0x2f7   :  { %v2081_v38 = vadd.f32 %v2080_v13, %v2031_v46  ;;  %v2763_v9 = vadd.f32 %v5776_v60, %v2689_v27  ;;  %v6409_v46 = vld [vmem:[#allocation23_spill] sm:$0xff]  ;;  %v4479_v13 = vld [vmem:[%s6323_s12 + $0x80] sm:$0xff] }
 0x2f8   :  { %3183 = vmatmul.bf16.gmra.mxu0 %v5906_v10  ;;  %3255 = vmatpush.bf16.msra.mxu2 %v4479_v13 }
 0x2f9   :  { %v2545_v29 = vadd.f32 %v2417_v6, %v2081_v38  ;;  %v2827_v20 = vmax.f32 %v2763_v9, 0.0  ;;  %v6410_v9 = vld [vmem:[#allocation11_spill] sm:$0xff] }
 0x2fa   :  { %2229 = vmatmul.bf16.gmra.mxu2 %v6406_v28 }
 0x2fb   :  { %v2619_v42 = vadd.f32 %v5752_v17, %v2545_v29  ;;  %2278 = vmatmul.bf16.gmra.mxu3 %v6407_v25 }
 0x2fd   :  { %v2693_v55 = vmul.f32 %v5773_v12, %v2619_v42  ;;  %v2034_v7 = vpop.f32.mrf.mxu2 }
 0x2fe   :  { %v2083_v31 = vpop.f32.mrf.mxu3 }
 0x2ff   :  { %v2084_v57 = vadd.f32 %v2083_v31, %v2034_v7  ;;  %v2767_v35 = vadd.f32 %v5776_v60, %v2693_v55  ;;  %v2433_v31 = vperm.slane %v6410_v9, 1 }
 0x301   :  { %v2549_v10 = vadd.f32 %v2421_v63, %v2084_v57  ;;  %v2831_v32 = vmax.f32 %v2767_v35, 0.0  ;;  %v4487_v35 = vld [vmem:[%s6323_s12 + $0xc0] sm:$0xff] }
 0x302   :  { %3304 = vmatpush.bf16.msra.mxu3 %v4487_v35 }
 0x303   :  { %v2875_v48 = vpack.c.bf16 %v2831_v32, %v2827_v20  ;;  %v2623_v39 = vadd.f32 %v5752_v17, %v2549_v10  ;;  %v6411_v10 = vld [vmem:[#allocation24_spill] sm:$0xff]  ;;  %v6412_v32 = vld [vmem:[#allocation25_spill] sm:$0xff] }
 0x305   :  { %3227 = vmatmul.bf16.gmra.mxu1 %v2875_v48  ;;  %v2036_v59 = vpop.f32.mrf.mxu2  ;;  %v2697_v54 = vmul.f32 %v5773_v12, %v2623_v39 }
 0x306   :  { %v2085_v19 = vpop.f32.mrf.mxu3 }
 0x307   :  { %v2086_v33 = vadd.f32 %v2085_v19, %v2036_v59  ;;  %v2771_v37 = vadd.f32 %v5776_v60, %v2697_v54 }
 0x308   :  { %3188 = vmatmul.bf16.gmra.mxu0 %v5930_v36  ;;  %v2429_v36 = vperm.slane %v5754_v61, 1 }
 0x309   :  { %v2553_v18 = vadd.f32 %v2425_v51, %v2086_v33  ;;  %v2835_v27 = vmax.f32 %v2771_v37, 0.0 }
 0x30a   :  { %2234 = vmatmul.bf16.gmra.mxu2 %v6408_v34 }
 0x30b   :  { %v2627_v5 = vadd.f32 %v5752_v17, %v2553_v18  ;;  %2283 = vmatmul.bf16.gmra.mxu3 %v6409_v46 }
 0x30d   :  { %v2701_v50 = vmul.f32 %v5773_v12, %v2627_v5  ;;  %v2039_v47 = vpop.f32.mrf.mxu2 }
 0x30e   :  { %v2088_v38 = vpop.f32.mrf.mxu3 }
 0x30f   :  { %v2089_v6 = vadd.f32 %v2088_v38, %v2039_v47  ;;  %v2775_v40 = vadd.f32 %v5776_v60, %v2701_v50  ;;  %v2441_v47 = vperm.slane %v5815_v30, 1 }
 0x311   :  { %v2557_v21 = vadd.f32 %v2429_v36, %v2089_v6  ;;  %v2839_v29 = vmax.f32 %v2775_v40, 0.0 }
 0x313   :  { %v2879_v28 = vpack.c.bf16 %v2839_v29, %v2835_v27  ;;  %v2631_v42 = vadd.f32 %v5752_v17, %v2557_v21  ;;  %v2383_v29 = vperm.slane %v5613_v56, 3 }
 0x315   :  { %3232 = vmatmul.bf16.gmra.mxu1 %v2879_v28  ;;  %v2041_v25 = vpop.f32.mrf.mxu2  ;;  %v2705_v57 = vmul.f32 %v5773_v12, %v2631_v42 }
 0x316   :  { %v2090_v55 = vpop.f32.mrf.mxu3 }
 0x317   :  { %v2091_v7 = vadd.f32 %v2090_v55, %v2041_v25  ;;  %v2779_v59 = vadd.f32 %v5776_v60, %v2705_v57  ;;  %v4553_v55 = vld [vmem:[%s6320_s9] sm:$0xf] }
 0x318   :  { %3193 = vmatmul.bf16.gmra.mxu0 %v5955_v44  ;;  %v2437_v44 = vperm.slane %v5798_v3, 1  ;;  %v4554_v57 = vld [vmem:[%s6321_s10] sm:$0xf] }
 0x319   :  { %v2561_v63 = vadd.f32 %v2433_v31, %v2091_v7  ;;  %v2843_v23 = vmax.f32 %v2779_v59, 0.0  ;;  %v6129_v56 = vperm.slane %v4554_v57, 3  ;;  %v2399_v57 = vperm.slane %v5709_v2, 3 }
 0x31a   :  { %2239 = vmatmul.bf16.gmra.mxu2 %v6411_v10  ;;  %v2387_v10 = vperm.slane %v5628_v8, 3 }
 0x31b   :  { %v2635_v20 = vadd.f32 %v5752_v17, %v2561_v63  ;;  %2288 = vmatmul.bf16.gmra.mxu3 %v6412_v32  ;;  %v4555_v32 = vld [vmem:[%s6322_s11] sm:$0xf] }
 0x31d   :  { %v2709_v48 = vmul.f32 %v5773_v12, %v2635_v20  ;;  %v2044_v39 = vpop.f32.mrf.mxu2 }
 0x31e   :  { %v2093_v52 = vpop.f32.mrf.mxu3 }
 0x31f   :  { %v2094_v19 = vadd.f32 %v2093_v52, %v2044_v39  ;;  %v2783_v33 = vadd.f32 %v5776_v60, %v2709_v48  ;;  %v6136_v48 = vperm.slane %v4555_v32, 3 }
 0x321   :  { %v2565_v51 = vadd.f32 %v2437_v44, %v2094_v19  ;;  %v2847_v54 = vmax.f32 %v2783_v33, 0.0  ;;  %v6143_v19 = vld [vmem:[%s6324_s13] ss:$0 sm:$0xff] }
 0x323   :  { %v2883_v18 = vpack.c.bf16 %v2847_v54, %v2843_v23  ;;  %v2639_v34 = vadd.f32 %v5752_v17, %v2565_v51  ;;  %v3159_v42 = vpop.f32.mrf.mxu0 }
 0x325   :  { %3237 = vmatmul.bf16.gmra.mxu1 %v2883_v18  ;;  %v2046_v5 = vpop.f32.mrf.mxu2  ;;  %v2713_v37 = vmul.f32 %v5773_v12, %v2639_v34  ;;  %v2391_v18 = vperm.slane %v5626_v53, 3 }
 0x326   :  { %v2095_v46 = vpop.f32.mrf.mxu3 }
 0x327   :  { %v2096_v50 = vadd.f32 %v2095_v46, %v2046_v5  ;;  %v2787_v40 = vadd.f32 %v5776_v60, %v2713_v37 }
 0x329   :  { %v2569_v13 = vadd.f32 %v2441_v47, %v2096_v50 }
 0x32a   :  { %3256 = vmatmul.bf16.vlgmr.msra.gmra.mxu2 %v5980_v1  ;;  %v6123_v1 = vperm.slane %v4553_v55, 3 }
 0x32b   :  { %v2643_v38 = vadd.f32 %v5752_v17, %v2569_v13  ;;  %v2851_v17 = vmax.f32 %v2787_v40, 0.0  ;;  %v3161_v59 = vpop.f32.mrf.mxu0 }
 0x32c   :  { %v3162_v53 = vadd.f32 %v6143_v19, %v3161_v59 }
 0x32d   :  { %v2717_v6 = vmul.f32 %v5773_v12, %v2643_v38  ;;  %v2205_v36 = vpop.f32.mrf.mxu2 }
 0x32e   :  { %v2254_v21 = vpop.f32.mrf.mxu3 }
 0x32f   :  { %v2255_v27 = vadd.f32 %v2254_v21, %v2205_v36  ;;  %v2791_v28 = vadd.f32 %v5776_v60, %v2717_v6  ;;  %v2395_v21 = vperm.slane %v5650_v43, 3 }
 0x331   :  { %v2511_v25 = vadd.f32 %v2383_v29, %v2255_v27  ;;  %v2855_v7 = vmax.f32 %v2791_v28, 0.0 }
 0x333   :  { %v2887_v12 = vpack.c.bf16 %v2855_v7, %v2851_v17  ;;  %v2585_v31 = vadd.f32 %v6123_v1, %v2511_v25  ;;  %v3164_v13 = vpop.f32.mrf.mxu0 }
 0x335   :  { %3242 = vmatmul.bf16.gmra.mxu1 %v2887_v12  ;;  %v2207_v60 = vpop.f32.mrf.mxu2  ;;  %v2659_v20 = vmul.f32 %v6129_v56, %v2585_v31 }
 0x336   :  { %v2256_v63 = vpop.f32.mrf.mxu3 }
 0x337   :  { %v2257_v35 = vadd.f32 %v2256_v63, %v2207_v60  ;;  %v2733_v8 = vadd.f32 %v6136_v48, %v2659_v20  ;;  %v3165_v63 = vadd.f32 %v6143_v19, %v3164_v13  ;;  %v2407_v13 = vperm.slane %v5757_v15, 3 }
 0x338   :  { %v2411_v15 = vperm.slane %v5783_v58, 3 }
 0x339   :  { %v2515_v39 = vadd.f32 %v2387_v10, %v2257_v35  ;;  %v2797_v34 = vmax.f32 %v2733_v8, 0.0 }
 0x33a   :  { %3261 = vmatmul.bf16.gmra.mxu2 %v5998_v11  ;;  %v3160_v11 = vadd.f32 %v6143_v19, %v3159_v42 }
 0x33b   :  { %v2589_v52 = vadd.f32 %v6123_v1, %v2515_v39  ;;  %v3166_v12 = vpop.f32.mrf.mxu0 }
 0x33d   :  { %v2663_v44 = vmul.f32 %v6129_v56, %v2589_v52  ;;  %v2210_v33 = vpop.f32.mrf.mxu2 }
 0x33e   :  { %v2259_v51 = vpop.f32.mrf.mxu3 }
 0x33f   :  { %v2737_v23 = vadd.f32 %v6136_v48, %v2663_v44  ;;  %v2260_v54 = vadd.f32 %v2259_v51, %v2210_v33  ;;  %v2403_v33 = vperm.slane %v5740_v49, 3  ;;  %v3167_v51 = vadd.f32 %v6143_v19, %v3166_v12 }
 0x341   :  { %v2801_v5 = vmax.f32 %v2737_v23, 0.0  ;;  %v2519_v46 = vadd.f32 %v2391_v18, %v2260_v54 }
 0x342   :  { %v3208_v50 = vpop.f32.mrf.mxu1 }
 0x343   :  { %v6150_v47 = vadd.f32 %v3208_v50, %v3160_v11  ;;  %v2861_v37 = vpack.c.bf16 %v2801_v5, %v2797_v34  ;;  %v2593_v38 = vadd.f32 %v6123_v1, %v2519_v46 }
 0x345   :  { %3305 = vmatmul.bf16.vlgmr.msra.gmra.mxu3 %v2861_v37  ;;  %v2212_v6 = vpop.f32.mrf.mxu2  ;;  %v2667_v27 = vmul.f32 %v6129_v56, %v2593_v38  ;;  %v3169_v2 = vpop.f32.mrf.mxu0 }
 0x346   :  { %v2261_v36 = vpop.f32.mrf.mxu3 }
 0x347   :  { %v2262_v40 = vadd.f32 %v2261_v36, %v2212_v6  ;;  %v2741_v7 = vadd.f32 %v6136_v48, %v2667_v27  ;;  %v3170_v6 = vadd.f32 %v6143_v19, %v3169_v2 }
 0x349   :  { %v2523_v29 = vadd.f32 %v2395_v21, %v2262_v40 }
 0x34a   :  { %v3210_v28 = vpop.f32.mrf.mxu1  ;;  %3266 = vmatmul.bf16.gmra.mxu2 %v6014_v24  ;;  %v2805_v24 = vmax.f32 %v2741_v7, 0.0 }
 0x34b   :  { %v2597_v42 = vadd.f32 %v6123_v1, %v2523_v29  ;;  %v6158_v25 = vadd.f32 %v3210_v28, %v3162_v53 }
 0x34d   :  { %v2671_v55 = vmul.f32 %v6129_v56, %v2597_v42  ;;  %v2215_v17 = vpop.f32.mrf.mxu2  ;;  %v3171_v21 = vpop.f32.mrf.mxu0 }
 0x34e   :  { %v2264_v31 = vpop.f32.mrf.mxu3  ;;  %v3172_v7 = vadd.f32 %v6143_v19, %v3171_v21 }
 0x34f   :  { %v2265_v43 = vadd.f32 %v2264_v31, %v2215_v17  ;;  %v2745_v60 = vadd.f32 %v6136_v48, %v2671_v55 }
 0x351   :  { %v2527_v35 = vadd.f32 %v2399_v57, %v2265_v43  ;;  %v2809_v10 = vmax.f32 %v2745_v60, 0.0 }
 0x352   :  { %v3213_v20 = vpop.f32.mrf.mxu1 }
 0x353   :  { %v6165_v32 = vadd.f32 %v3213_v20, %v3165_v63  ;;  %v2865_v39 = vpack.c.bf16 %v2809_v10, %v2805_v24  ;;  %v2601_v59 = vadd.f32 %v6123_v1, %v2527_v35 }
 0x355   :  { %3310 = vmatmul.bf16.gmra.mxu3 %v2865_v39  ;;  %v2217_v52 = vpop.f32.mrf.mxu2  ;;  %v2675_v23 = vmul.f32 %v6129_v56, %v2601_v59  ;;  %v3174_v63 = vpop.f32.mrf.mxu0  ;;  %v2415_v39 = vperm.slane %v5808_v14, 3  ;;  %v2419_v14 = vperm.slane %v5825_v62, 3  ;;  %v2423_v62 = vperm.slane %v5685_v45, 3 }
 0x356   :  { %v2266_v8 = vpop.f32.mrf.mxu3 }
 0x357   :  { %v2267_v44 = vadd.f32 %v2266_v8, %v2217_v52  ;;  %v2749_v50 = vadd.f32 %v6136_v48, %v2675_v23  ;;  %v3175_v52 = vadd.f32 %v6143_v19, %v3174_v63 }
 0x359   :  { %v2531_v54 = vadd.f32 %v2403_v33, %v2267_v44  ;;  %v2813_v40 = vmax.f32 %v2749_v50, 0.0 }
 0x35a   :  { %v3215_v18 = vpop.f32.mrf.mxu1  ;;  %3271 = vmatmul.bf16.gmra.mxu2 %v6031_v41 }
 0x35b   :  { %v2605_v11 = vadd.f32 %v6123_v1, %v2531_v54  ;;  %v6173_v34 = vadd.f32 %v3215_v18, %v3167_v51 }
 0x35d   :  { %v2679_v5 = vmul.f32 %v6129_v56, %v2605_v11  ;;  %v2220_v46 = vpop.f32.mrf.mxu2  ;;  %v3176_v18 = vpop.f32.mrf.mxu0 }
 0x35e   :  { %v2269_v37 = vpop.f32.mrf.mxu3 }
 0x35f   :  { %v2270_v49 = vadd.f32 %v2269_v37, %v2220_v46  ;;  %v2753_v38 = vadd.f32 %v6136_v48, %v2679_v5  ;;  %v3177_v46 = vadd.f32 %v6143_v19, %v3176_v18 }
 0x361   :  { %v2535_v36 = vadd.f32 %v2407_v13, %v2270_v49  ;;  %v2817_v41 = vmax.f32 %v2753_v38, 0.0 }
 0x362   :  { %v3218_v53 = vpop.f32.mrf.mxu1 }
 0x363   :  { %v6180_v27 = vadd.f32 %v3218_v53, %v3170_v6  ;;  %v2869_v29 = vpack.c.bf16 %v2817_v41, %v2813_v40  ;;  %v2609_v28 = vadd.f32 %v6123_v1, %v2535_v36 }
 0x365   :  { %3315 = vmatmul.bf16.gmra.mxu3 %v2869_v29  ;;  %v2222_v42 = vpop.f32.mrf.mxu2  ;;  %v2683_v12 = vmul.f32 %v6129_v56, %v2609_v28 }
 0x366   :  { %v2271_v55 = vpop.f32.mrf.mxu3 }
 0x367   :  { %v2272_v17 = vadd.f32 %v2271_v55, %v2222_v42  ;;  %v2757_v10 = vadd.f32 %v6136_v48, %v2683_v12  ;;  %v2427_v12 = vperm.slane %v5687_v0, 3 }
 0x369   :  { %v2539_v31 = vadd.f32 %v2411_v15, %v2272_v17 }
 0x36a   :  { %v3220_v43 = vpop.f32.mrf.mxu1  ;;  %3276 = vmatmul.bf16.gmra.mxu2 %v6044_v16  ;;  %v2821_v16 = vmax.f32 %v2757_v10, 0.0 }
 0x36b   :  { %v2613_v57 = vadd.f32 %v6123_v1, %v2539_v31  ;;  %v6188_v60 = vadd.f32 %v3220_v43, %v3172_v7 }
 0x36d   :  { %v2687_v35 = vmul.f32 %v6129_v56, %v2613_v57  ;;  %v2225_v24 = vpop.f32.mrf.mxu2 }
 0x36e   :  { %v2274_v20 = vpop.f32.mrf.mxu3 }
 0x36f   :  { %v2275_v58 = vadd.f32 %v2274_v20, %v2225_v24  ;;  %v2761_v59 = vadd.f32 %v6136_v48, %v2687_v35  ;;  %v2431_v20 = vperm.slane %v5754_v61, 3 }
 0x371   :  { %v2543_v8 = vadd.f32 %v2415_v39, %v2275_v58  ;;  %v2825_v44 = vmax.f32 %v2761_v59, 0.0 }
 0x372   :  { %v3223_v33 = vpop.f32.mrf.mxu1 }
 0x373   :  { %v6195_v2 = vadd.f32 %v3223_v33, %v3175_v52  ;;  %v2873_v51 = vpack.c.bf16 %v2825_v44, %v2821_v16  ;;  %v2617_v23 = vadd.f32 %v6123_v1, %v2543_v8  ;;  %v2435_v33 = vperm.slane %v6410_v9, 3 }
 0x375   :  { %3320 = vmatmul.bf16.gmra.mxu3 %v2873_v51  ;;  %v2227_v54 = vpop.f32.mrf.mxu2  ;;  %v2691_v50 = vmul.f32 %v6129_v56, %v2617_v23 }
 0x376   :  { %v2276_v11 = vpop.f32.mrf.mxu3 }
 0x377   :  { %v2277_v5 = vadd.f32 %v2276_v11, %v2227_v54  ;;  %v2765_v40 = vadd.f32 %v6136_v48, %v2691_v50 }
 0x379   :  { %v2547_v37 = vadd.f32 %v2419_v14, %v2277_v5  ;;  %v2829_v28 = vmax.f32 %v2765_v40, 0.0 }
 0x37a   :  { %v3225_v49 = vpop.f32.mrf.mxu1  ;;  %3281 = vmatmul.bf16.gmra.mxu2 %v6039_v4 }
 0x37b   :  { %v2621_v13 = vadd.f32 %v6123_v1, %v2547_v37  ;;  %v6203_v38 = vadd.f32 %v3225_v49, %v3177_v46  ;;  %v2439_v46 = vperm.slane %v5798_v3, 3 }
 0x37d   :  { %v2695_v6 = vmul.f32 %v6129_v56, %v2621_v13  ;;  %v2230_v36 = vpop.f32.mrf.mxu2 }
 0x37e   :  { %v2279_v41 = vpop.f32.mrf.mxu3 }
 0x37f   :  { %v2280_v21 = vadd.f32 %v2279_v41, %v2230_v36  ;;  %v2769_v53 = vadd.f32 %v6136_v48, %v2695_v6  ;;  %v2443_v41 = vperm.slane %v5815_v30, 3 }
 0x381   :  { %v2551_v29 = vadd.f32 %v2423_v62, %v2280_v21  ;;  %v2833_v42 = vmax.f32 %v2769_v53, 0.0 }
 0x383   :  { %v2877_v55 = vpack.c.bf16 %v2833_v42, %v2829_v28  ;;  %v2625_v4 = vadd.f32 %v6123_v1, %v2551_v29 }
 0x385   :  { %3325 = vmatmul.bf16.gmra.mxu3 %v2877_v55  ;;  %v2232_v17 = vpop.f32.mrf.mxu2  ;;  %v2699_v31 = vmul.f32 %v6129_v56, %v2625_v4 }
 0x386   :  { %v2281_v15 = vpop.f32.mrf.mxu3 }
 0x387   :  { %v2282_v7 = vadd.f32 %v2281_v15, %v2232_v17  ;;  %v2773_v35 = vadd.f32 %v6136_v48, %v2699_v31 }
 0x389   :  { %v2555_v43 = vadd.f32 %v2427_v12, %v2282_v7  ;;  %v2837_v0 = vmax.f32 %v2773_v35, 0.0 }
 0x38a   :  { %3286 = vmatmul.bf16.gmra.mxu2 %v6046_v22 }
 0x38b   :  { %v2629_v45 = vadd.f32 %v6123_v1, %v2555_v43 }
 0x38d   :  { %v2703_v57 = vmul.f32 %v6129_v56, %v2629_v45  ;;  %v2235_v63 = vpop.f32.mrf.mxu2 }
 0x38e   :  { %v2284_v24 = vpop.f32.mrf.mxu3 }
 0x38f   :  { %v2285_v10 = vadd.f32 %v2284_v24, %v2235_v63  ;;  %v2777_v58 = vadd.f32 %v6136_v48, %v2703_v57 }
 0x391   :  { %v2559_v39 = vadd.f32 %v2431_v20, %v2285_v10  ;;  %v2841_v59 = vmax.f32 %v2777_v58, 0.0 }
 0x393   :  { %v2881_v52 = vpack.c.bf16 %v2841_v59, %v2837_v0  ;;  %v2633_v8 = vadd.f32 %v6123_v1, %v2559_v39 }
 0x395   :  { %3330 = vmatmul.bf16.gmra.mxu3 %v2881_v52  ;;  %v2237_v22 = vpop.f32.mrf.mxu2  ;;  %v2707_v51 = vmul.f32 %v6129_v56, %v2633_v8 }
 0x396   :  { %v2286_v16 = vpop.f32.mrf.mxu3 }
 0x397   :  { %v2287_v44 = vadd.f32 %v2286_v16, %v2237_v22  ;;  %v2781_v11 = vadd.f32 %v6136_v48, %v2707_v51 }
 0x399   :  { %v2563_v23 = vadd.f32 %v2435_v33, %v2287_v44  ;;  %v2845_v9 = vmax.f32 %v2781_v11, 0.0 }
 0x39a   :  { %3291 = vmatmul.bf16.gmra.mxu2 %v6068_v26 }
 0x39b   :  { %v2637_v61 = vadd.f32 %v6123_v1, %v2563_v23 }
 0x39d   :  { %v2711_v54 = vmul.f32 %v6129_v56, %v2637_v61  ;;  %v2240_v18 = vpop.f32.mrf.mxu2 }
 0x39e   :  { %v2289_v5 = vpop.f32.mrf.mxu3 }
 0x39f   :  { %v2290_v14 = vadd.f32 %v2289_v5, %v2240_v18  ;;  %v2785_v50 = vadd.f32 %v6136_v48, %v2711_v54 }
 0x3a1   :  { %v2567_v37 = vadd.f32 %v2439_v46, %v2290_v14  ;;  %v2849_v49 = vmax.f32 %v2785_v50, 0.0 }
 0x3a3   :  { %v2885_v13 = vpack.c.bf16 %v2849_v49, %v2845_v9  ;;  %v2641_v6 = vadd.f32 %v6123_v1, %v2567_v37 }
 0x3a5   :  { %3335 = vmatmul.bf16.gmra.mxu3 %v2885_v13  ;;  %v2242_v26 = vpop.f32.mrf.mxu2  ;;  %v2715_v21 = vmul.f32 %v6129_v56, %v2641_v6 }
 0x3a6   :  { %v2291_v36 = vpop.f32.mrf.mxu3 }
 0x3a7   :  { %v2292_v40 = vadd.f32 %v2291_v36, %v2242_v26  ;;  %v2789_v28 = vadd.f32 %v6136_v48, %v2715_v21 }
 0x3a9   :  { %v2571_v62 = vadd.f32 %v2443_v41, %v2292_v40  ;;  %v2853_v4 = vmax.f32 %v2789_v28, 0.0  ;;  %v4497_v40 = vld [vmem:[%s6325_s14 + $0x10] sm:$0xff] }
 0x3ab   :  { %v2645_v53 = vadd.f32 %v6123_v1, %v2571_v62  ;;  %v4498_v1 = vld [vmem:[%s6325_s14 + $0x18] sm:$0xff] }
 0x3ac   :  { %3565 = vmatpush.bf16.msra.mxu0 %v4498_v1 }
 0x3ad   :  { %v2719_v3 = vmul.f32 %v6129_v56, %v2645_v53  ;;  %v3257_v29 = vpop.f32.mrf.mxu2 }
 0x3ae   :  { %v3258_v42 = vadd.f32 %v3257_v29, %v6150_v47 }
 0x3af   :  { %v2793_v55 = vadd.f32 %v6136_v48, %v2719_v3 }
 0x3b0   :  { %3566 = vmatpush.bf16.msra.mxu0 %v4497_v40 }
 0x3b1   :  { %v2857_v17 = vmax.f32 %v2793_v55, 0.0 }
 0x3b3   :  { %v2889_v15 = vpack.c.bf16 %v2857_v17, %v2853_v4 }
 0x3b5   :  { %3340 = vmatmul.bf16.gmra.mxu3 %v2889_v15  ;;  %v3259_v7 = vpop.f32.mrf.mxu2 }
 0x3b6   :  { %v3260_v30 = vadd.f32 %v3259_v7, %v6158_v25 }
 0x3bd   :  { %v3262_v12 = vpop.f32.mrf.mxu2 }
 0x3be   :  { %v3263_v31 = vadd.f32 %v3262_v12, %v6165_v32 }
 0x3c5   :  { %v3264_v56 = vpop.f32.mrf.mxu2 }
 0x3c6   :  { %v3265_v43 = vadd.f32 %v3264_v56, %v6173_v34 }
 0x3c8   :  { %v3306_v47 = vpop.f32.mrf.mxu3 }
 0x3c9   :  { %v3307_v48 = vadd.f32 %v3306_v47, %v3258_v42 }
 0x3cb   :  { %v3347_v45 = vsel %vm3346_vm6, %v3307_v48, -inf }
 0x3cc   :  { %v3348_v57 = vrot.slane %v3347_v45, 4 }
 0x3cd   :  { %v3267_v63 = vpop.f32.mrf.mxu2 }
 0x3ce   :  { %v3349_v35 = vmax.f32 %v3347_v45, %v3348_v57  ;;  %v3268_v25 = vadd.f32 %v3267_v63, %v6180_v27  ;;  %v6258_v57 = vpop.f32.mrf.mxu1 }
 0x3d0   :  { %v3350_v24 = vrot.slane %v3349_v35, 2  ;;  %v3308_v32 = vpop.f32.mrf.mxu3 }
 0x3d1   :  { %v3309_v10 = vadd.f32 %v3308_v32, %v3260_v30 }
 0x3d2   :  { %v3351_v20 = vmax.f32 %v3349_v35, %v3350_v24 }
 0x3d3   :  { %v3354_v58 = vsel %vm3346_vm6, %v3309_v10, -inf }
 0x3d4   :  { %v3355_v39 = vrot.slane %v3354_v58, 4  ;;  %v3352_v34 = vrot.slane %v3351_v20, 1 }
 0x3d5   :  { %v3269_v0 = vpop.f32.mrf.mxu2 }
 0x3d6   :  { %v3356_v59 = vmax.f32 %v3354_v58, %v3355_v39  ;;  %v3270_v52 = vadd.f32 %v3269_v0, %v6188_v60  ;;  %v3353_v44 = vmax.f32 %v3351_v20, %v3352_v34 }
 0x3d8   :  { %v3357_v8 = vrot.slane %v3356_v59, 2  ;;  %v3311_v22 = vpop.f32.mrf.mxu3  ;;  %v3459_v54 = vpack.c.bf16 %v3353_v44, %v3353_v44 }
 0x3d9   :  { %v3312_v16 = vadd.f32 %v3311_v22, %v3263_v31 }
 0x3da   :  { %v3358_v33 = vmax.f32 %v3356_v59, %v3357_v8  ;;  %v3503_v60 = vunpack.c.l.b16 %v3459_v54 }
 0x3db   :  { %v3361_v51 = vsel %vm3346_vm6, %v3312_v16, -inf }
 0x3dc   :  { %v3359_v27 = vrot.slane %v3358_v33, 1  ;;  %v3362_v23 = vrot.slane %v3361_v51, 4 }
 0x3dd   :  { %v3272_v61 = vpop.f32.mrf.mxu2 }
 0x3de   :  { %v3360_v18 = vmax.f32 %v3358_v33, %v3359_v27  ;;  %v3363_v11 = vmax.f32 %v3361_v51, %v3362_v23  ;;  %v3273_v5 = vadd.f32 %v3272_v61, %v6195_v2  ;;  %v3230_v33 = vpop.f32.mrf.mxu1 }
 0x3e0   :  { %v3460_v14 = vpack.c.bf16 %v3360_v18, %v3360_v18  ;;  %v3364_v46 = vrot.slane %v3363_v11, 2  ;;  %v3313_v50 = vpop.f32.mrf.mxu3 }
 0x3e1   :  { %v3314_v37 = vadd.f32 %v3313_v50, %v3265_v43 }
 0x3e2   :  { %v3504_v9 = vunpack.c.l.b16 %v3460_v14  ;;  %v3365_v49 = vmax.f32 %v3363_v11, %v3364_v46 }
 0x3e3   :  { %v3368_v13 = vsel %vm3346_vm6, %v3314_v37, -inf }
 0x3e4   :  { %v3519_v6 = vsel %vm1031_vm0, %v3504_v9, %v3503_v60  ;;  %v3366_v26 = vrot.slane %v3365_v49, 1  ;;  %v3369_v36 = vrot.slane %v3368_v13, 4  ;;  %v4496_v9 = vld [vmem:[%s6325_s14 + $0x8] sm:$0xff] }
 0x3e5   :  { %v3274_v41 = vpop.f32.mrf.mxu2  ;;  %3567 = vmatpush.bf16.msra.mxu0 %v4496_v9 }
 0x3e6   :  { %v3367_v21 = vmax.f32 %v3365_v49, %v3366_v26  ;;  %v3370_v2 = vmax.f32 %v3368_v13, %v3369_v36  ;;  %v3275_v62 = vadd.f32 %v3274_v41, %v6203_v38  ;;  %v6255_v38 = vpop.f32.mrf.mxu0  ;;  %v3233_v26 = vpop.f32.mrf.mxu1 }
 0x3e8   :  { %v3461_v53 = vpack.c.bf16 %v3367_v21, %v3367_v21  ;;  %v3371_v3 = vrot.slane %v3370_v2, 2  ;;  %v3316_v29 = vpop.f32.mrf.mxu3 }
 0x3e9   :  { %v3317_v28 = vadd.f32 %v3316_v29, %v3268_v25 }
 0x3ea   :  { %v3505_v42 = vunpack.c.l.b16 %v3461_v53  ;;  %v3372_v55 = vmax.f32 %v3370_v2, %v3371_v3 }
 0x3eb   :  { %v3375_v4 = vsel %vm3346_vm6, %v3317_v28, -inf }
 0x3ec   :  { %v3520_v17 = vsel %vm1033_vm1, %v3505_v42, %v3519_v6  ;;  %v3373_v15 = vrot.slane %v3372_v55, 1  ;;  %v3376_v7 = vrot.slane %v3375_v4, 4 }
 0x3ed   :  { %v6261_v32 = vpop.f32.mrf.mxu2 }
 0x3ee   :  { %v3374_v30 = vmax.f32 %v3372_v55, %v3373_v15  ;;  %v3377_v12 = vmax.f32 %v3375_v4, %v3376_v7  ;;  %v3181_v8 = vpop.f32.mrf.mxu0  ;;  %v3235_v4 = vpop.f32.mrf.mxu1 }
 0x3f0   :  { %v3462_v31 = vpack.c.bf16 %v3374_v30, %v3374_v30  ;;  %v3378_v1 = vrot.slane %v3377_v12, 2  ;;  %v3318_v56 = vpop.f32.mrf.mxu3 }
 0x3f1   :  { %v3319_v43 = vadd.f32 %v3318_v56, %v3270_v52 }
 0x3f2   :  { %v3506_v47 = vunpack.c.l.b16 %v3462_v31  ;;  %v3379_v48 = vmax.f32 %v3377_v12, %v3378_v1 }
 0x3f3   :  { %v3382_v45 = vsel %vm3346_vm6, %v3319_v43, -inf  ;;  %v3182_v43 = vadd.f32 %v6143_v19, %v3181_v8 }
 0x3f4   :  { %v3521_v63 = vsel %vm1035_vm2, %v3506_v47, %v3520_v17  ;;  %v3380_v35 = vrot.slane %v3379_v48, 1  ;;  %v3383_v25 = vrot.slane %v3382_v45, 4 }
 0x3f5   :  { %v3279_v61 = vpop.f32.mrf.mxu2 }
 0x3f6   :  { %v3381_v24 = vmax.f32 %v3379_v48, %v3380_v35  ;;  %v3384_v10 = vmax.f32 %v3382_v45, %v3383_v25  ;;  %v3184_v49 = vpop.f32.mrf.mxu0  ;;  %v3238_v31 = vpop.f32.mrf.mxu1  ;;  %v3180_v48 = vadd.f32 %v6143_v19, %v6255_v38 }
 0x3f7   :  { %v3185_v47 = vadd.f32 %v6143_v19, %v3184_v49 }
 0x3f8   :  { %v3463_v20 = vpack.c.bf16 %v3381_v24, %v3381_v24  ;;  %v3385_v58 = vrot.slane %v3384_v10, 2  ;;  %v3321_v39 = vpop.f32.mrf.mxu3 }
 0x3f9   :  { %v3322_v0 = vadd.f32 %v3321_v39, %v3273_v5  ;;  %v3234_v24 = vadd.f32 %v3233_v26, %v3185_v47 }
 0x3fa   :  { %v3507_v34 = vunpack.c.l.b16 %v3463_v20  ;;  %v3386_v59 = vmax.f32 %v3384_v10, %v3385_v58  ;;  %v4495_v10 = vld [vmem:[%s6325_s14] sm:$0xff]  ;;  %v3229_v20 = vadd.f32 %v6258_v57, %v3180_v48 }
 0x3fb   :  { %v3389_v52 = vsel %vm3346_vm6, %v3322_v0, -inf  ;;  %3568 = vmatpush.bf16.msra.mxu0 %v4495_v10 }
 0x3fc   :  { %v3522_v22 = vsel %vm1037_vm3, %v3507_v34, %v3521_v63  ;;  %v3387_v16 = vrot.slane %v3386_v59, 1  ;;  %v3390_v44 = vrot.slane %v3389_v52, 4  ;;  %v3231_v63 = vadd.f32 %v3230_v33, %v3182_v43 }
 0x3fd   :  { %v3282_v2 = vpop.f32.mrf.mxu2  ;;  %v3278_v38 = vadd.f32 %v6261_v32, %v3229_v20 }
 0x3fe   :  { %v3388_v51 = vmax.f32 %v3386_v59, %v3387_v16  ;;  %v3391_v27 = vmax.f32 %v3389_v52, %v3390_v44  ;;  %v3186_v28 = vpop.f32.mrf.mxu0  ;;  %v3280_v39 = vadd.f32 %v3279_v61, %v3231_v63  ;;  %v3240_v34 = vpop.f32.mrf.mxu1  ;;  %v3283_v59 = vadd.f32 %v3282_v2, %v3234_v24 }
 0x3ff   :  { %v3187_v45 = vadd.f32 %v6143_v19, %v3186_v28 }
 0x400   :  { %v3464_v23 = vpack.c.bf16 %v3388_v51, %v3388_v51  ;;  %v3392_v54 = vrot.slane %v3391_v27, 2  ;;  %v3323_v18 = vpop.f32.mrf.mxu3 }
 0x401   :  { %v3324_v11 = vadd.f32 %v3323_v18, %v3275_v62  ;;  %v3236_v58 = vadd.f32 %v3235_v4, %v3187_v45 }
 0x402   :  { %v3508_v14 = vunpack.c.l.b16 %v3464_v23  ;;  %v3393_v46 = vmax.f32 %v3391_v27, %v3392_v54 }
 0x403   :  { %v3396_v5 = vsel %vm3346_vm6, %v3324_v11, -inf }
 0x404   :  { %v3523_v50 = vsel %vm1039_vm4, %v3508_v14, %v3522_v22  ;;  %v3394_v37 = vrot.slane %v3393_v46, 1  ;;  %v3397_v60 = vrot.slane %v3396_v5, 4 }
 0x405   :  { %v3284_v7 = vpop.f32.mrf.mxu2 }
 0x406   :  { %v3395_v13 = vmax.f32 %v3393_v46, %v3394_v37  ;;  %v3398_v6 = vmax.f32 %v3396_v5, %v3397_v60  ;;  %v3189_v12 = vpop.f32.mrf.mxu0  ;;  %v3285_v52 = vadd.f32 %v3284_v7, %v3236_v58  ;;  %v3243_v60 = vpop.f32.mrf.mxu1 }
 0x407   :  { %v3190_v35 = vadd.f32 %v6143_v19, %v3189_v12 }
 0x408   :  { %v3465_v36 = vpack.c.bf16 %v3395_v13, %v3395_v13  ;;  %v3399_v40 = vrot.slane %v3398_v6, 2  ;;  %v3326_v41 = vpop.f32.mrf.mxu3 }
 0x409   :  { %v3239_v0 = vadd.f32 %v3238_v31, %v3190_v35  ;;  %v3327_v51 = vadd.f32 %v3326_v41, %v3278_v38 }
 0x40a   :  { %v3509_v21 = vunpack.c.l.b16 %v3465_v36  ;;  %v3400_v62 = vmax.f32 %v3398_v6, %v3399_v40 }
 0x40b   :  { %v3403_v11 = vsel %vm3346_vm6, %v3327_v51, -inf }
 0x40c   :  { %v3524_v53 = vsel %vm1041_vm5, %v3509_v21, %v3523_v50  ;;  %v3401_v3 = vrot.slane %v3400_v62, 1  ;;  %v3404_v9 = vrot.slane %v3403_v11, 4 }
 0x40d   :  { %v3287_v1 = vpop.f32.mrf.mxu2 }
 0x40e   :  { %v3402_v29 = vmax.f32 %v3400_v62, %v3401_v3  ;;  %v3191_v25 = vpop.f32.mrf.mxu0  ;;  %v3288_v22 = vadd.f32 %v3287_v1, %v3239_v0  ;;  %v3405_v62 = vmax.f32 %v3403_v11, %v3404_v9  ;;  %v3245_v43 = vpop.f32.mrf.mxu1 }
 0x40f   :  { %v3192_v54 = vadd.f32 %v6143_v19, %v3191_v25 }
 0x410   :  { %v3466_v42 = vpack.c.bf16 %v3402_v29, %v3402_v29  ;;  %v3328_v55 = vpop.f32.mrf.mxu3 }
 0x411   :  { %v3329_v8 = vadd.f32 %v3328_v55, %v3280_v39  ;;  %v3241_v18 = vadd.f32 %v3240_v34, %v3192_v54 }
 0x412   :  { %v3510_v17 = vunpack.c.l.b16 %v3466_v42 }
 0x413   :  { %v3410_v57 = vsel %vm3346_vm6, %v3329_v8, -inf }
 0x414   :  { %v6272_v15 = vsel %vm6413_vm7, %v3510_v17, %v3524_v53  ;;  %v3411_v46 = vrot.slane %v3410_v57, 4 }
 0x415   :  { %v3289_v16 = vpop.f32.mrf.mxu2 }
 0x416   :  { %v3194_v14 = vpop.f32.mrf.mxu0  ;;  %v3290_v50 = vadd.f32 %v3289_v16, %v3241_v18  ;;  %v3412_v36 = vmax.f32 %v3410_v57, %v3411_v46 }
 0x417   :  { %v3195_v41 = vadd.f32 %v6143_v19, %v3194_v14 }
 0x418   :  { %v3331_v30 = vpop.f32.mrf.mxu3  ;;  %v3413_v42 = vrot.slane %v3412_v36, 2 }
 0x419   :  { %v3332_v44 = vadd.f32 %v3331_v30, %v3283_v59  ;;  %v3244_v29 = vadd.f32 %v3243_v60, %v3195_v41  ;;  %v3406_v30 = vrot.slane %v3405_v62, 2 }
 0x41a   :  { %v3414_v47 = vmax.f32 %v3412_v36, %v3413_v42 }
 0x41b   :  { %v3417_v61 = vsel %vm3346_vm6, %v3332_v44, -inf  ;;  %v3407_v25 = vmax.f32 %v3405_v62, %v3406_v30 }
 0x41c   :  { %v3418_v37 = vrot.slane %v3417_v61, 4  ;;  %v3415_v0 = vrot.slane %v3414_v47, 1 }
 0x41d   :  { %v3292_v40 = vpop.f32.mrf.mxu2  ;;  %v3408_v8 = vrot.slane %v3407_v25, 1 }
 0x41e   :  { %v3419_v21 = vmax.f32 %v3417_v61, %v3418_v37  ;;  %v3293_v17 = vadd.f32 %v3292_v40, %v3244_v29  ;;  %v3196_v7 = vpop.f32.mrf.mxu0  ;;  %v3416_v51 = vmax.f32 %v3414_v47, %v3415_v0  ;;  %v4552_v47 = vld [vmem:[%s6326_s15] ss:$0 sm:$0xff] }
 0x41f   :  { %v3197_v45 = vadd.f32 %v6143_v19, %v3196_v7  ;;  %v3409_v61 = vmax.f32 %v3407_v25, %v3408_v8 }
 0x420   :  { %v3333_v56 = vpop.f32.mrf.mxu3  ;;  %v3420_v4 = vrot.slane %v3419_v21, 2  ;;  %v3468_v46 = vpack.c.bf16 %v3416_v51, %v3416_v51 }
 0x421   :  { %v3334_v27 = vadd.f32 %v3333_v56, %v3285_v52  ;;  %v3246_v58 = vadd.f32 %v3245_v43, %v3197_v45  ;;  %v3467_v9 = vpack.c.bf16 %v3409_v61, %v3409_v61 }
 0x422   :  { %v3421_v63 = vmax.f32 %v3419_v21, %v3420_v4 }
 0x423   :  { %v3424_v32 = vsel %vm3346_vm6, %v3334_v27, -inf }
 0x424   :  { %v3425_v49 = vrot.slane %v3424_v32, 4  ;;  %v3422_v38 = vrot.slane %v3421_v63, 1 }
 0x425   :  { %v3294_v10 = vpop.f32.mrf.mxu2 }
 0x426   :  { %v3426_v53 = vmax.f32 %v3424_v32, %v3425_v49  ;;  %v3295_v52 = vadd.f32 %v3294_v10, %v3246_v58  ;;  %v3423_v54 = vmax.f32 %v3421_v63, %v3422_v38 }
 0x428   :  { %v3336_v33 = vpop.f32.mrf.mxu3  ;;  %v3427_v12 = vrot.slane %v3426_v53, 2  ;;  %v3469_v37 = vpack.c.bf16 %v3423_v54, %v3423_v54 }
 0x429   :  { %v3337_v23 = vadd.f32 %v3336_v33, %v3288_v22 }
 0x42a   :  { %v3428_v24 = vmax.f32 %v3426_v53, %v3427_v12  ;;  %v3513_v41 = vunpack.c.l.b16 %v3469_v37 }
 0x42b   :  { %v3431_v5 = vsel %vm3346_vm6, %v3337_v23, -inf }
 0x42c   :  { %v3432_v6 = vrot.slane %v3431_v5, 4  ;;  %v3429_v22 = vrot.slane %v3428_v24, 1 }
 0x42e   :  { %v3433_v28 = vmax.f32 %v3431_v5, %v3432_v6  ;;  %v3430_v18 = vmax.f32 %v3428_v24, %v3429_v22 }
 0x430   :  { %v3338_v13 = vpop.f32.mrf.mxu3  ;;  %v3434_v1 = vrot.slane %v3433_v28, 2  ;;  %v3470_v49 = vpack.c.bf16 %v3430_v18, %v3430_v18 }
 0x431   :  { %v3339_v26 = vadd.f32 %v3338_v13, %v3290_v50 }
 0x432   :  { %v3435_v39 = vmax.f32 %v3433_v28, %v3434_v1  ;;  %v3514_v62 = vunpack.c.l.b16 %v3470_v49 }
 0x433   :  { %v3438_v2 = vsel %vm3346_vm6, %v3339_v26, -inf  ;;  %v3512_v26 = vunpack.c.l.b16 %v3468_v46 }
 0x434   :  { %v3439_v3 = vrot.slane %v3438_v2, 4  ;;  %v3436_v33 = vrot.slane %v3435_v39, 1 }
 0x436   :  { %v3440_v55 = vmax.f32 %v3438_v2, %v3439_v3  ;;  %v3437_v14 = vmax.f32 %v3435_v39, %v3436_v33  ;;  %v3511_v2 = vunpack.c.l.b16 %v3467_v9 }
 0x438   :  { %v3341_v31 = vpop.f32.mrf.mxu3  ;;  %v3441_v48 = vrot.slane %v3440_v55, 2  ;;  %v3471_v6 = vpack.c.bf16 %v3437_v14, %v3437_v14  ;;  %v3526_v29 = vsel %vm1031_vm0, %v3512_v26, %v3511_v2  ;;  %vm3575_vm0 = vcmask 261120  }
 0x439   :  { %v3342_v56 = vadd.f32 %v3341_v31, %v3293_v17 }
 0x43a   :  { %v3442_v34 = vmax.f32 %v3440_v55, %v3441_v48  ;;  %v3515_v3 = vunpack.c.l.b16 %v3471_v6  ;;  %v3527_v55 = vsel %vm1033_vm1, %v3513_v41, %v3526_v29 }
 0x43b   :  { %v3445_v35 = vsel %vm3346_vm6, %v3342_v56, -inf  ;;  %v3528_v17 = vsel %vm1035_vm2, %v3514_v62, %v3527_v55 }
 0x43c   :  { %v3446_v20 = vrot.slane %v3445_v35, 4  ;;  %v3443_v27 = vrot.slane %v3442_v34, 1  ;;  %v3529_v30 = vsel %vm1037_vm3, %v3515_v3, %v3528_v17 }
 0x43e   :  { %v3447_v59 = vmax.f32 %v3445_v35, %v3446_v20  ;;  %v3444_v5 = vmax.f32 %v3442_v34, %v3443_v27 }
 0x440   :  { %v3448_v16 = vrot.slane %v3447_v59, 2  ;;  %v3343_v44 = vpop.f32.mrf.mxu3  ;;  %v3472_v36 = vpack.c.bf16 %v3444_v5, %v3444_v5 }
 0x441   :  { %v3344_v19 = vadd.f32 %v3343_v44, %v3295_v52 }
 0x442   :  { %v3449_v23 = vmax.f32 %v3447_v59, %v3448_v16  ;;  %v3516_v28 = vunpack.c.l.b16 %v3472_v36 }
 0x443   :  { %v3452_v57 = vsel %vm3346_vm6, %v3344_v19, -inf }
 0x444   :  { %v3450_v11 = vrot.slane %v3449_v23, 1  ;;  %v3453_v32 = vrot.slane %v3452_v57, 4  ;;  %v3530_v12 = vsel %vm1039_vm4, %v3516_v28, %v3529_v30 }
 0x446   :  { %v3454_v50 = vmax.f32 %v3452_v57, %v3453_v32  ;;  %v3451_v60 = vmax.f32 %v3449_v23, %v3450_v11 }
 0x448   :  { %v3455_v13 = vrot.slane %v3454_v50, 2  ;;  %v3473_v21 = vpack.c.bf16 %v3451_v60, %v3451_v60 }
 0x44a   :  { %v3456_v40 = vmax.f32 %v3454_v50, %v3455_v13  ;;  %v3517_v4 = vunpack.c.l.b16 %v3473_v21 }
 0x44c   :  { %v3457_v53 = vrot.slane %v3456_v40, 1  ;;  %v3531_v1 = vsel %vm1041_vm5, %v3517_v4, %v3530_v12 }
 0x44e   :  { %v3458_v42 = vmax.f32 %v3456_v40, %v3457_v53 }
 0x450   :  { %v3474_v7 = vpack.c.bf16 %v3458_v42, %v3458_v42 }
 0x452   :  { %v3518_v31 = vunpack.c.l.b16 %v3474_v7 }
 0x454   :  { %v3532_v56 = vsel %vm6414_vm8, %v3518_v31, %v3531_v1 }
 0x455   :  { %v3533_v43 = vpack.c.b16 %v3532_v56, %v6272_v15 }
 0x457   :  { %4318 = vmatmul.msk.bf16.vlgmr.msra.gmra.mxu0 %vm3346_vm6, %v3533_v43 }
 0x4d4   :  { %v3570_v48 = vpop.f32.mrf.mxu0 }
 0x4d5   :  { %v3571_v45 = vadd.f32 %v4552_v47, %v3570_v48 }
 0x4d7   :  { %3576 = vst.msk [vmem:[#allocation7] sm:$0xff] %vm3575_vm0, %v3571_v45 }
 0x4dc   :  { %v3572_v63 = vpop.f32.mrf.mxu0 }
 0x4dd   :  { %v3573_v15 = vadd.f32 %v4552_v47, %v3572_v63 }
 0x4df   :  { %3577 = vst.msk [vmem:[#allocation7 + $0x8] sm:$0xff] %vm3575_vm0, %v3573_v15 }
 0x4e0   :  { %3590 = dma.vmem_to_hbm [thread:$0]  %s3583_s5, 256, %s3585_s2, [#allocation4], %s4642_s19, %s4642_s19, %s4643_s3  }
 0x4e1   :  { %4632 = dma.done.wait [#allocation4], 256  }
 0x4e2   :  { %4633 = vsyncadd [#allocation4], 4294967040 }
 0x4e3   :  { %3595 = vsyncpa [#allocation3], 1 }
 0x4e4   :  { %3596 = vsyncpa [#allocation6], 1 }
 0x4e5   :  { %3597 = vsyncpa [#allocation4], 1 }

</bundles_post_ra>
